<compile_context>
chip_gen: v7x
topology: tpu7x:2x2x1
jax: 0.10.0
libtpu: 0.0.40
codegen_flags: <defaults>
</compile_context>

<pallas_src>
import functools
import math

import jax
import jax.numpy as jnp
from jax.experimental import pallas as pl
from jax.experimental.pallas import tpu as pltpu

# ----------------------------- model sizes ---------------------------------
B = 2          # batch
L = 8          # decoder (target) sequence length
S = 16         # encoder (cross) sequence length
D_MODEL = 32
N_HEADS = 4
D_FF = 64
C_OUT = 8
N_LAYERS = 2
EPS = 1e-5
OUT_PAD = 128  # lane-dense padded output width (sliced back to C_OUT outside)

# Packing orders for the parameter slabs.
ATTN_ORDER = ("sWq", "sWk", "sWv", "sWo", "cWq", "cWk", "cWv", "cWo")
VEC_ORDER = ("sbq", "sbk", "sbv", "sbo", "cbq", "cbk", "cbv", "cbo",
             "n1g", "n1b", "n2g", "n2b", "n3g", "n3b", "b2")


# --------------------------- in-kernel helpers ------------------------------
def _layernorm(x, gamma, beta):
    mu = jnp.mean(x, axis=-1, keepdims=True)
    var = jnp.mean((x - mu) ** 2, axis=-1, keepdims=True)
    return (x - mu) * jax.lax.rsqrt(var + EPS) * gamma + beta


def _mha(q_in, kv_in, Wq, bq, Wk, bk, Wv, bv, Wo, bo, n_heads):
    # q_in: (L, D), kv_in: (S, D); full (unmasked) attention, scale 1/sqrt(E).
    Lq, D = q_in.shape
    E = D // n_heads
    q = jnp.dot(q_in, Wq, preferred_element_type=jnp.float32) + bq
    k = jnp.dot(kv_in, Wk, preferred_element_type=jnp.float32) + bk
    v = jnp.dot(kv_in, Wv, preferred_element_type=jnp.float32) + bv
    scale = 1.0 / math.sqrt(E)
    out = jnp.zeros((Lq, D), jnp.float32)
    for h in range(n_heads):
        qh = q[:, h * E:(h + 1) * E]
        kh = k[:, h * E:(h + 1) * E]
        vh = v[:, h * E:(h + 1) * E]
        # qh @ kh.T without an explicit transpose
        scores = jax.lax.dot_general(
            qh, kh, (((1,), (1,)), ((), ())),
            preferred_element_type=jnp.float32) * scale
        m = jnp.max(scores, axis=-1, keepdims=True)
        p = jnp.exp(scores - m)
        p = p * pl.reciprocal(jnp.sum(p, axis=-1, keepdims=True), approx=True)
        attn_h = jnp.dot(p, vh, preferred_element_type=jnp.float32)  # (L, E)
        # Fold the output projection into the head loop: no lane concat.
        out = out + jnp.dot(attn_h, Wo[h * E:(h + 1) * E, :],
                            preferred_element_type=jnp.float32)
    return out + bo


# ------------------------------- kernel --------------------------------------
def decoder_kernel(x_ref, cross_ref,
                   attn_w_ref,    # (N_LAYERS, 8, D, D)   qkv/o weights (self+cross)
                   vec_ref,       # (N_LAYERS, 15, D)     biases / LN params / b2
                   ffn_w1_ref,    # (N_LAYERS, D, D_FF)
                   ffn_w2_ref,    # (N_LAYERS, D_FF, D)
                   b1_ref,        # (N_LAYERS, D_FF)
                   fin_ln_ref,    # (2, D)                final LN gamma/beta
                   fin_proj_ref,  # (D+1, OUT_PAD)        padded proj W (rows 0..D-1) + bias (row D)
                   out_ref, *, n_heads, n_layers):
    x = x_ref[0].astype(jnp.float32)          # (L, D)
    cross = cross_ref[0].astype(jnp.float32)  # (S, D)

    for l in range(n_layers):
        vec = vec_ref[l]                      # (15, D)

        def V(i, _vec=vec):                   # (1, D) row slice
            return _vec[i:i + 1]

        # x = x + SelfAttn(x, x, x)      (dropout is identity in eval)
        x = x + _mha(x, x,
                     attn_w_ref[l, 0], V(0), attn_w_ref[l, 1], V(1),
                     attn_w_ref[l, 2], V(2), attn_w_ref[l, 3], V(3), n_heads)
        x = _layernorm(x, V(8), V(9))

        # x = x + CrossAttn(x, cross, cross)
        x = x + _mha(x, cross,
                     attn_w_ref[l, 4], V(4), attn_w_ref[l, 5], V(5),
                     attn_w_ref[l, 6], V(6), attn_w_ref[l, 7], V(7), n_heads)
        x = _layernorm(x, V(10), V(11))

        # FFN: conv1d(k=1) -> relu -> conv1d(k=1)
        y = jnp.maximum(
            jnp.dot(x, ffn_w1_ref[l], preferred_element_type=jnp.float32)
            + b1_ref[l:l + 1], 0.0)
        y = jnp.dot(y, ffn_w2_ref[l], preferred_element_type=jnp.float32) + V(14)
        x = _layernorm(x + y, V(12), V(13))

    # final LayerNorm + Linear projection (lane-dense padded output)
    x = _layernorm(x, fin_ln_ref[0:1], fin_ln_ref[1:2])
    fp = fin_proj_ref[...]
    out = jnp.dot(x, fp[:D_MODEL], preferred_element_type=jnp.float32) \
        + fp[D_MODEL:D_MODEL + 1]
    out_ref[0] = out.astype(out_ref.dtype)


# ----------------------------- host wrapper ----------------------------------
def _full_block(arr):
    nd = arr.ndim
    return pl.BlockSpec(arr.shape, lambda b, _nd=nd: (0,) * _nd)


@jax.jit
def decoder_forward(x, cross, packed):
    weights = list(packed)
    in_specs = [
        pl.BlockSpec((1, L, D_MODEL), lambda b: (b, 0, 0)),
        pl.BlockSpec((1, S, D_MODEL), lambda b: (b, 0, 0)),
    ] + [_full_block(w) for w in weights]

    out = pl.pallas_call(
        functools.partial(decoder_kernel, n_heads=N_HEADS, n_layers=N_LAYERS),
        out_shape=jax.ShapeDtypeStruct((B, L, OUT_PAD), jnp.float32),
        grid_spec=pltpu.PrefetchScalarGridSpec(
            num_scalar_prefetch=0,
            grid=(B,),   # batch-parallel: one TC per batch element on v7x
            in_specs=in_specs,
            out_specs=pl.BlockSpec((1, L, OUT_PAD), lambda b: (b, 0, 0)),
        ),
        compiler_params=pltpu.CompilerParams(
            dimension_semantics=("parallel",)),
    )(x, cross, *weights)
    return out[:, :, :C_OUT]   # slice the lane-dense padded output


# ------------------------------ param packing ---------------------------------
def pack_params(layer_params, final_params):
    attn_w = jnp.stack(
        [jnp.stack([p[k] for k in ATTN_ORDER]) for p in layer_params])
    vec = jnp.stack(
        [jnp.stack([p[k] for k in VEC_ORDER]) for p in layer_params])
    ffn_w1 = jnp.stack([p["w1"] for p in layer_params])
    ffn_w2 = jnp.stack([p["w2"] for p in layer_params])
    b1 = jnp.stack([p["b1"] for p in layer_params])
    fin_ln = jnp.stack([final_params["ng"], final_params["nb"]])
    fin_proj = jnp.zeros((D_MODEL + 1, OUT_PAD), jnp.float32)
    fin_proj = fin_proj.at[:D_MODEL, :C_OUT].set(final_params["pw"])
    fin_proj = fin_proj.at[D_MODEL, :C_OUT].set(final_params["pb"])
    return (attn_w, vec, ffn_w1, ffn_w2, b1, fin_ln, fin_proj)


# -------------------------- plain-JAX reference ------------------------------
def _mha_ref(q_in, kv_in, Wq, bq, Wk, bk, Wv, bv, Wo, bo, n_heads):
    D = q_in.shape[-1]
    E = D // n_heads
    q = q_in @ Wq + bq
    k = kv_in @ Wk + bk
    v = kv_in @ Wv + bv
    outs = []
    for h in range(n_heads):
        qh, kh, vh = (t[:, h * E:(h + 1) * E] for t in (q, k, v))
        sc = (qh @ kh.T) / math.sqrt(E)
        p = jax.nn.softmax(sc, axis=-1)
        outs.append(p @ vh)
    return jnp.concatenate(outs, axis=-1) @ Wo + bo


def _ln_ref(x, g, b):
    mu = jnp.mean(x, axis=-1, keepdims=True)
    var = jnp.mean((x - mu) ** 2, axis=-1, keepdims=True)
    return (x - mu) * jax.lax.rsqrt(var + EPS) * g + b


def decoder_ref(x, cross, layer_params, final_params):
    def one_batch(xb, cb):
        for p in layer_params:
            xb = xb + _mha_ref(xb, xb, p["sWq"], p["sbq"], p["sWk"], p["sbk"],
                               p["sWv"], p["sbv"], p["sWo"], p["sbo"], N_HEADS)
            xb = _ln_ref(xb, p["n1g"], p["n1b"])
            xb = xb + _mha_ref(xb, cb, p["cWq"], p["cbq"], p["cWk"], p["cbk"],
                               p["cWv"], p["cbv"], p["cWo"], p["cbo"], N_HEADS)
            xb = _ln_ref(xb, p["n2g"], p["n2b"])
            y = jnp.maximum(xb @ p["w1"] + p["b1"], 0.0) @ p["w2"] + p["b2"]
            xb = _ln_ref(xb + y, p["n3g"], p["n3b"])
        xb = _ln_ref(xb, final_params["ng"], final_params["nb"])
        return xb @ final_params["pw"] + final_params["pb"]
    return jnp.stack([one_batch(x[b], cross[b]) for b in range(B)], axis=0)


# ------------------------------ param init -----------------------------------
def make_params(key):
    def dense(k, fan_in, fan_out):
        return (jax.random.normal(k, (fan_in, fan_out), jnp.float32)
                / math.sqrt(fan_in))

    layer_params = []
    for _ in range(N_LAYERS):
        keys = jax.random.split(key, 13)
        key = keys[0]
        p = {}
        # self-attention
        p["sWq"] = dense(keys[1], D_MODEL, D_MODEL); p["sbq"] = jnp.zeros((D_MODEL,), jnp.float32)
        p["sWk"] = dense(keys[2], D_MODEL, D_MODEL); p["sbk"] = jnp.zeros((D_MODEL,), jnp.float32)
        p["sWv"] = dense(keys[3], D_MODEL, D_MODEL); p["sbv"] = jnp.zeros((D_MODEL,), jnp.float32)
        p["sWo"] = dense(keys[4], D_MODEL, D_MODEL); p["sbo"] = jnp.zeros((D_MODEL,), jnp.float32)
        # cross-attention
        p["cWq"] = dense(keys[5], D_MODEL, D_MODEL); p["cbq"] = jnp.zeros((D_MODEL,), jnp.float32)
        p["cWk"] = dense(keys[6], D_MODEL, D_MODEL); p["cbk"] = jnp.zeros((D_MODEL,), jnp.float32)
        p["cWv"] = dense(keys[7], D_MODEL, D_MODEL); p["cbv"] = jnp.zeros((D_MODEL,), jnp.float32)
        p["cWo"] = dense(keys[8], D_MODEL, D_MODEL); p["cbo"] = jnp.zeros((D_MODEL,), jnp.float32)
        # layernorms
        for n in ("n1", "n2", "n3"):
            p[n + "g"] = jnp.ones((D_MODEL,), jnp.float32)
            p[n + "b"] = jnp.zeros((D_MODEL,), jnp.float32)
        # FFN (conv1d kernel_size=1 == per-token linear)
        p["w1"] = dense(keys[9], D_MODEL, D_FF);  p["b1"] = 0.01 * jnp.ones((D_FF,), jnp.float32)
        p["w2"] = dense(keys[10], D_FF, D_MODEL); p["b2"] = 0.01 * jnp.ones((D_MODEL,), jnp.float32)
        layer_params.append(p)

    kf1, kf2 = jax.random.split(key, 2)
    final_params = {
        "ng": jnp.ones((D_MODEL,), jnp.float32),
        "nb": jnp.zeros((D_MODEL,), jnp.float32),
        "pw": dense(kf1, D_MODEL, C_OUT),
        "pb": 0.01 * jnp.ones((C_OUT,), jnp.float32),
    }
    return layer_params, final_params


# --------------------------------- main --------------------------------------
if __name__ == "__main__":
    key = jax.random.PRNGKey(0)
    kx, kc, kp = jax.random.split(key, 3)
    x = jax.random.normal(kx, (B, L, D_MODEL), jnp.float32)
    cross = jax.random.normal(kc, (B, S, D_MODEL), jnp.float32)
    layer_params, final_params = make_params(kp)
    packed = pack_params(layer_params, final_params)

    out = decoder_forward(x, cross, packed)
    out = jax.block_until_ready(out)
    assert out.shape == (B, L, C_OUT)

    # High-precision reference; kernel uses default (fast) matmul precision.
    with jax.default_matmul_precision("highest"):
        ref = decoder_ref(x, cross, layer_params, final_params)

    max_diff = jnp.max(jnp.abs(out - ref))
    assert jnp.allclose(out, ref, atol=2e-2, rtol=2e-2), \
        f"max abs diff {max_diff}"

    print("KERNEL_OK")
</pallas_src>

<mosaic_0001>
module attributes {stable_mosaic.version = 11 : i64} {
  func.func @decoder_kernel(%arg0: i32, %arg1: memref<1x8x32xf32, #tpu.memory_space<vmem>>, %arg2: memref<1x16x32xf32, #tpu.memory_space<vmem>>, %arg3: memref<2x8x32x32xf32, #tpu.memory_space<vmem>>, %arg4: memref<2x15x32xf32, #tpu.memory_space<vmem>>, %arg5: memref<2x32x64xf32, #tpu.memory_space<vmem>>, %arg6: memref<2x64x32xf32, #tpu.memory_space<vmem>>, %arg7: memref<2x64xf32, #tpu.memory_space<vmem>>, %arg8: memref<2x32xf32, #tpu.memory_space<vmem>>, %arg9: memref<33x128xf32, #tpu.memory_space<vmem>>, %arg10: memref<1x8x128xf32, #tpu.memory_space<vmem>>) attributes {dimension_semantics = [#tpu.dimension_semantics<parallel>], iteration_bounds = array<i64: 2>, scalar_prefetch = 0 : i64, scratch_operands = 0 : i64, tpu.core_type = #tpu.core_type<tc>, window_params = [{transform_indices = @transform_0, window_bounds = array<i64: 1, 8, 32>}, {transform_indices = @transform_1, window_bounds = array<i64: 1, 16, 32>}, {pipeline_mode = #tpu.pipeline_mode<synchronous>, transform_indices = @transform_2, window_bounds = array<i64: 2, 8, 32, 32>}, {pipeline_mode = #tpu.pipeline_mode<synchronous>, transform_indices = @transform_3, window_bounds = array<i64: 2, 15, 32>}, {pipeline_mode = #tpu.pipeline_mode<synchronous>, transform_indices = @transform_4, window_bounds = array<i64: 2, 32, 64>}, {pipeline_mode = #tpu.pipeline_mode<synchronous>, transform_indices = @transform_5, window_bounds = array<i64: 2, 64, 32>}, {pipeline_mode = #tpu.pipeline_mode<synchronous>, transform_indices = @transform_6, window_bounds = array<i64: 2, 64>}, {pipeline_mode = #tpu.pipeline_mode<synchronous>, transform_indices = @transform_7, window_bounds = array<i64: 2, 32>}, {pipeline_mode = #tpu.pipeline_mode<synchronous>, transform_indices = @transform_8, window_bounds = array<i64: 33, 128>}, {transform_indices = @transform_9, window_bounds = array<i64: 1, 8, 128>}]} {
    %c0 = arith.constant 0 : index
    %c0_0 = arith.constant 0 : index
    %c0_1 = arith.constant 0 : index
    %0 = vector.load %arg1[%c0, %c0_0, %c0_1] : memref<1x8x32xf32, #tpu.memory_space<vmem>>, vector<1x8x32xf32>
    %1 = vector.shape_cast %0 : vector<1x8x32xf32> to vector<8x32xf32>
    %c0_2 = arith.constant 0 : index
    %c0_3 = arith.constant 0 : index
    %c0_4 = arith.constant 0 : index
    %2 = vector.load %arg2[%c0_2, %c0_3, %c0_4] : memref<1x16x32xf32, #tpu.memory_space<vmem>>, vector<1x16x32xf32>
    %3 = vector.shape_cast %2 : vector<1x16x32xf32> to vector<16x32xf32>
    %c0_5 = arith.constant 0 : index
    %c0_6 = arith.constant 0 : index
    %c0_7 = arith.constant 0 : index
    %4 = vector.load %arg4[%c0_5, %c0_6, %c0_7] : memref<2x15x32xf32, #tpu.memory_space<vmem>>, vector<1x15x32xf32>
    %5 = vector.shape_cast %4 : vector<1x15x32xf32> to vector<15x32xf32>
    %c0_8 = arith.constant 0 : index
    %c0_9 = arith.constant 0 : index
    %c0_10 = arith.constant 0 : index
    %c0_11 = arith.constant 0 : index
    %6 = vector.load %arg3[%c0_8, %c0_9, %c0_10, %c0_11] : memref<2x8x32x32xf32, #tpu.memory_space<vmem>>, vector<1x1x32x32xf32>
    %7 = vector.shape_cast %6 : vector<1x1x32x32xf32> to vector<32x32xf32>
    %8 = vector.extract_strided_slice %5 {offsets = [0, 0], sizes = [1, 32], strides = [1, 1]} : vector<15x32xf32> to vector<1x32xf32>
    %c0_12 = arith.constant 0 : index
    %c1 = arith.constant 1 : index
    %c0_13 = arith.constant 0 : index
    %c0_14 = arith.constant 0 : index
    %9 = vector.load %arg3[%c0_12, %c1, %c0_13, %c0_14] : memref<2x8x32x32xf32, #tpu.memory_space<vmem>>, vector<1x1x32x32xf32>
    %10 = vector.shape_cast %9 : vector<1x1x32x32xf32> to vector<32x32xf32>
    %11 = vector.extract_strided_slice %5 {offsets = [1, 0], sizes = [1, 32], strides = [1, 1]} : vector<15x32xf32> to vector<1x32xf32>
    %c0_15 = arith.constant 0 : index
    %c2 = arith.constant 2 : index
    %c0_16 = arith.constant 0 : index
    %c0_17 = arith.constant 0 : index
    %12 = vector.load %arg3[%c0_15, %c2, %c0_16, %c0_17] : memref<2x8x32x32xf32, #tpu.memory_space<vmem>>, vector<1x1x32x32xf32>
    %13 = vector.shape_cast %12 : vector<1x1x32x32xf32> to vector<32x32xf32>
    %14 = vector.extract_strided_slice %5 {offsets = [2, 0], sizes = [1, 32], strides = [1, 1]} : vector<15x32xf32> to vector<1x32xf32>
    %c0_18 = arith.constant 0 : index
    %c3 = arith.constant 3 : index
    %c0_19 = arith.constant 0 : index
    %c0_20 = arith.constant 0 : index
    %15 = vector.load %arg3[%c0_18, %c3, %c0_19, %c0_20] : memref<2x8x32x32xf32, #tpu.memory_space<vmem>>, vector<1x1x32x32xf32>
    %16 = vector.shape_cast %15 : vector<1x1x32x32xf32> to vector<32x32xf32>
    %17 = vector.extract_strided_slice %5 {offsets = [3, 0], sizes = [1, 32], strides = [1, 1]} : vector<15x32xf32> to vector<1x32xf32>
    %cst = arith.constant dense<0.000000e+00> : vector<8x32xf32>
    %18 = tpu.matmul %1, %7, %cst {dimension_numbers = #tpu.dot_dimension_numbers<[1], [0], [0], [1], [0, 0, 1, 1], [], []>} : vector<8x32xf32>, vector<32x32xf32>, vector<8x32xf32> -> vector<8x32xf32>
    %19 = vector.broadcast %8 : vector<1x32xf32> to vector<8x32xf32>
    %20 = arith.addf %18, %19 : vector<8x32xf32>
    %cst_21 = arith.constant dense<0.000000e+00> : vector<8x32xf32>
    %21 = tpu.matmul %1, %10, %cst_21 {dimension_numbers = #tpu.dot_dimension_numbers<[1], [0], [0], [1], [0, 0, 1, 1], [], []>} : vector<8x32xf32>, vector<32x32xf32>, vector<8x32xf32> -> vector<8x32xf32>
    %22 = vector.broadcast %11 : vector<1x32xf32> to vector<8x32xf32>
    %23 = arith.addf %21, %22 : vector<8x32xf32>
    %cst_22 = arith.constant dense<0.000000e+00> : vector<8x32xf32>
    %24 = tpu.matmul %1, %13, %cst_22 {dimension_numbers = #tpu.dot_dimension_numbers<[1], [0], [0], [1], [0, 0, 1, 1], [], []>} : vector<8x32xf32>, vector<32x32xf32>, vector<8x32xf32> -> vector<8x32xf32>
    %25 = vector.broadcast %14 : vector<1x32xf32> to vector<8x32xf32>
    %26 = arith.addf %24, %25 : vector<8x32xf32>
    %cst_23 = arith.constant 0.000000e+00 : f32
    %27 = vector.broadcast %cst_23 : f32 to vector<8x32xf32>
    %28 = vector.extract_strided_slice %20 {offsets = [0, 0], sizes = [8, 8], strides = [1, 1]} : vector<8x32xf32> to vector<8x8xf32>
    %29 = vector.extract_strided_slice %23 {offsets = [0, 0], sizes = [8, 8], strides = [1, 1]} : vector<8x32xf32> to vector<8x8xf32>
    %30 = vector.extract_strided_slice %26 {offsets = [0, 0], sizes = [8, 8], strides = [1, 1]} : vector<8x32xf32> to vector<8x8xf32>
    %cst_24 = arith.constant dense<0.000000e+00> : vector<8x8xf32>
    %31 = tpu.matmul %28, %29, %cst_24 {dimension_numbers = #tpu.dot_dimension_numbers<[1], [1], [0], [0], [0, 0, 1, 0], [], []>} : vector<8x8xf32>, vector<8x8xf32>, vector<8x8xf32> -> vector<8x8xf32>
    %cst_25 = arith.constant 0.353553385 : f32
    %32 = vector.broadcast %cst_25 : f32 to vector<8x8xf32>
    %33 = arith.mulf %31, %32 : vector<8x8xf32>
    %cst_26 = arith.constant dense<0xFF800000> : vector<8xf32>
    %34 = vector.multi_reduction <maximumf>, %33, %cst_26 [1] : vector<8x8xf32> to vector<8xf32>
    %35 = vector.shape_cast %34 : vector<8xf32> to vector<8x1xf32>
    %36 = vector.broadcast %35 : vector<8x1xf32> to vector<8x8xf32>
    %37 = arith.subf %33, %36 : vector<8x8xf32>
    %38 = math.exp %37 : vector<8x8xf32>
    %cst_27 = arith.constant dense<0.000000e+00> : vector<8xf32>
    %39 = vector.multi_reduction <add>, %38, %cst_27 [1] : vector<8x8xf32> to vector<8xf32>
    %40 = vector.shape_cast %39 : vector<8xf32> to vector<8x1xf32>
    %41 = tpu.reciprocal %40 {approx = true} : vector<8x1xf32> -> vector<8x1xf32>
    %42 = vector.broadcast %41 : vector<8x1xf32> to vector<8x8xf32>
    %43 = arith.mulf %38, %42 : vector<8x8xf32>
    %cst_28 = arith.constant dense<0.000000e+00> : vector<8x8xf32>
    %44 = tpu.matmul %43, %30, %cst_28 {dimension_numbers = #tpu.dot_dimension_numbers<[1], [0], [0], [1], [0, 0, 1, 1], [], []>} : vector<8x8xf32>, vector<8x8xf32>, vector<8x8xf32> -> vector<8x8xf32>
    %45 = vector.extract_strided_slice %16 {offsets = [0, 0], sizes = [8, 32], strides = [1, 1]} : vector<32x32xf32> to vector<8x32xf32>
    %cst_29 = arith.constant dense<0.000000e+00> : vector<8x32xf32>
    %46 = tpu.matmul %44, %45, %cst_29 {dimension_numbers = #tpu.dot_dimension_numbers<[1], [0], [0], [1], [0, 0, 1, 1], [], []>} : vector<8x8xf32>, vector<8x32xf32>, vector<8x32xf32> -> vector<8x32xf32>
    %47 = arith.addf %27, %46 : vector<8x32xf32>
    %48 = vector.extract_strided_slice %20 {offsets = [0, 8], sizes = [8, 8], strides = [1, 1]} : vector<8x32xf32> to vector<8x8xf32>
    %49 = vector.extract_strided_slice %23 {offsets = [0, 8], sizes = [8, 8], strides = [1, 1]} : vector<8x32xf32> to vector<8x8xf32>
    %50 = vector.extract_strided_slice %26 {offsets = [0, 8], sizes = [8, 8], strides = [1, 1]} : vector<8x32xf32> to vector<8x8xf32>
    %cst_30 = arith.constant dense<0.000000e+00> : vector<8x8xf32>
    %51 = tpu.matmul %48, %49, %cst_30 {dimension_numbers = #tpu.dot_dimension_numbers<[1], [1], [0], [0], [0, 0, 1, 0], [], []>} : vector<8x8xf32>, vector<8x8xf32>, vector<8x8xf32> -> vector<8x8xf32>
    %cst_31 = arith.constant 0.353553385 : f32
    %52 = vector.broadcast %cst_31 : f32 to vector<8x8xf32>
    %53 = arith.mulf %51, %52 : vector<8x8xf32>
    %cst_32 = arith.constant dense<0xFF800000> : vector<8xf32>
    %54 = vector.multi_reduction <maximumf>, %53, %cst_32 [1] : vector<8x8xf32> to vector<8xf32>
    %55 = vector.shape_cast %54 : vector<8xf32> to vector<8x1xf32>
    %56 = vector.broadcast %55 : vector<8x1xf32> to vector<8x8xf32>
    %57 = arith.subf %53, %56 : vector<8x8xf32>
    %58 = math.exp %57 : vector<8x8xf32>
    %cst_33 = arith.constant dense<0.000000e+00> : vector<8xf32>
    %59 = vector.multi_reduction <add>, %58, %cst_33 [1] : vector<8x8xf32> to vector<8xf32>
    %60 = vector.shape_cast %59 : vector<8xf32> to vector<8x1xf32>
    %61 = tpu.reciprocal %60 {approx = true} : vector<8x1xf32> -> vector<8x1xf32>
    %62 = vector.broadcast %61 : vector<8x1xf32> to vector<8x8xf32>
    %63 = arith.mulf %58, %62 : vector<8x8xf32>
    %cst_34 = arith.constant dense<0.000000e+00> : vector<8x8xf32>
    %64 = tpu.matmul %63, %50, %cst_34 {dimension_numbers = #tpu.dot_dimension_numbers<[1], [0], [0], [1], [0, 0, 1, 1], [], []>} : vector<8x8xf32>, vector<8x8xf32>, vector<8x8xf32> -> vector<8x8xf32>
    %65 = vector.extract_strided_slice %16 {offsets = [8, 0], sizes = [8, 32], strides = [1, 1]} : vector<32x32xf32> to vector<8x32xf32>
    %cst_35 = arith.constant dense<0.000000e+00> : vector<8x32xf32>
    %66 = tpu.matmul %64, %65, %cst_35 {dimension_numbers = #tpu.dot_dimension_numbers<[1], [0], [0], [1], [0, 0, 1, 1], [], []>} : vector<8x8xf32>, vector<8x32xf32>, vector<8x32xf32> -> vector<8x32xf32>
    %67 = arith.addf %47, %66 : vector<8x32xf32>
    %68 = vector.extract_strided_slice %20 {offsets = [0, 16], sizes = [8, 8], strides = [1, 1]} : vector<8x32xf32> to vector<8x8xf32>
    %69 = vector.extract_strided_slice %23 {offsets = [0, 16], sizes = [8, 8], strides = [1, 1]} : vector<8x32xf32> to vector<8x8xf32>
    %70 = vector.extract_strided_slice %26 {offsets = [0, 16], sizes = [8, 8], strides = [1, 1]} : vector<8x32xf32> to vector<8x8xf32>
    %cst_36 = arith.constant dense<0.000000e+00> : vector<8x8xf32>
    %71 = tpu.matmul %68, %69, %cst_36 {dimension_numbers = #tpu.dot_dimension_numbers<[1], [1], [0], [0], [0, 0, 1, 0], [], []>} : vector<8x8xf32>, vector<8x8xf32>, vector<8x8xf32> -> vector<8x8xf32>
    %cst_37 = arith.constant 0.353553385 : f32
    %72 = vector.broadcast %cst_37 : f32 to vector<8x8xf32>
    %73 = arith.mulf %71, %72 : vector<8x8xf32>
    %cst_38 = arith.constant dense<0xFF800000> : vector<8xf32>
    %74 = vector.multi_reduction <maximumf>, %73, %cst_38 [1] : vector<8x8xf32> to vector<8xf32>
    %75 = vector.shape_cast %74 : vector<8xf32> to vector<8x1xf32>
    %76 = vector.broadcast %75 : vector<8x1xf32> to vector<8x8xf32>
    %77 = arith.subf %73, %76 : vector<8x8xf32>
    %78 = math.exp %77 : vector<8x8xf32>
    %cst_39 = arith.constant dense<0.000000e+00> : vector<8xf32>
    %79 = vector.multi_reduction <add>, %78, %cst_39 [1] : vector<8x8xf32> to vector<8xf32>
    %80 = vector.shape_cast %79 : vector<8xf32> to vector<8x1xf32>
    %81 = tpu.reciprocal %80 {approx = true} : vector<8x1xf32> -> vector<8x1xf32>
    %82 = vector.broadcast %81 : vector<8x1xf32> to vector<8x8xf32>
    %83 = arith.mulf %78, %82 : vector<8x8xf32>
    %cst_40 = arith.constant dense<0.000000e+00> : vector<8x8xf32>
    %84 = tpu.matmul %83, %70, %cst_40 {dimension_numbers = #tpu.dot_dimension_numbers<[1], [0], [0], [1], [0, 0, 1, 1], [], []>} : vector<8x8xf32>, vector<8x8xf32>, vector<8x8xf32> -> vector<8x8xf32>
    %85 = vector.extract_strided_slice %16 {offsets = [16, 0], sizes = [8, 32], strides = [1, 1]} : vector<32x32xf32> to vector<8x32xf32>
    %cst_41 = arith.constant dense<0.000000e+00> : vector<8x32xf32>
    %86 = tpu.matmul %84, %85, %cst_41 {dimension_numbers = #tpu.dot_dimension_numbers<[1], [0], [0], [1], [0, 0, 1, 1], [], []>} : vector<8x8xf32>, vector<8x32xf32>, vector<8x32xf32> -> vector<8x32xf32>
    %87 = arith.addf %67, %86 : vector<8x32xf32>
    %88 = vector.extract_strided_slice %20 {offsets = [0, 24], sizes = [8, 8], strides = [1, 1]} : vector<8x32xf32> to vector<8x8xf32>
    %89 = vector.extract_strided_slice %23 {offsets = [0, 24], sizes = [8, 8], strides = [1, 1]} : vector<8x32xf32> to vector<8x8xf32>
    %90 = vector.extract_strided_slice %26 {offsets = [0, 24], sizes = [8, 8], strides = [1, 1]} : vector<8x32xf32> to vector<8x8xf32>
    %cst_42 = arith.constant dense<0.000000e+00> : vector<8x8xf32>
    %91 = tpu.matmul %88, %89, %cst_42 {dimension_numbers = #tpu.dot_dimension_numbers<[1], [1], [0], [0], [0, 0, 1, 0], [], []>} : vector<8x8xf32>, vector<8x8xf32>, vector<8x8xf32> -> vector<8x8xf32>
    %cst_43 = arith.constant 0.353553385 : f32
    %92 = vector.broadcast %cst_43 : f32 to vector<8x8xf32>
    %93 = arith.mulf %91, %92 : vector<8x8xf32>
    %cst_44 = arith.constant dense<0xFF800000> : vector<8xf32>
    %94 = vector.multi_reduction <maximumf>, %93, %cst_44 [1] : vector<8x8xf32> to vector<8xf32>
    %95 = vector.shape_cast %94 : vector<8xf32> to vector<8x1xf32>
    %96 = vector.broadcast %95 : vector<8x1xf32> to vector<8x8xf32>
    %97 = arith.subf %93, %96 : vector<8x8xf32>
    %98 = math.exp %97 : vector<8x8xf32>
    %cst_45 = arith.constant dense<0.000000e+00> : vector<8xf32>
    %99 = vector.multi_reduction <add>, %98, %cst_45 [1] : vector<8x8xf32> to vector<8xf32>
    %100 = vector.shape_cast %99 : vector<8xf32> to vector<8x1xf32>
    %101 = tpu.reciprocal %100 {approx = true} : vector<8x1xf32> -> vector<8x1xf32>
    %102 = vector.broadcast %101 : vector<8x1xf32> to vector<8x8xf32>
    %103 = arith.mulf %98, %102 : vector<8x8xf32>
    %cst_46 = arith.constant dense<0.000000e+00> : vector<8x8xf32>
    %104 = tpu.matmul %103, %90, %cst_46 {dimension_numbers = #tpu.dot_dimension_numbers<[1], [0], [0], [1], [0, 0, 1, 1], [], []>} : vector<8x8xf32>, vector<8x8xf32>, vector<8x8xf32> -> vector<8x8xf32>
    %105 = vector.extract_strided_slice %16 {offsets = [24, 0], sizes = [8, 32], strides = [1, 1]} : vector<32x32xf32> to vector<8x32xf32>
    %cst_47 = arith.constant dense<0.000000e+00> : vector<8x32xf32>
    %106 = tpu.matmul %104, %105, %cst_47 {dimension_numbers = #tpu.dot_dimension_numbers<[1], [0], [0], [1], [0, 0, 1, 1], [], []>} : vector<8x8xf32>, vector<8x32xf32>, vector<8x32xf32> -> vector<8x32xf32>
    %107 = arith.addf %87, %106 : vector<8x32xf32>
    %108 = vector.broadcast %17 : vector<1x32xf32> to vector<8x32xf32>
    %109 = arith.addf %107, %108 : vector<8x32xf32>
    %110 = arith.addf %1, %109 : vector<8x32xf32>
    %111 = vector.extract_strided_slice %5 {offsets = [8, 0], sizes = [1, 32], strides = [1, 1]} : vector<15x32xf32> to vector<1x32xf32>
    %112 = vector.extract_strided_slice %5 {offsets = [9, 0], sizes = [1, 32], strides = [1, 1]} : vector<15x32xf32> to vector<1x32xf32>
    %cst_48 = arith.constant dense<0.000000e+00> : vector<8xf32>
    %113 = vector.multi_reduction <add>, %110, %cst_48 [1] : vector<8x32xf32> to vector<8xf32>
    %114 = vector.shape_cast %113 : vector<8xf32> to vector<8x1xf32>
    %cst_49 = arith.constant 3.200000e+01 : f32
    %115 = vector.broadcast %cst_49 : f32 to vector<8x1xf32>
    %116 = arith.divf %114, %115 : vector<8x1xf32>
    %117 = vector.broadcast %116 : vector<8x1xf32> to vector<8x32xf32>
    %118 = arith.subf %110, %117 : vector<8x32xf32>
    %119 = arith.mulf %118, %118 : vector<8x32xf32>
    %cst_50 = arith.constant dense<0.000000e+00> : vector<8xf32>
    %120 = vector.multi_reduction <add>, %119, %cst_50 [1] : vector<8x32xf32> to vector<8xf32>
    %121 = vector.shape_cast %120 : vector<8xf32> to vector<8x1xf32>
    %cst_51 = arith.constant 3.200000e+01 : f32
    %122 = vector.broadcast %cst_51 : f32 to vector<8x1xf32>
    %123 = arith.divf %121, %122 : vector<8x1xf32>
    %124 = vector.broadcast %116 : vector<8x1xf32> to vector<8x32xf32>
    %125 = arith.subf %110, %124 : vector<8x32xf32>
    %cst_52 = arith.constant 9.99999974E-6 : f32
    %126 = vector.broadcast %cst_52 : f32 to vector<8x1xf32>
    %127 = arith.addf %123, %126 : vector<8x1xf32>
    %128 = math.rsqrt %127 : vector<8x1xf32>
    %129 = vector.broadcast %128 : vector<8x1xf32> to vector<8x32xf32>
    %130 = arith.mulf %125, %129 : vector<8x32xf32>
    %131 = vector.broadcast %111 : vector<1x32xf32> to vector<8x32xf32>
    %132 = arith.mulf %130, %131 : vector<8x32xf32>
    %133 = vector.broadcast %112 : vector<1x32xf32> to vector<8x32xf32>
    %134 = arith.addf %132, %133 : vector<8x32xf32>
    %c0_53 = arith.constant 0 : index
    %c4 = arith.constant 4 : index
    %c0_54 = arith.constant 0 : index
    %c0_55 = arith.constant 0 : index
    %135 = vector.load %arg3[%c0_53, %c4, %c0_54, %c0_55] : memref<2x8x32x32xf32, #tpu.memory_space<vmem>>, vector<1x1x32x32xf32>
    %136 = vector.shape_cast %135 : vector<1x1x32x32xf32> to vector<32x32xf32>
    %137 = vector.extract_strided_slice %5 {offsets = [4, 0], sizes = [1, 32], strides = [1, 1]} : vector<15x32xf32> to vector<1x32xf32>
    %c0_56 = arith.constant 0 : index
    %c5 = arith.constant 5 : index
    %c0_57 = arith.constant 0 : index
    %c0_58 = arith.constant 0 : index
    %138 = vector.load %arg3[%c0_56, %c5, %c0_57, %c0_58] : memref<2x8x32x32xf32, #tpu.memory_space<vmem>>, vector<1x1x32x32xf32>
    %139 = vector.shape_cast %138 : vector<1x1x32x32xf32> to vector<32x32xf32>
    %140 = vector.extract_strided_slice %5 {offsets = [5, 0], sizes = [1, 32], strides = [1, 1]} : vector<15x32xf32> to vector<1x32xf32>
    %c0_59 = arith.constant 0 : index
    %c6 = arith.constant 6 : index
    %c0_60 = arith.constant 0 : index
    %c0_61 = arith.constant 0 : index
    %141 = vector.load %arg3[%c0_59, %c6, %c0_60, %c0_61] : memref<2x8x32x32xf32, #tpu.memory_space<vmem>>, vector<1x1x32x32xf32>
    %142 = vector.shape_cast %141 : vector<1x1x32x32xf32> to vector<32x32xf32>
    %143 = vector.extract_strided_slice %5 {offsets = [6, 0], sizes = [1, 32], strides = [1, 1]} : vector<15x32xf32> to vector<1x32xf32>
    %c0_62 = arith.constant 0 : index
    %c7 = arith.constant 7 : index
    %c0_63 = arith.constant 0 : index
    %c0_64 = arith.constant 0 : index
    %144 = vector.load %arg3[%c0_62, %c7, %c0_63, %c0_64] : memref<2x8x32x32xf32, #tpu.memory_space<vmem>>, vector<1x1x32x32xf32>
    %145 = vector.shape_cast %144 : vector<1x1x32x32xf32> to vector<32x32xf32>
    %146 = vector.extract_strided_slice %5 {offsets = [7, 0], sizes = [1, 32], strides = [1, 1]} : vector<15x32xf32> to vector<1x32xf32>
    %cst_65 = arith.constant dense<0.000000e+00> : vector<8x32xf32>
    %147 = tpu.matmul %134, %136, %cst_65 {dimension_numbers = #tpu.dot_dimension_numbers<[1], [0], [0], [1], [0, 0, 1, 1], [], []>} : vector<8x32xf32>, vector<32x32xf32>, vector<8x32xf32> -> vector<8x32xf32>
    %148 = vector.broadcast %137 : vector<1x32xf32> to vector<8x32xf32>
    %149 = arith.addf %147, %148 : vector<8x32xf32>
    %cst_66 = arith.constant dense<0.000000e+00> : vector<16x32xf32>
    %150 = tpu.matmul %3, %139, %cst_66 {dimension_numbers = #tpu.dot_dimension_numbers<[1], [0], [0], [1], [0, 0, 1, 1], [], []>} : vector<16x32xf32>, vector<32x32xf32>, vector<16x32xf32> -> vector<16x32xf32>
    %151 = vector.broadcast %140 : vector<1x32xf32> to vector<16x32xf32>
    %152 = arith.addf %150, %151 : vector<16x32xf32>
    %cst_67 = arith.constant dense<0.000000e+00> : vector<16x32xf32>
    %153 = tpu.matmul %3, %142, %cst_67 {dimension_numbers = #tpu.dot_dimension_numbers<[1], [0], [0], [1], [0, 0, 1, 1], [], []>} : vector<16x32xf32>, vector<32x32xf32>, vector<16x32xf32> -> vector<16x32xf32>
    %154 = vector.broadcast %143 : vector<1x32xf32> to vector<16x32xf32>
    %155 = arith.addf %153, %154 : vector<16x32xf32>
    %cst_68 = arith.constant 0.000000e+00 : f32
    %156 = vector.broadcast %cst_68 : f32 to vector<8x32xf32>
    %157 = vector.extract_strided_slice %149 {offsets = [0, 0], sizes = [8, 8], strides = [1, 1]} : vector<8x32xf32> to vector<8x8xf32>
    %158 = vector.extract_strided_slice %152 {offsets = [0, 0], sizes = [16, 8], strides = [1, 1]} : vector<16x32xf32> to vector<16x8xf32>
    %159 = vector.extract_strided_slice %155 {offsets = [0, 0], sizes = [16, 8], strides = [1, 1]} : vector<16x32xf32> to vector<16x8xf32>
    %cst_69 = arith.constant dense<0.000000e+00> : vector<8x16xf32>
    %160 = tpu.matmul %157, %158, %cst_69 {dimension_numbers = #tpu.dot_dimension_numbers<[1], [1], [0], [0], [0, 0, 1, 0], [], []>} : vector<8x8xf32>, vector<16x8xf32>, vector<8x16xf32> -> vector<8x16xf32>
    %cst_70 = arith.constant 0.353553385 : f32
    %161 = vector.broadcast %cst_70 : f32 to vector<8x16xf32>
    %162 = arith.mulf %160, %161 : vector<8x16xf32>
    %cst_71 = arith.constant dense<0xFF800000> : vector<8xf32>
    %163 = vector.multi_reduction <maximumf>, %162, %cst_71 [1] : vector<8x16xf32> to vector<8xf32>
    %164 = vector.shape_cast %163 : vector<8xf32> to vector<8x1xf32>
    %165 = vector.broadcast %164 : vector<8x1xf32> to vector<8x16xf32>
    %166 = arith.subf %162, %165 : vector<8x16xf32>
    %167 = math.exp %166 : vector<8x16xf32>
    %cst_72 = arith.constant dense<0.000000e+00> : vector<8xf32>
    %168 = vector.multi_reduction <add>, %167, %cst_72 [1] : vector<8x16xf32> to vector<8xf32>
    %169 = vector.shape_cast %168 : vector<8xf32> to vector<8x1xf32>
    %170 = tpu.reciprocal %169 {approx = true} : vector<8x1xf32> -> vector<8x1xf32>
    %171 = vector.broadcast %170 : vector<8x1xf32> to vector<8x16xf32>
    %172 = arith.mulf %167, %171 : vector<8x16xf32>
    %cst_73 = arith.constant dense<0.000000e+00> : vector<8x8xf32>
    %173 = tpu.matmul %172, %159, %cst_73 {dimension_numbers = #tpu.dot_dimension_numbers<[1], [0], [0], [1], [0, 0, 1, 1], [], []>} : vector<8x16xf32>, vector<16x8xf32>, vector<8x8xf32> -> vector<8x8xf32>
    %174 = vector.extract_strided_slice %145 {offsets = [0, 0], sizes = [8, 32], strides = [1, 1]} : vector<32x32xf32> to vector<8x32xf32>
    %cst_74 = arith.constant dense<0.000000e+00> : vector<8x32xf32>
    %175 = tpu.matmul %173, %174, %cst_74 {dimension_numbers = #tpu.dot_dimension_numbers<[1], [0], [0], [1], [0, 0, 1, 1], [], []>} : vector<8x8xf32>, vector<8x32xf32>, vector<8x32xf32> -> vector<8x32xf32>
    %176 = arith.addf %156, %175 : vector<8x32xf32>
    %177 = vector.extract_strided_slice %149 {offsets = [0, 8], sizes = [8, 8], strides = [1, 1]} : vector<8x32xf32> to vector<8x8xf32>
    %178 = vector.extract_strided_slice %152 {offsets = [0, 8], sizes = [16, 8], strides = [1, 1]} : vector<16x32xf32> to vector<16x8xf32>
    %179 = vector.extract_strided_slice %155 {offsets = [0, 8], sizes = [16, 8], strides = [1, 1]} : vector<16x32xf32> to vector<16x8xf32>
    %cst_75 = arith.constant dense<0.000000e+00> : vector<8x16xf32>
    %180 = tpu.matmul %177, %178, %cst_75 {dimension_numbers = #tpu.dot_dimension_numbers<[1], [1], [0], [0], [0, 0, 1, 0], [], []>} : vector<8x8xf32>, vector<16x8xf32>, vector<8x16xf32> -> vector<8x16xf32>
    %cst_76 = arith.constant 0.353553385 : f32
    %181 = vector.broadcast %cst_76 : f32 to vector<8x16xf32>
    %182 = arith.mulf %180, %181 : vector<8x16xf32>
    %cst_77 = arith.constant dense<0xFF800000> : vector<8xf32>
    %183 = vector.multi_reduction <maximumf>, %182, %cst_77 [1] : vector<8x16xf32> to vector<8xf32>
    %184 = vector.shape_cast %183 : vector<8xf32> to vector<8x1xf32>
    %185 = vector.broadcast %184 : vector<8x1xf32> to vector<8x16xf32>
    %186 = arith.subf %182, %185 : vector<8x16xf32>
    %187 = math.exp %186 : vector<8x16xf32>
    %cst_78 = arith.constant dense<0.000000e+00> : vector<8xf32>
    %188 = vector.multi_reduction <add>, %187, %cst_78 [1] : vector<8x16xf32> to vector<8xf32>
    %189 = vector.shape_cast %188 : vector<8xf32> to vector<8x1xf32>
    %190 = tpu.reciprocal %189 {approx = true} : vector<8x1xf32> -> vector<8x1xf32>
    %191 = vector.broadcast %190 : vector<8x1xf32> to vector<8x16xf32>
    %192 = arith.mulf %187, %191 : vector<8x16xf32>
    %cst_79 = arith.constant dense<0.000000e+00> : vector<8x8xf32>
    %193 = tpu.matmul %192, %179, %cst_79 {dimension_numbers = #tpu.dot_dimension_numbers<[1], [0], [0], [1], [0, 0, 1, 1], [], []>} : vector<8x16xf32>, vector<16x8xf32>, vector<8x8xf32> -> vector<8x8xf32>
    %194 = vector.extract_strided_slice %145 {offsets = [8, 0], sizes = [8, 32], strides = [1, 1]} : vector<32x32xf32> to vector<8x32xf32>
    %cst_80 = arith.constant dense<0.000000e+00> : vector<8x32xf32>
    %195 = tpu.matmul %193, %194, %cst_80 {dimension_numbers = #tpu.dot_dimension_numbers<[1], [0], [0], [1], [0, 0, 1, 1], [], []>} : vector<8x8xf32>, vector<8x32xf32>, vector<8x32xf32> -> vector<8x32xf32>
    %196 = arith.addf %176, %195 : vector<8x32xf32>
    %197 = vector.extract_strided_slice %149 {offsets = [0, 16], sizes = [8, 8], strides = [1, 1]} : vector<8x32xf32> to vector<8x8xf32>
    %198 = vector.extract_strided_slice %152 {offsets = [0, 16], sizes = [16, 8], strides = [1, 1]} : vector<16x32xf32> to vector<16x8xf32>
    %199 = vector.extract_strided_slice %155 {offsets = [0, 16], sizes = [16, 8], strides = [1, 1]} : vector<16x32xf32> to vector<16x8xf32>
    %cst_81 = arith.constant dense<0.000000e+00> : vector<8x16xf32>
    %200 = tpu.matmul %197, %198, %cst_81 {dimension_numbers = #tpu.dot_dimension_numbers<[1], [1], [0], [0], [0, 0, 1, 0], [], []>} : vector<8x8xf32>, vector<16x8xf32>, vector<8x16xf32> -> vector<8x16xf32>
    %cst_82 = arith.constant 0.353553385 : f32
    %201 = vector.broadcast %cst_82 : f32 to vector<8x16xf32>
    %202 = arith.mulf %200, %201 : vector<8x16xf32>
    %cst_83 = arith.constant dense<0xFF800000> : vector<8xf32>
    %203 = vector.multi_reduction <maximumf>, %202, %cst_83 [1] : vector<8x16xf32> to vector<8xf32>
    %204 = vector.shape_cast %203 : vector<8xf32> to vector<8x1xf32>
    %205 = vector.broadcast %204 : vector<8x1xf32> to vector<8x16xf32>
    %206 = arith.subf %202, %205 : vector<8x16xf32>
    %207 = math.exp %206 : vector<8x16xf32>
    %cst_84 = arith.constant dense<0.000000e+00> : vector<8xf32>
    %208 = vector.multi_reduction <add>, %207, %cst_84 [1] : vector<8x16xf32> to vector<8xf32>
    %209 = vector.shape_cast %208 : vector<8xf32> to vector<8x1xf32>
    %210 = tpu.reciprocal %209 {approx = true} : vector<8x1xf32> -> vector<8x1xf32>
    %211 = vector.broadcast %210 : vector<8x1xf32> to vector<8x16xf32>
    %212 = arith.mulf %207, %211 : vector<8x16xf32>
    %cst_85 = arith.constant dense<0.000000e+00> : vector<8x8xf32>
    %213 = tpu.matmul %212, %199, %cst_85 {dimension_numbers = #tpu.dot_dimension_numbers<[1], [0], [0], [1], [0, 0, 1, 1], [], []>} : vector<8x16xf32>, vector<16x8xf32>, vector<8x8xf32> -> vector<8x8xf32>
    %214 = vector.extract_strided_slice %145 {offsets = [16, 0], sizes = [8, 32], strides = [1, 1]} : vector<32x32xf32> to vector<8x32xf32>
    %cst_86 = arith.constant dense<0.000000e+00> : vector<8x32xf32>
    %215 = tpu.matmul %213, %214, %cst_86 {dimension_numbers = #tpu.dot_dimension_numbers<[1], [0], [0], [1], [0, 0, 1, 1], [], []>} : vector<8x8xf32>, vector<8x32xf32>, vector<8x32xf32> -> vector<8x32xf32>
    %216 = arith.addf %196, %215 : vector<8x32xf32>
    %217 = vector.extract_strided_slice %149 {offsets = [0, 24], sizes = [8, 8], strides = [1, 1]} : vector<8x32xf32> to vector<8x8xf32>
    %218 = vector.extract_strided_slice %152 {offsets = [0, 24], sizes = [16, 8], strides = [1, 1]} : vector<16x32xf32> to vector<16x8xf32>
    %219 = vector.extract_strided_slice %155 {offsets = [0, 24], sizes = [16, 8], strides = [1, 1]} : vector<16x32xf32> to vector<16x8xf32>
    %cst_87 = arith.constant dense<0.000000e+00> : vector<8x16xf32>
    %220 = tpu.matmul %217, %218, %cst_87 {dimension_numbers = #tpu.dot_dimension_numbers<[1], [1], [0], [0], [0, 0, 1, 0], [], []>} : vector<8x8xf32>, vector<16x8xf32>, vector<8x16xf32> -> vector<8x16xf32>
    %cst_88 = arith.constant 0.353553385 : f32
    %221 = vector.broadcast %cst_88 : f32 to vector<8x16xf32>
    %222 = arith.mulf %220, %221 : vector<8x16xf32>
    %cst_89 = arith.constant dense<0xFF800000> : vector<8xf32>
    %223 = vector.multi_reduction <maximumf>, %222, %cst_89 [1] : vector<8x16xf32> to vector<8xf32>
    %224 = vector.shape_cast %223 : vector<8xf32> to vector<8x1xf32>
    %225 = vector.broadcast %224 : vector<8x1xf32> to vector<8x16xf32>
    %226 = arith.subf %222, %225 : vector<8x16xf32>
    %227 = math.exp %226 : vector<8x16xf32>
    %cst_90 = arith.constant dense<0.000000e+00> : vector<8xf32>
    %228 = vector.multi_reduction <add>, %227, %cst_90 [1] : vector<8x16xf32> to vector<8xf32>
    %229 = vector.shape_cast %228 : vector<8xf32> to vector<8x1xf32>
    %230 = tpu.reciprocal %229 {approx = true} : vector<8x1xf32> -> vector<8x1xf32>
    %231 = vector.broadcast %230 : vector<8x1xf32> to vector<8x16xf32>
    %232 = arith.mulf %227, %231 : vector<8x16xf32>
    %cst_91 = arith.constant dense<0.000000e+00> : vector<8x8xf32>
    %233 = tpu.matmul %232, %219, %cst_91 {dimension_numbers = #tpu.dot_dimension_numbers<[1], [0], [0], [1], [0, 0, 1, 1], [], []>} : vector<8x16xf32>, vector<16x8xf32>, vector<8x8xf32> -> vector<8x8xf32>
    %234 = vector.extract_strided_slice %145 {offsets = [24, 0], sizes = [8, 32], strides = [1, 1]} : vector<32x32xf32> to vector<8x32xf32>
    %cst_92 = arith.constant dense<0.000000e+00> : vector<8x32xf32>
    %235 = tpu.matmul %233, %234, %cst_92 {dimension_numbers = #tpu.dot_dimension_numbers<[1], [0], [0], [1], [0, 0, 1, 1], [], []>} : vector<8x8xf32>, vector<8x32xf32>, vector<8x32xf32> -> vector<8x32xf32>
    %236 = arith.addf %216, %235 : vector<8x32xf32>
    %237 = vector.broadcast %146 : vector<1x32xf32> to vector<8x32xf32>
    %238 = arith.addf %236, %237 : vector<8x32xf32>
    %239 = arith.addf %134, %238 : vector<8x32xf32>
    %240 = vector.extract_strided_slice %5 {offsets = [10, 0], sizes = [1, 32], strides = [1, 1]} : vector<15x32xf32> to vector<1x32xf32>
    %241 = vector.extract_strided_slice %5 {offsets = [11, 0], sizes = [1, 32], strides = [1, 1]} : vector<15x32xf32> to vector<1x32xf32>
    %cst_93 = arith.constant dense<0.000000e+00> : vector<8xf32>
    %242 = vector.multi_reduction <add>, %239, %cst_93 [1] : vector<8x32xf32> to vector<8xf32>
    %243 = vector.shape_cast %242 : vector<8xf32> to vector<8x1xf32>
    %cst_94 = arith.constant 3.200000e+01 : f32
    %244 = vector.broadcast %cst_94 : f32 to vector<8x1xf32>
    %245 = arith.divf %243, %244 : vector<8x1xf32>
    %246 = vector.broadcast %245 : vector<8x1xf32> to vector<8x32xf32>
    %247 = arith.subf %239, %246 : vector<8x32xf32>
    %248 = arith.mulf %247, %247 : vector<8x32xf32>
    %cst_95 = arith.constant dense<0.000000e+00> : vector<8xf32>
    %249 = vector.multi_reduction <add>, %248, %cst_95 [1] : vector<8x32xf32> to vector<8xf32>
    %250 = vector.shape_cast %249 : vector<8xf32> to vector<8x1xf32>
    %cst_96 = arith.constant 3.200000e+01 : f32
    %251 = vector.broadcast %cst_96 : f32 to vector<8x1xf32>
    %252 = arith.divf %250, %251 : vector<8x1xf32>
    %253 = vector.broadcast %245 : vector<8x1xf32> to vector<8x32xf32>
    %254 = arith.subf %239, %253 : vector<8x32xf32>
    %cst_97 = arith.constant 9.99999974E-6 : f32
    %255 = vector.broadcast %cst_97 : f32 to vector<8x1xf32>
    %256 = arith.addf %252, %255 : vector<8x1xf32>
    %257 = math.rsqrt %256 : vector<8x1xf32>
    %258 = vector.broadcast %257 : vector<8x1xf32> to vector<8x32xf32>
    %259 = arith.mulf %254, %258 : vector<8x32xf32>
    %260 = vector.broadcast %240 : vector<1x32xf32> to vector<8x32xf32>
    %261 = arith.mulf %259, %260 : vector<8x32xf32>
    %262 = vector.broadcast %241 : vector<1x32xf32> to vector<8x32xf32>
    %263 = arith.addf %261, %262 : vector<8x32xf32>
    %c0_98 = arith.constant 0 : index
    %c0_99 = arith.constant 0 : index
    %c0_100 = arith.constant 0 : index
    %264 = vector.load %arg5[%c0_98, %c0_99, %c0_100] : memref<2x32x64xf32, #tpu.memory_space<vmem>>, vector<1x32x64xf32>
    %265 = vector.shape_cast %264 : vector<1x32x64xf32> to vector<32x64xf32>
    %cst_101 = arith.constant dense<0.000000e+00> : vector<8x64xf32>
    %266 = tpu.matmul %263, %265, %cst_101 {dimension_numbers = #tpu.dot_dimension_numbers<[1], [0], [0], [1], [0, 0, 1, 1], [], []>} : vector<8x32xf32>, vector<32x64xf32>, vector<8x64xf32> -> vector<8x64xf32>
    %c0_102 = arith.constant 0 : index
    %c0_103 = arith.constant 0 : index
    %267 = vector.load %arg7[%c0_102, %c0_103] : memref<2x64xf32, #tpu.memory_space<vmem>>, vector<1x64xf32>
    %268 = vector.broadcast %267 : vector<1x64xf32> to vector<8x64xf32>
    %269 = arith.addf %266, %268 : vector<8x64xf32>
    %cst_104 = arith.constant 0.000000e+00 : f32
    %270 = vector.broadcast %cst_104 : f32 to vector<8x64xf32>
    %271 = arith.maximumf %269, %270 : vector<8x64xf32>
    %c0_105 = arith.constant 0 : index
    %c0_106 = arith.constant 0 : index
    %c0_107 = arith.constant 0 : index
    %272 = vector.load %arg6[%c0_105, %c0_106, %c0_107] : memref<2x64x32xf32, #tpu.memory_space<vmem>>, vector<1x64x32xf32>
    %273 = vector.shape_cast %272 : vector<1x64x32xf32> to vector<64x32xf32>
    %cst_108 = arith.constant dense<0.000000e+00> : vector<8x32xf32>
    %274 = tpu.matmul %271, %273, %cst_108 {dimension_numbers = #tpu.dot_dimension_numbers<[1], [0], [0], [1], [0, 0, 1, 1], [], []>} : vector<8x64xf32>, vector<64x32xf32>, vector<8x32xf32> -> vector<8x32xf32>
    %275 = vector.extract_strided_slice %5 {offsets = [14, 0], sizes = [1, 32], strides = [1, 1]} : vector<15x32xf32> to vector<1x32xf32>
    %276 = vector.broadcast %275 : vector<1x32xf32> to vector<8x32xf32>
    %277 = arith.addf %274, %276 : vector<8x32xf32>
    %278 = arith.addf %263, %277 : vector<8x32xf32>
    %279 = vector.extract_strided_slice %5 {offsets = [12, 0], sizes = [1, 32], strides = [1, 1]} : vector<15x32xf32> to vector<1x32xf32>
    %280 = vector.extract_strided_slice %5 {offsets = [13, 0], sizes = [1, 32], strides = [1, 1]} : vector<15x32xf32> to vector<1x32xf32>
    %cst_109 = arith.constant dense<0.000000e+00> : vector<8xf32>
    %281 = vector.multi_reduction <add>, %278, %cst_109 [1] : vector<8x32xf32> to vector<8xf32>
    %282 = vector.shape_cast %281 : vector<8xf32> to vector<8x1xf32>
    %cst_110 = arith.constant 3.200000e+01 : f32
    %283 = vector.broadcast %cst_110 : f32 to vector<8x1xf32>
    %284 = arith.divf %282, %283 : vector<8x1xf32>
    %285 = vector.broadcast %284 : vector<8x1xf32> to vector<8x32xf32>
    %286 = arith.subf %278, %285 : vector<8x32xf32>
    %287 = arith.mulf %286, %286 : vector<8x32xf32>
    %cst_111 = arith.constant dense<0.000000e+00> : vector<8xf32>
    %288 = vector.multi_reduction <add>, %287, %cst_111 [1] : vector<8x32xf32> to vector<8xf32>
    %289 = vector.shape_cast %288 : vector<8xf32> to vector<8x1xf32>
    %cst_112 = arith.constant 3.200000e+01 : f32
    %290 = vector.broadcast %cst_112 : f32 to vector<8x1xf32>
    %291 = arith.divf %289, %290 : vector<8x1xf32>
    %292 = vector.broadcast %284 : vector<8x1xf32> to vector<8x32xf32>
    %293 = arith.subf %278, %292 : vector<8x32xf32>
    %cst_113 = arith.constant 9.99999974E-6 : f32
    %294 = vector.broadcast %cst_113 : f32 to vector<8x1xf32>
    %295 = arith.addf %291, %294 : vector<8x1xf32>
    %296 = math.rsqrt %295 : vector<8x1xf32>
    %297 = vector.broadcast %296 : vector<8x1xf32> to vector<8x32xf32>
    %298 = arith.mulf %293, %297 : vector<8x32xf32>
    %299 = vector.broadcast %279 : vector<1x32xf32> to vector<8x32xf32>
    %300 = arith.mulf %298, %299 : vector<8x32xf32>
    %301 = vector.broadcast %280 : vector<1x32xf32> to vector<8x32xf32>
    %302 = arith.addf %300, %301 : vector<8x32xf32>
    %c1_114 = arith.constant 1 : index
    %c0_115 = arith.constant 0 : index
    %c0_116 = arith.constant 0 : index
    %303 = vector.load %arg4[%c1_114, %c0_115, %c0_116] : memref<2x15x32xf32, #tpu.memory_space<vmem>>, vector<1x15x32xf32>
    %304 = vector.shape_cast %303 : vector<1x15x32xf32> to vector<15x32xf32>
    %c1_117 = arith.constant 1 : index
    %c0_118 = arith.constant 0 : index
    %c0_119 = arith.constant 0 : index
    %c0_120 = arith.constant 0 : index
    %305 = vector.load %arg3[%c1_117, %c0_118, %c0_119, %c0_120] : memref<2x8x32x32xf32, #tpu.memory_space<vmem>>, vector<1x1x32x32xf32>
    %306 = vector.shape_cast %305 : vector<1x1x32x32xf32> to vector<32x32xf32>
    %307 = vector.extract_strided_slice %304 {offsets = [0, 0], sizes = [1, 32], strides = [1, 1]} : vector<15x32xf32> to vector<1x32xf32>
    %c1_121 = arith.constant 1 : index
    %c1_122 = arith.constant 1 : index
    %c0_123 = arith.constant 0 : index
    %c0_124 = arith.constant 0 : index
    %308 = vector.load %arg3[%c1_121, %c1_122, %c0_123, %c0_124] : memref<2x8x32x32xf32, #tpu.memory_space<vmem>>, vector<1x1x32x32xf32>
    %309 = vector.shape_cast %308 : vector<1x1x32x32xf32> to vector<32x32xf32>
    %310 = vector.extract_strided_slice %304 {offsets = [1, 0], sizes = [1, 32], strides = [1, 1]} : vector<15x32xf32> to vector<1x32xf32>
    %c1_125 = arith.constant 1 : index
    %c2_126 = arith.constant 2 : index
    %c0_127 = arith.constant 0 : index
    %c0_128 = arith.constant 0 : index
    %311 = vector.load %arg3[%c1_125, %c2_126, %c0_127, %c0_128] : memref<2x8x32x32xf32, #tpu.memory_space<vmem>>, vector<1x1x32x32xf32>
    %312 = vector.shape_cast %311 : vector<1x1x32x32xf32> to vector<32x32xf32>
    %313 = vector.extract_strided_slice %304 {offsets = [2, 0], sizes = [1, 32], strides = [1, 1]} : vector<15x32xf32> to vector<1x32xf32>
    %c1_129 = arith.constant 1 : index
    %c3_130 = arith.constant 3 : index
    %c0_131 = arith.constant 0 : index
    %c0_132 = arith.constant 0 : index
    %314 = vector.load %arg3[%c1_129, %c3_130, %c0_131, %c0_132] : memref<2x8x32x32xf32, #tpu.memory_space<vmem>>, vector<1x1x32x32xf32>
    %315 = vector.shape_cast %314 : vector<1x1x32x32xf32> to vector<32x32xf32>
    %316 = vector.extract_strided_slice %304 {offsets = [3, 0], sizes = [1, 32], strides = [1, 1]} : vector<15x32xf32> to vector<1x32xf32>
    %cst_133 = arith.constant dense<0.000000e+00> : vector<8x32xf32>
    %317 = tpu.matmul %302, %306, %cst_133 {dimension_numbers = #tpu.dot_dimension_numbers<[1], [0], [0], [1], [0, 0, 1, 1], [], []>} : vector<8x32xf32>, vector<32x32xf32>, vector<8x32xf32> -> vector<8x32xf32>
    %318 = vector.broadcast %307 : vector<1x32xf32> to vector<8x32xf32>
    %319 = arith.addf %317, %318 : vector<8x32xf32>
    %cst_134 = arith.constant dense<0.000000e+00> : vector<8x32xf32>
    %320 = tpu.matmul %302, %309, %cst_134 {dimension_numbers = #tpu.dot_dimension_numbers<[1], [0], [0], [1], [0, 0, 1, 1], [], []>} : vector<8x32xf32>, vector<32x32xf32>, vector<8x32xf32> -> vector<8x32xf32>
    %321 = vector.broadcast %310 : vector<1x32xf32> to vector<8x32xf32>
    %322 = arith.addf %320, %321 : vector<8x32xf32>
    %cst_135 = arith.constant dense<0.000000e+00> : vector<8x32xf32>
    %323 = tpu.matmul %302, %312, %cst_135 {dimension_numbers = #tpu.dot_dimension_numbers<[1], [0], [0], [1], [0, 0, 1, 1], [], []>} : vector<8x32xf32>, vector<32x32xf32>, vector<8x32xf32> -> vector<8x32xf32>
    %324 = vector.broadcast %313 : vector<1x32xf32> to vector<8x32xf32>
    %325 = arith.addf %323, %324 : vector<8x32xf32>
    %cst_136 = arith.constant 0.000000e+00 : f32
    %326 = vector.broadcast %cst_136 : f32 to vector<8x32xf32>
    %327 = vector.extract_strided_slice %319 {offsets = [0, 0], sizes = [8, 8], strides = [1, 1]} : vector<8x32xf32> to vector<8x8xf32>
    %328 = vector.extract_strided_slice %322 {offsets = [0, 0], sizes = [8, 8], strides = [1, 1]} : vector<8x32xf32> to vector<8x8xf32>
    %329 = vector.extract_strided_slice %325 {offsets = [0, 0], sizes = [8, 8], strides = [1, 1]} : vector<8x32xf32> to vector<8x8xf32>
    %cst_137 = arith.constant dense<0.000000e+00> : vector<8x8xf32>
    %330 = tpu.matmul %327, %328, %cst_137 {dimension_numbers = #tpu.dot_dimension_numbers<[1], [1], [0], [0], [0, 0, 1, 0], [], []>} : vector<8x8xf32>, vector<8x8xf32>, vector<8x8xf32> -> vector<8x8xf32>
    %cst_138 = arith.constant 0.353553385 : f32
    %331 = vector.broadcast %cst_138 : f32 to vector<8x8xf32>
    %332 = arith.mulf %330, %331 : vector<8x8xf32>
    %cst_139 = arith.constant dense<0xFF800000> : vector<8xf32>
    %333 = vector.multi_reduction <maximumf>, %332, %cst_139 [1] : vector<8x8xf32> to vector<8xf32>
    %334 = vector.shape_cast %333 : vector<8xf32> to vector<8x1xf32>
    %335 = vector.broadcast %334 : vector<8x1xf32> to vector<8x8xf32>
    %336 = arith.subf %332, %335 : vector<8x8xf32>
    %337 = math.exp %336 : vector<8x8xf32>
    %cst_140 = arith.constant dense<0.000000e+00> : vector<8xf32>
    %338 = vector.multi_reduction <add>, %337, %cst_140 [1] : vector<8x8xf32> to vector<8xf32>
    %339 = vector.shape_cast %338 : vector<8xf32> to vector<8x1xf32>
    %340 = tpu.reciprocal %339 {approx = true} : vector<8x1xf32> -> vector<8x1xf32>
    %341 = vector.broadcast %340 : vector<8x1xf32> to vector<8x8xf32>
    %342 = arith.mulf %337, %341 : vector<8x8xf32>
    %cst_141 = arith.constant dense<0.000000e+00> : vector<8x8xf32>
    %343 = tpu.matmul %342, %329, %cst_141 {dimension_numbers = #tpu.dot_dimension_numbers<[1], [0], [0], [1], [0, 0, 1, 1], [], []>} : vector<8x8xf32>, vector<8x8xf32>, vector<8x8xf32> -> vector<8x8xf32>
    %344 = vector.extract_strided_slice %315 {offsets = [0, 0], sizes = [8, 32], strides = [1, 1]} : vector<32x32xf32> to vector<8x32xf32>
    %cst_142 = arith.constant dense<0.000000e+00> : vector<8x32xf32>
    %345 = tpu.matmul %343, %344, %cst_142 {dimension_numbers = #tpu.dot_dimension_numbers<[1], [0], [0], [1], [0, 0, 1, 1], [], []>} : vector<8x8xf32>, vector<8x32xf32>, vector<8x32xf32> -> vector<8x32xf32>
    %346 = arith.addf %326, %345 : vector<8x32xf32>
    %347 = vector.extract_strided_slice %319 {offsets = [0, 8], sizes = [8, 8], strides = [1, 1]} : vector<8x32xf32> to vector<8x8xf32>
    %348 = vector.extract_strided_slice %322 {offsets = [0, 8], sizes = [8, 8], strides = [1, 1]} : vector<8x32xf32> to vector<8x8xf32>
    %349 = vector.extract_strided_slice %325 {offsets = [0, 8], sizes = [8, 8], strides = [1, 1]} : vector<8x32xf32> to vector<8x8xf32>
    %cst_143 = arith.constant dense<0.000000e+00> : vector<8x8xf32>
    %350 = tpu.matmul %347, %348, %cst_143 {dimension_numbers = #tpu.dot_dimension_numbers<[1], [1], [0], [0], [0, 0, 1, 0], [], []>} : vector<8x8xf32>, vector<8x8xf32>, vector<8x8xf32> -> vector<8x8xf32>
    %cst_144 = arith.constant 0.353553385 : f32
    %351 = vector.broadcast %cst_144 : f32 to vector<8x8xf32>
    %352 = arith.mulf %350, %351 : vector<8x8xf32>
    %cst_145 = arith.constant dense<0xFF800000> : vector<8xf32>
    %353 = vector.multi_reduction <maximumf>, %352, %cst_145 [1] : vector<8x8xf32> to vector<8xf32>
    %354 = vector.shape_cast %353 : vector<8xf32> to vector<8x1xf32>
    %355 = vector.broadcast %354 : vector<8x1xf32> to vector<8x8xf32>
    %356 = arith.subf %352, %355 : vector<8x8xf32>
    %357 = math.exp %356 : vector<8x8xf32>
    %cst_146 = arith.constant dense<0.000000e+00> : vector<8xf32>
    %358 = vector.multi_reduction <add>, %357, %cst_146 [1] : vector<8x8xf32> to vector<8xf32>
    %359 = vector.shape_cast %358 : vector<8xf32> to vector<8x1xf32>
    %360 = tpu.reciprocal %359 {approx = true} : vector<8x1xf32> -> vector<8x1xf32>
    %361 = vector.broadcast %360 : vector<8x1xf32> to vector<8x8xf32>
    %362 = arith.mulf %357, %361 : vector<8x8xf32>
    %cst_147 = arith.constant dense<0.000000e+00> : vector<8x8xf32>
    %363 = tpu.matmul %362, %349, %cst_147 {dimension_numbers = #tpu.dot_dimension_numbers<[1], [0], [0], [1], [0, 0, 1, 1], [], []>} : vector<8x8xf32>, vector<8x8xf32>, vector<8x8xf32> -> vector<8x8xf32>
    %364 = vector.extract_strided_slice %315 {offsets = [8, 0], sizes = [8, 32], strides = [1, 1]} : vector<32x32xf32> to vector<8x32xf32>
    %cst_148 = arith.constant dense<0.000000e+00> : vector<8x32xf32>
    %365 = tpu.matmul %363, %364, %cst_148 {dimension_numbers = #tpu.dot_dimension_numbers<[1], [0], [0], [1], [0, 0, 1, 1], [], []>} : vector<8x8xf32>, vector<8x32xf32>, vector<8x32xf32> -> vector<8x32xf32>
    %366 = arith.addf %346, %365 : vector<8x32xf32>
    %367 = vector.extract_strided_slice %319 {offsets = [0, 16], sizes = [8, 8], strides = [1, 1]} : vector<8x32xf32> to vector<8x8xf32>
    %368 = vector.extract_strided_slice %322 {offsets = [0, 16], sizes = [8, 8], strides = [1, 1]} : vector<8x32xf32> to vector<8x8xf32>
    %369 = vector.extract_strided_slice %325 {offsets = [0, 16], sizes = [8, 8], strides = [1, 1]} : vector<8x32xf32> to vector<8x8xf32>
    %cst_149 = arith.constant dense<0.000000e+00> : vector<8x8xf32>
    %370 = tpu.matmul %367, %368, %cst_149 {dimension_numbers = #tpu.dot_dimension_numbers<[1], [1], [0], [0], [0, 0, 1, 0], [], []>} : vector<8x8xf32>, vector<8x8xf32>, vector<8x8xf32> -> vector<8x8xf32>
    %cst_150 = arith.constant 0.353553385 : f32
    %371 = vector.broadcast %cst_150 : f32 to vector<8x8xf32>
    %372 = arith.mulf %370, %371 : vector<8x8xf32>
    %cst_151 = arith.constant dense<0xFF800000> : vector<8xf32>
    %373 = vector.multi_reduction <maximumf>, %372, %cst_151 [1] : vector<8x8xf32> to vector<8xf32>
    %374 = vector.shape_cast %373 : vector<8xf32> to vector<8x1xf32>
    %375 = vector.broadcast %374 : vector<8x1xf32> to vector<8x8xf32>
    %376 = arith.subf %372, %375 : vector<8x8xf32>
    %377 = math.exp %376 : vector<8x8xf32>
    %cst_152 = arith.constant dense<0.000000e+00> : vector<8xf32>
    %378 = vector.multi_reduction <add>, %377, %cst_152 [1] : vector<8x8xf32> to vector<8xf32>
    %379 = vector.shape_cast %378 : vector<8xf32> to vector<8x1xf32>
    %380 = tpu.reciprocal %379 {approx = true} : vector<8x1xf32> -> vector<8x1xf32>
    %381 = vector.broadcast %380 : vector<8x1xf32> to vector<8x8xf32>
    %382 = arith.mulf %377, %381 : vector<8x8xf32>
    %cst_153 = arith.constant dense<0.000000e+00> : vector<8x8xf32>
    %383 = tpu.matmul %382, %369, %cst_153 {dimension_numbers = #tpu.dot_dimension_numbers<[1], [0], [0], [1], [0, 0, 1, 1], [], []>} : vector<8x8xf32>, vector<8x8xf32>, vector<8x8xf32> -> vector<8x8xf32>
    %384 = vector.extract_strided_slice %315 {offsets = [16, 0], sizes = [8, 32], strides = [1, 1]} : vector<32x32xf32> to vector<8x32xf32>
    %cst_154 = arith.constant dense<0.000000e+00> : vector<8x32xf32>
    %385 = tpu.matmul %383, %384, %cst_154 {dimension_numbers = #tpu.dot_dimension_numbers<[1], [0], [0], [1], [0, 0, 1, 1], [], []>} : vector<8x8xf32>, vector<8x32xf32>, vector<8x32xf32> -> vector<8x32xf32>
    %386 = arith.addf %366, %385 : vector<8x32xf32>
    %387 = vector.extract_strided_slice %319 {offsets = [0, 24], sizes = [8, 8], strides = [1, 1]} : vector<8x32xf32> to vector<8x8xf32>
    %388 = vector.extract_strided_slice %322 {offsets = [0, 24], sizes = [8, 8], strides = [1, 1]} : vector<8x32xf32> to vector<8x8xf32>
    %389 = vector.extract_strided_slice %325 {offsets = [0, 24], sizes = [8, 8], strides = [1, 1]} : vector<8x32xf32> to vector<8x8xf32>
    %cst_155 = arith.constant dense<0.000000e+00> : vector<8x8xf32>
    %390 = tpu.matmul %387, %388, %cst_155 {dimension_numbers = #tpu.dot_dimension_numbers<[1], [1], [0], [0], [0, 0, 1, 0], [], []>} : vector<8x8xf32>, vector<8x8xf32>, vector<8x8xf32> -> vector<8x8xf32>
    %cst_156 = arith.constant 0.353553385 : f32
    %391 = vector.broadcast %cst_156 : f32 to vector<8x8xf32>
    %392 = arith.mulf %390, %391 : vector<8x8xf32>
    %cst_157 = arith.constant dense<0xFF800000> : vector<8xf32>
    %393 = vector.multi_reduction <maximumf>, %392, %cst_157 [1] : vector<8x8xf32> to vector<8xf32>
    %394 = vector.shape_cast %393 : vector<8xf32> to vector<8x1xf32>
    %395 = vector.broadcast %394 : vector<8x1xf32> to vector<8x8xf32>
    %396 = arith.subf %392, %395 : vector<8x8xf32>
    %397 = math.exp %396 : vector<8x8xf32>
    %cst_158 = arith.constant dense<0.000000e+00> : vector<8xf32>
    %398 = vector.multi_reduction <add>, %397, %cst_158 [1] : vector<8x8xf32> to vector<8xf32>
    %399 = vector.shape_cast %398 : vector<8xf32> to vector<8x1xf32>
    %400 = tpu.reciprocal %399 {approx = true} : vector<8x1xf32> -> vector<8x1xf32>
    %401 = vector.broadcast %400 : vector<8x1xf32> to vector<8x8xf32>
    %402 = arith.mulf %397, %401 : vector<8x8xf32>
    %cst_159 = arith.constant dense<0.000000e+00> : vector<8x8xf32>
    %403 = tpu.matmul %402, %389, %cst_159 {dimension_numbers = #tpu.dot_dimension_numbers<[1], [0], [0], [1], [0, 0, 1, 1], [], []>} : vector<8x8xf32>, vector<8x8xf32>, vector<8x8xf32> -> vector<8x8xf32>
    %404 = vector.extract_strided_slice %315 {offsets = [24, 0], sizes = [8, 32], strides = [1, 1]} : vector<32x32xf32> to vector<8x32xf32>
    %cst_160 = arith.constant dense<0.000000e+00> : vector<8x32xf32>
    %405 = tpu.matmul %403, %404, %cst_160 {dimension_numbers = #tpu.dot_dimension_numbers<[1], [0], [0], [1], [0, 0, 1, 1], [], []>} : vector<8x8xf32>, vector<8x32xf32>, vector<8x32xf32> -> vector<8x32xf32>
    %406 = arith.addf %386, %405 : vector<8x32xf32>
    %407 = vector.broadcast %316 : vector<1x32xf32> to vector<8x32xf32>
    %408 = arith.addf %406, %407 : vector<8x32xf32>
    %409 = arith.addf %302, %408 : vector<8x32xf32>
    %410 = vector.extract_strided_slice %304 {offsets = [8, 0], sizes = [1, 32], strides = [1, 1]} : vector<15x32xf32> to vector<1x32xf32>
    %411 = vector.extract_strided_slice %304 {offsets = [9, 0], sizes = [1, 32], strides = [1, 1]} : vector<15x32xf32> to vector<1x32xf32>
    %cst_161 = arith.constant dense<0.000000e+00> : vector<8xf32>
    %412 = vector.multi_reduction <add>, %409, %cst_161 [1] : vector<8x32xf32> to vector<8xf32>
    %413 = vector.shape_cast %412 : vector<8xf32> to vector<8x1xf32>
    %cst_162 = arith.constant 3.200000e+01 : f32
    %414 = vector.broadcast %cst_162 : f32 to vector<8x1xf32>
    %415 = arith.divf %413, %414 : vector<8x1xf32>
    %416 = vector.broadcast %415 : vector<8x1xf32> to vector<8x32xf32>
    %417 = arith.subf %409, %416 : vector<8x32xf32>
    %418 = arith.mulf %417, %417 : vector<8x32xf32>
    %cst_163 = arith.constant dense<0.000000e+00> : vector<8xf32>
    %419 = vector.multi_reduction <add>, %418, %cst_163 [1] : vector<8x32xf32> to vector<8xf32>
    %420 = vector.shape_cast %419 : vector<8xf32> to vector<8x1xf32>
    %cst_164 = arith.constant 3.200000e+01 : f32
    %421 = vector.broadcast %cst_164 : f32 to vector<8x1xf32>
    %422 = arith.divf %420, %421 : vector<8x1xf32>
    %423 = vector.broadcast %415 : vector<8x1xf32> to vector<8x32xf32>
    %424 = arith.subf %409, %423 : vector<8x32xf32>
    %cst_165 = arith.constant 9.99999974E-6 : f32
    %425 = vector.broadcast %cst_165 : f32 to vector<8x1xf32>
    %426 = arith.addf %422, %425 : vector<8x1xf32>
    %427 = math.rsqrt %426 : vector<8x1xf32>
    %428 = vector.broadcast %427 : vector<8x1xf32> to vector<8x32xf32>
    %429 = arith.mulf %424, %428 : vector<8x32xf32>
    %430 = vector.broadcast %410 : vector<1x32xf32> to vector<8x32xf32>
    %431 = arith.mulf %429, %430 : vector<8x32xf32>
    %432 = vector.broadcast %411 : vector<1x32xf32> to vector<8x32xf32>
    %433 = arith.addf %431, %432 : vector<8x32xf32>
    %c1_166 = arith.constant 1 : index
    %c4_167 = arith.constant 4 : index
    %c0_168 = arith.constant 0 : index
    %c0_169 = arith.constant 0 : index
    %434 = vector.load %arg3[%c1_166, %c4_167, %c0_168, %c0_169] : memref<2x8x32x32xf32, #tpu.memory_space<vmem>>, vector<1x1x32x32xf32>
    %435 = vector.shape_cast %434 : vector<1x1x32x32xf32> to vector<32x32xf32>
    %436 = vector.extract_strided_slice %304 {offsets = [4, 0], sizes = [1, 32], strides = [1, 1]} : vector<15x32xf32> to vector<1x32xf32>
    %c1_170 = arith.constant 1 : index
    %c5_171 = arith.constant 5 : index
    %c0_172 = arith.constant 0 : index
    %c0_173 = arith.constant 0 : index
    %437 = vector.load %arg3[%c1_170, %c5_171, %c0_172, %c0_173] : memref<2x8x32x32xf32, #tpu.memory_space<vmem>>, vector<1x1x32x32xf32>
    %438 = vector.shape_cast %437 : vector<1x1x32x32xf32> to vector<32x32xf32>
    %439 = vector.extract_strided_slice %304 {offsets = [5, 0], sizes = [1, 32], strides = [1, 1]} : vector<15x32xf32> to vector<1x32xf32>
    %c1_174 = arith.constant 1 : index
    %c6_175 = arith.constant 6 : index
    %c0_176 = arith.constant 0 : index
    %c0_177 = arith.constant 0 : index
    %440 = vector.load %arg3[%c1_174, %c6_175, %c0_176, %c0_177] : memref<2x8x32x32xf32, #tpu.memory_space<vmem>>, vector<1x1x32x32xf32>
    %441 = vector.shape_cast %440 : vector<1x1x32x32xf32> to vector<32x32xf32>
    %442 = vector.extract_strided_slice %304 {offsets = [6, 0], sizes = [1, 32], strides = [1, 1]} : vector<15x32xf32> to vector<1x32xf32>
    %c1_178 = arith.constant 1 : index
    %c7_179 = arith.constant 7 : index
    %c0_180 = arith.constant 0 : index
    %c0_181 = arith.constant 0 : index
    %443 = vector.load %arg3[%c1_178, %c7_179, %c0_180, %c0_181] : memref<2x8x32x32xf32, #tpu.memory_space<vmem>>, vector<1x1x32x32xf32>
    %444 = vector.shape_cast %443 : vector<1x1x32x32xf32> to vector<32x32xf32>
    %445 = vector.extract_strided_slice %304 {offsets = [7, 0], sizes = [1, 32], strides = [1, 1]} : vector<15x32xf32> to vector<1x32xf32>
    %cst_182 = arith.constant dense<0.000000e+00> : vector<8x32xf32>
    %446 = tpu.matmul %433, %435, %cst_182 {dimension_numbers = #tpu.dot_dimension_numbers<[1], [0], [0], [1], [0, 0, 1, 1], [], []>} : vector<8x32xf32>, vector<32x32xf32>, vector<8x32xf32> -> vector<8x32xf32>
    %447 = vector.broadcast %436 : vector<1x32xf32> to vector<8x32xf32>
    %448 = arith.addf %446, %447 : vector<8x32xf32>
    %cst_183 = arith.constant dense<0.000000e+00> : vector<16x32xf32>
    %449 = tpu.matmul %3, %438, %cst_183 {dimension_numbers = #tpu.dot_dimension_numbers<[1], [0], [0], [1], [0, 0, 1, 1], [], []>} : vector<16x32xf32>, vector<32x32xf32>, vector<16x32xf32> -> vector<16x32xf32>
    %450 = vector.broadcast %439 : vector<1x32xf32> to vector<16x32xf32>
    %451 = arith.addf %449, %450 : vector<16x32xf32>
    %cst_184 = arith.constant dense<0.000000e+00> : vector<16x32xf32>
    %452 = tpu.matmul %3, %441, %cst_184 {dimension_numbers = #tpu.dot_dimension_numbers<[1], [0], [0], [1], [0, 0, 1, 1], [], []>} : vector<16x32xf32>, vector<32x32xf32>, vector<16x32xf32> -> vector<16x32xf32>
    %453 = vector.broadcast %442 : vector<1x32xf32> to vector<16x32xf32>
    %454 = arith.addf %452, %453 : vector<16x32xf32>
    %cst_185 = arith.constant 0.000000e+00 : f32
    %455 = vector.broadcast %cst_185 : f32 to vector<8x32xf32>
    %456 = vector.extract_strided_slice %448 {offsets = [0, 0], sizes = [8, 8], strides = [1, 1]} : vector<8x32xf32> to vector<8x8xf32>
    %457 = vector.extract_strided_slice %451 {offsets = [0, 0], sizes = [16, 8], strides = [1, 1]} : vector<16x32xf32> to vector<16x8xf32>
    %458 = vector.extract_strided_slice %454 {offsets = [0, 0], sizes = [16, 8], strides = [1, 1]} : vector<16x32xf32> to vector<16x8xf32>
    %cst_186 = arith.constant dense<0.000000e+00> : vector<8x16xf32>
    %459 = tpu.matmul %456, %457, %cst_186 {dimension_numbers = #tpu.dot_dimension_numbers<[1], [1], [0], [0], [0, 0, 1, 0], [], []>} : vector<8x8xf32>, vector<16x8xf32>, vector<8x16xf32> -> vector<8x16xf32>
    %cst_187 = arith.constant 0.353553385 : f32
    %460 = vector.broadcast %cst_187 : f32 to vector<8x16xf32>
    %461 = arith.mulf %459, %460 : vector<8x16xf32>
    %cst_188 = arith.constant dense<0xFF800000> : vector<8xf32>
    %462 = vector.multi_reduction <maximumf>, %461, %cst_188 [1] : vector<8x16xf32> to vector<8xf32>
    %463 = vector.shape_cast %462 : vector<8xf32> to vector<8x1xf32>
    %464 = vector.broadcast %463 : vector<8x1xf32> to vector<8x16xf32>
    %465 = arith.subf %461, %464 : vector<8x16xf32>
    %466 = math.exp %465 : vector<8x16xf32>
    %cst_189 = arith.constant dense<0.000000e+00> : vector<8xf32>
    %467 = vector.multi_reduction <add>, %466, %cst_189 [1] : vector<8x16xf32> to vector<8xf32>
    %468 = vector.shape_cast %467 : vector<8xf32> to vector<8x1xf32>
    %469 = tpu.reciprocal %468 {approx = true} : vector<8x1xf32> -> vector<8x1xf32>
    %470 = vector.broadcast %469 : vector<8x1xf32> to vector<8x16xf32>
    %471 = arith.mulf %466, %470 : vector<8x16xf32>
    %cst_190 = arith.constant dense<0.000000e+00> : vector<8x8xf32>
    %472 = tpu.matmul %471, %458, %cst_190 {dimension_numbers = #tpu.dot_dimension_numbers<[1], [0], [0], [1], [0, 0, 1, 1], [], []>} : vector<8x16xf32>, vector<16x8xf32>, vector<8x8xf32> -> vector<8x8xf32>
    %473 = vector.extract_strided_slice %444 {offsets = [0, 0], sizes = [8, 32], strides = [1, 1]} : vector<32x32xf32> to vector<8x32xf32>
    %cst_191 = arith.constant dense<0.000000e+00> : vector<8x32xf32>
    %474 = tpu.matmul %472, %473, %cst_191 {dimension_numbers = #tpu.dot_dimension_numbers<[1], [0], [0], [1], [0, 0, 1, 1], [], []>} : vector<8x8xf32>, vector<8x32xf32>, vector<8x32xf32> -> vector<8x32xf32>
    %475 = arith.addf %455, %474 : vector<8x32xf32>
    %476 = vector.extract_strided_slice %448 {offsets = [0, 8], sizes = [8, 8], strides = [1, 1]} : vector<8x32xf32> to vector<8x8xf32>
    %477 = vector.extract_strided_slice %451 {offsets = [0, 8], sizes = [16, 8], strides = [1, 1]} : vector<16x32xf32> to vector<16x8xf32>
    %478 = vector.extract_strided_slice %454 {offsets = [0, 8], sizes = [16, 8], strides = [1, 1]} : vector<16x32xf32> to vector<16x8xf32>
    %cst_192 = arith.constant dense<0.000000e+00> : vector<8x16xf32>
    %479 = tpu.matmul %476, %477, %cst_192 {dimension_numbers = #tpu.dot_dimension_numbers<[1], [1], [0], [0], [0, 0, 1, 0], [], []>} : vector<8x8xf32>, vector<16x8xf32>, vector<8x16xf32> -> vector<8x16xf32>
    %cst_193 = arith.constant 0.353553385 : f32
    %480 = vector.broadcast %cst_193 : f32 to vector<8x16xf32>
    %481 = arith.mulf %479, %480 : vector<8x16xf32>
    %cst_194 = arith.constant dense<0xFF800000> : vector<8xf32>
    %482 = vector.multi_reduction <maximumf>, %481, %cst_194 [1] : vector<8x16xf32> to vector<8xf32>
    %483 = vector.shape_cast %482 : vector<8xf32> to vector<8x1xf32>
    %484 = vector.broadcast %483 : vector<8x1xf32> to vector<8x16xf32>
    %485 = arith.subf %481, %484 : vector<8x16xf32>
    %486 = math.exp %485 : vector<8x16xf32>
    %cst_195 = arith.constant dense<0.000000e+00> : vector<8xf32>
    %487 = vector.multi_reduction <add>, %486, %cst_195 [1] : vector<8x16xf32> to vector<8xf32>
    %488 = vector.shape_cast %487 : vector<8xf32> to vector<8x1xf32>
    %489 = tpu.reciprocal %488 {approx = true} : vector<8x1xf32> -> vector<8x1xf32>
    %490 = vector.broadcast %489 : vector<8x1xf32> to vector<8x16xf32>
    %491 = arith.mulf %486, %490 : vector<8x16xf32>
    %cst_196 = arith.constant dense<0.000000e+00> : vector<8x8xf32>
    %492 = tpu.matmul %491, %478, %cst_196 {dimension_numbers = #tpu.dot_dimension_numbers<[1], [0], [0], [1], [0, 0, 1, 1], [], []>} : vector<8x16xf32>, vector<16x8xf32>, vector<8x8xf32> -> vector<8x8xf32>
    %493 = vector.extract_strided_slice %444 {offsets = [8, 0], sizes = [8, 32], strides = [1, 1]} : vector<32x32xf32> to vector<8x32xf32>
    %cst_197 = arith.constant dense<0.000000e+00> : vector<8x32xf32>
    %494 = tpu.matmul %492, %493, %cst_197 {dimension_numbers = #tpu.dot_dimension_numbers<[1], [0], [0], [1], [0, 0, 1, 1], [], []>} : vector<8x8xf32>, vector<8x32xf32>, vector<8x32xf32> -> vector<8x32xf32>
    %495 = arith.addf %475, %494 : vector<8x32xf32>
    %496 = vector.extract_strided_slice %448 {offsets = [0, 16], sizes = [8, 8], strides = [1, 1]} : vector<8x32xf32> to vector<8x8xf32>
    %497 = vector.extract_strided_slice %451 {offsets = [0, 16], sizes = [16, 8], strides = [1, 1]} : vector<16x32xf32> to vector<16x8xf32>
    %498 = vector.extract_strided_slice %454 {offsets = [0, 16], sizes = [16, 8], strides = [1, 1]} : vector<16x32xf32> to vector<16x8xf32>
    %cst_198 = arith.constant dense<0.000000e+00> : vector<8x16xf32>
    %499 = tpu.matmul %496, %497, %cst_198 {dimension_numbers = #tpu.dot_dimension_numbers<[1], [1], [0], [0], [0, 0, 1, 0], [], []>} : vector<8x8xf32>, vector<16x8xf32>, vector<8x16xf32> -> vector<8x16xf32>
    %cst_199 = arith.constant 0.353553385 : f32
    %500 = vector.broadcast %cst_199 : f32 to vector<8x16xf32>
    %501 = arith.mulf %499, %500 : vector<8x16xf32>
    %cst_200 = arith.constant dense<0xFF800000> : vector<8xf32>
    %502 = vector.multi_reduction <maximumf>, %501, %cst_200 [1] : vector<8x16xf32> to vector<8xf32>
    %503 = vector.shape_cast %502 : vector<8xf32> to vector<8x1xf32>
    %504 = vector.broadcast %503 : vector<8x1xf32> to vector<8x16xf32>
    %505 = arith.subf %501, %504 : vector<8x16xf32>
    %506 = math.exp %505 : vector<8x16xf32>
    %cst_201 = arith.constant dense<0.000000e+00> : vector<8xf32>
    %507 = vector.multi_reduction <add>, %506, %cst_201 [1] : vector<8x16xf32> to vector<8xf32>
    %508 = vector.shape_cast %507 : vector<8xf32> to vector<8x1xf32>
    %509 = tpu.reciprocal %508 {approx = true} : vector<8x1xf32> -> vector<8x1xf32>
    %510 = vector.broadcast %509 : vector<8x1xf32> to vector<8x16xf32>
    %511 = arith.mulf %506, %510 : vector<8x16xf32>
    %cst_202 = arith.constant dense<0.000000e+00> : vector<8x8xf32>
    %512 = tpu.matmul %511, %498, %cst_202 {dimension_numbers = #tpu.dot_dimension_numbers<[1], [0], [0], [1], [0, 0, 1, 1], [], []>} : vector<8x16xf32>, vector<16x8xf32>, vector<8x8xf32> -> vector<8x8xf32>
    %513 = vector.extract_strided_slice %444 {offsets = [16, 0], sizes = [8, 32], strides = [1, 1]} : vector<32x32xf32> to vector<8x32xf32>
    %cst_203 = arith.constant dense<0.000000e+00> : vector<8x32xf32>
    %514 = tpu.matmul %512, %513, %cst_203 {dimension_numbers = #tpu.dot_dimension_numbers<[1], [0], [0], [1], [0, 0, 1, 1], [], []>} : vector<8x8xf32>, vector<8x32xf32>, vector<8x32xf32> -> vector<8x32xf32>
    %515 = arith.addf %495, %514 : vector<8x32xf32>
    %516 = vector.extract_strided_slice %448 {offsets = [0, 24], sizes = [8, 8], strides = [1, 1]} : vector<8x32xf32> to vector<8x8xf32>
    %517 = vector.extract_strided_slice %451 {offsets = [0, 24], sizes = [16, 8], strides = [1, 1]} : vector<16x32xf32> to vector<16x8xf32>
    %518 = vector.extract_strided_slice %454 {offsets = [0, 24], sizes = [16, 8], strides = [1, 1]} : vector<16x32xf32> to vector<16x8xf32>
    %cst_204 = arith.constant dense<0.000000e+00> : vector<8x16xf32>
    %519 = tpu.matmul %516, %517, %cst_204 {dimension_numbers = #tpu.dot_dimension_numbers<[1], [1], [0], [0], [0, 0, 1, 0], [], []>} : vector<8x8xf32>, vector<16x8xf32>, vector<8x16xf32> -> vector<8x16xf32>
    %cst_205 = arith.constant 0.353553385 : f32
    %520 = vector.broadcast %cst_205 : f32 to vector<8x16xf32>
    %521 = arith.mulf %519, %520 : vector<8x16xf32>
    %cst_206 = arith.constant dense<0xFF800000> : vector<8xf32>
    %522 = vector.multi_reduction <maximumf>, %521, %cst_206 [1] : vector<8x16xf32> to vector<8xf32>
    %523 = vector.shape_cast %522 : vector<8xf32> to vector<8x1xf32>
    %524 = vector.broadcast %523 : vector<8x1xf32> to vector<8x16xf32>
    %525 = arith.subf %521, %524 : vector<8x16xf32>
    %526 = math.exp %525 : vector<8x16xf32>
    %cst_207 = arith.constant dense<0.000000e+00> : vector<8xf32>
    %527 = vector.multi_reduction <add>, %526, %cst_207 [1] : vector<8x16xf32> to vector<8xf32>
    %528 = vector.shape_cast %527 : vector<8xf32> to vector<8x1xf32>
    %529 = tpu.reciprocal %528 {approx = true} : vector<8x1xf32> -> vector<8x1xf32>
    %530 = vector.broadcast %529 : vector<8x1xf32> to vector<8x16xf32>
    %531 = arith.mulf %526, %530 : vector<8x16xf32>
    %cst_208 = arith.constant dense<0.000000e+00> : vector<8x8xf32>
    %532 = tpu.matmul %531, %518, %cst_208 {dimension_numbers = #tpu.dot_dimension_numbers<[1], [0], [0], [1], [0, 0, 1, 1], [], []>} : vector<8x16xf32>, vector<16x8xf32>, vector<8x8xf32> -> vector<8x8xf32>
    %533 = vector.extract_strided_slice %444 {offsets = [24, 0], sizes = [8, 32], strides = [1, 1]} : vector<32x32xf32> to vector<8x32xf32>
    %cst_209 = arith.constant dense<0.000000e+00> : vector<8x32xf32>
    %534 = tpu.matmul %532, %533, %cst_209 {dimension_numbers = #tpu.dot_dimension_numbers<[1], [0], [0], [1], [0, 0, 1, 1], [], []>} : vector<8x8xf32>, vector<8x32xf32>, vector<8x32xf32> -> vector<8x32xf32>
    %535 = arith.addf %515, %534 : vector<8x32xf32>
    %536 = vector.broadcast %445 : vector<1x32xf32> to vector<8x32xf32>
    %537 = arith.addf %535, %536 : vector<8x32xf32>
    %538 = arith.addf %433, %537 : vector<8x32xf32>
    %539 = vector.extract_strided_slice %304 {offsets = [10, 0], sizes = [1, 32], strides = [1, 1]} : vector<15x32xf32> to vector<1x32xf32>
    %540 = vector.extract_strided_slice %304 {offsets = [11, 0], sizes = [1, 32], strides = [1, 1]} : vector<15x32xf32> to vector<1x32xf32>
    %cst_210 = arith.constant dense<0.000000e+00> : vector<8xf32>
    %541 = vector.multi_reduction <add>, %538, %cst_210 [1] : vector<8x32xf32> to vector<8xf32>
    %542 = vector.shape_cast %541 : vector<8xf32> to vector<8x1xf32>
    %cst_211 = arith.constant 3.200000e+01 : f32
    %543 = vector.broadcast %cst_211 : f32 to vector<8x1xf32>
    %544 = arith.divf %542, %543 : vector<8x1xf32>
    %545 = vector.broadcast %544 : vector<8x1xf32> to vector<8x32xf32>
    %546 = arith.subf %538, %545 : vector<8x32xf32>
    %547 = arith.mulf %546, %546 : vector<8x32xf32>
    %cst_212 = arith.constant dense<0.000000e+00> : vector<8xf32>
    %548 = vector.multi_reduction <add>, %547, %cst_212 [1] : vector<8x32xf32> to vector<8xf32>
    %549 = vector.shape_cast %548 : vector<8xf32> to vector<8x1xf32>
    %cst_213 = arith.constant 3.200000e+01 : f32
    %550 = vector.broadcast %cst_213 : f32 to vector<8x1xf32>
    %551 = arith.divf %549, %550 : vector<8x1xf32>
    %552 = vector.broadcast %544 : vector<8x1xf32> to vector<8x32xf32>
    %553 = arith.subf %538, %552 : vector<8x32xf32>
    %cst_214 = arith.constant 9.99999974E-6 : f32
    %554 = vector.broadcast %cst_214 : f32 to vector<8x1xf32>
    %555 = arith.addf %551, %554 : vector<8x1xf32>
    %556 = math.rsqrt %555 : vector<8x1xf32>
    %557 = vector.broadcast %556 : vector<8x1xf32> to vector<8x32xf32>
    %558 = arith.mulf %553, %557 : vector<8x32xf32>
    %559 = vector.broadcast %539 : vector<1x32xf32> to vector<8x32xf32>
    %560 = arith.mulf %558, %559 : vector<8x32xf32>
    %561 = vector.broadcast %540 : vector<1x32xf32> to vector<8x32xf32>
    %562 = arith.addf %560, %561 : vector<8x32xf32>
    %c1_215 = arith.constant 1 : index
    %c0_216 = arith.constant 0 : index
    %c0_217 = arith.constant 0 : index
    %563 = vector.load %arg5[%c1_215, %c0_216, %c0_217] : memref<2x32x64xf32, #tpu.memory_space<vmem>>, vector<1x32x64xf32>
    %564 = vector.shape_cast %563 : vector<1x32x64xf32> to vector<32x64xf32>
    %cst_218 = arith.constant dense<0.000000e+00> : vector<8x64xf32>
    %565 = tpu.matmul %562, %564, %cst_218 {dimension_numbers = #tpu.dot_dimension_numbers<[1], [0], [0], [1], [0, 0, 1, 1], [], []>} : vector<8x32xf32>, vector<32x64xf32>, vector<8x64xf32> -> vector<8x64xf32>
    %c1_219 = arith.constant 1 : index
    %c0_220 = arith.constant 0 : index
    %566 = vector.load %arg7[%c1_219, %c0_220] : memref<2x64xf32, #tpu.memory_space<vmem>>, vector<1x64xf32>
    %567 = vector.broadcast %566 : vector<1x64xf32> to vector<8x64xf32>
    %568 = arith.addf %565, %567 : vector<8x64xf32>
    %cst_221 = arith.constant 0.000000e+00 : f32
    %569 = vector.broadcast %cst_221 : f32 to vector<8x64xf32>
    %570 = arith.maximumf %568, %569 : vector<8x64xf32>
    %c1_222 = arith.constant 1 : index
    %c0_223 = arith.constant 0 : index
    %c0_224 = arith.constant 0 : index
    %571 = vector.load %arg6[%c1_222, %c0_223, %c0_224] : memref<2x64x32xf32, #tpu.memory_space<vmem>>, vector<1x64x32xf32>
    %572 = vector.shape_cast %571 : vector<1x64x32xf32> to vector<64x32xf32>
    %cst_225 = arith.constant dense<0.000000e+00> : vector<8x32xf32>
    %573 = tpu.matmul %570, %572, %cst_225 {dimension_numbers = #tpu.dot_dimension_numbers<[1], [0], [0], [1], [0, 0, 1, 1], [], []>} : vector<8x64xf32>, vector<64x32xf32>, vector<8x32xf32> -> vector<8x32xf32>
    %574 = vector.extract_strided_slice %304 {offsets = [14, 0], sizes = [1, 32], strides = [1, 1]} : vector<15x32xf32> to vector<1x32xf32>
    %575 = vector.broadcast %574 : vector<1x32xf32> to vector<8x32xf32>
    %576 = arith.addf %573, %575 : vector<8x32xf32>
    %577 = arith.addf %562, %576 : vector<8x32xf32>
    %578 = vector.extract_strided_slice %304 {offsets = [12, 0], sizes = [1, 32], strides = [1, 1]} : vector<15x32xf32> to vector<1x32xf32>
    %579 = vector.extract_strided_slice %304 {offsets = [13, 0], sizes = [1, 32], strides = [1, 1]} : vector<15x32xf32> to vector<1x32xf32>
    %cst_226 = arith.constant dense<0.000000e+00> : vector<8xf32>
    %580 = vector.multi_reduction <add>, %577, %cst_226 [1] : vector<8x32xf32> to vector<8xf32>
    %581 = vector.shape_cast %580 : vector<8xf32> to vector<8x1xf32>
    %cst_227 = arith.constant 3.200000e+01 : f32
    %582 = vector.broadcast %cst_227 : f32 to vector<8x1xf32>
    %583 = arith.divf %581, %582 : vector<8x1xf32>
    %584 = vector.broadcast %583 : vector<8x1xf32> to vector<8x32xf32>
    %585 = arith.subf %577, %584 : vector<8x32xf32>
    %586 = arith.mulf %585, %585 : vector<8x32xf32>
    %cst_228 = arith.constant dense<0.000000e+00> : vector<8xf32>
    %587 = vector.multi_reduction <add>, %586, %cst_228 [1] : vector<8x32xf32> to vector<8xf32>
    %588 = vector.shape_cast %587 : vector<8xf32> to vector<8x1xf32>
    %cst_229 = arith.constant 3.200000e+01 : f32
    %589 = vector.broadcast %cst_229 : f32 to vector<8x1xf32>
    %590 = arith.divf %588, %589 : vector<8x1xf32>
    %591 = vector.broadcast %583 : vector<8x1xf32> to vector<8x32xf32>
    %592 = arith.subf %577, %591 : vector<8x32xf32>
    %cst_230 = arith.constant 9.99999974E-6 : f32
    %593 = vector.broadcast %cst_230 : f32 to vector<8x1xf32>
    %594 = arith.addf %590, %593 : vector<8x1xf32>
    %595 = math.rsqrt %594 : vector<8x1xf32>
    %596 = vector.broadcast %595 : vector<8x1xf32> to vector<8x32xf32>
    %597 = arith.mulf %592, %596 : vector<8x32xf32>
    %598 = vector.broadcast %578 : vector<1x32xf32> to vector<8x32xf32>
    %599 = arith.mulf %597, %598 : vector<8x32xf32>
    %600 = vector.broadcast %579 : vector<1x32xf32> to vector<8x32xf32>
    %601 = arith.addf %599, %600 : vector<8x32xf32>
    %c0_231 = arith.constant 0 : index
    %c0_232 = arith.constant 0 : index
    %602 = vector.load %arg8[%c0_231, %c0_232] : memref<2x32xf32, #tpu.memory_space<vmem>>, vector<1x32xf32>
    %c1_233 = arith.constant 1 : index
    %c0_234 = arith.constant 0 : index
    %603 = vector.load %arg8[%c1_233, %c0_234] : memref<2x32xf32, #tpu.memory_space<vmem>>, vector<1x32xf32>
    %cst_235 = arith.constant dense<0.000000e+00> : vector<8xf32>
    %604 = vector.multi_reduction <add>, %601, %cst_235 [1] : vector<8x32xf32> to vector<8xf32>
    %605 = vector.shape_cast %604 : vector<8xf32> to vector<8x1xf32>
    %cst_236 = arith.constant 3.200000e+01 : f32
    %606 = vector.broadcast %cst_236 : f32 to vector<8x1xf32>
    %607 = arith.divf %605, %606 : vector<8x1xf32>
    %608 = vector.broadcast %607 : vector<8x1xf32> to vector<8x32xf32>
    %609 = arith.subf %601, %608 : vector<8x32xf32>
    %610 = arith.mulf %609, %609 : vector<8x32xf32>
    %cst_237 = arith.constant dense<0.000000e+00> : vector<8xf32>
    %611 = vector.multi_reduction <add>, %610, %cst_237 [1] : vector<8x32xf32> to vector<8xf32>
    %612 = vector.shape_cast %611 : vector<8xf32> to vector<8x1xf32>
    %cst_238 = arith.constant 3.200000e+01 : f32
    %613 = vector.broadcast %cst_238 : f32 to vector<8x1xf32>
    %614 = arith.divf %612, %613 : vector<8x1xf32>
    %615 = vector.broadcast %607 : vector<8x1xf32> to vector<8x32xf32>
    %616 = arith.subf %601, %615 : vector<8x32xf32>
    %cst_239 = arith.constant 9.99999974E-6 : f32
    %617 = vector.broadcast %cst_239 : f32 to vector<8x1xf32>
    %618 = arith.addf %614, %617 : vector<8x1xf32>
    %619 = math.rsqrt %618 : vector<8x1xf32>
    %620 = vector.broadcast %619 : vector<8x1xf32> to vector<8x32xf32>
    %621 = arith.mulf %616, %620 : vector<8x32xf32>
    %622 = vector.broadcast %602 : vector<1x32xf32> to vector<8x32xf32>
    %623 = arith.mulf %621, %622 : vector<8x32xf32>
    %624 = vector.broadcast %603 : vector<1x32xf32> to vector<8x32xf32>
    %625 = arith.addf %623, %624 : vector<8x32xf32>
    %c0_240 = arith.constant 0 : index
    %c0_241 = arith.constant 0 : index
    %626 = vector.load %arg9[%c0_240, %c0_241] : memref<33x128xf32, #tpu.memory_space<vmem>>, vector<33x128xf32>
    %627 = vector.extract_strided_slice %626 {offsets = [0, 0], sizes = [32, 128], strides = [1, 1]} : vector<33x128xf32> to vector<32x128xf32>
    %cst_242 = arith.constant dense<0.000000e+00> : vector<8x128xf32>
    %628 = tpu.matmul %625, %627, %cst_242 {dimension_numbers = #tpu.dot_dimension_numbers<[1], [0], [0], [1], [0, 0, 1, 1], [], []>} : vector<8x32xf32>, vector<32x128xf32>, vector<8x128xf32> -> vector<8x128xf32>
    %629 = vector.extract_strided_slice %626 {offsets = [32, 0], sizes = [1, 128], strides = [1, 1]} : vector<33x128xf32> to vector<1x128xf32>
    %630 = vector.broadcast %629 : vector<1x128xf32> to vector<8x128xf32>
    %631 = arith.addf %628, %630 : vector<8x128xf32>
    %c0_243 = arith.constant 0 : index
    %c0_244 = arith.constant 0 : index
    %c0_245 = arith.constant 0 : index
    %632 = vector.load %arg10[%c0_243, %c0_244, %c0_245] : memref<1x8x128xf32, #tpu.memory_space<vmem>>, vector<1x8x128xf32>
    %633 = vector.shape_cast %632 : vector<1x8x128xf32> to vector<8x128xf32>
    %634 = vector.shape_cast %631 : vector<8x128xf32> to vector<1x8x128xf32>
    tpu.vector_store %arg10[%c0_243, %c0_244, %c0_245], %634 {strides = array<i32>} : memref<1x8x128xf32, #tpu.memory_space<vmem>>, vector<1x8x128xf32>,
    return
  }
  func.func @transform_0(%arg0: i32) -> (i32, i32, i32) {
    %c0_i32 = arith.constant 0 : i32
    %c0_i32_0 = arith.constant 0 : i32
    %c0_i32_1 = arith.constant 0 : i32
    return %arg0, %c0_i32, %c0_i32_0 : i32, i32, i32
  }
  func.func @transform_1(%arg0: i32) -> (i32, i32, i32) {
    %c0_i32 = arith.constant 0 : i32
    %c0_i32_0 = arith.constant 0 : i32
    %c0_i32_1 = arith.constant 0 : i32
    return %arg0, %c0_i32, %c0_i32_0 : i32, i32, i32
  }
  func.func @transform_2(%arg0: i32) -> (i32, i32, i32, i32) {
    %c0_i32 = arith.constant 0 : i32
    %c0_i32_0 = arith.constant 0 : i32
    %c0_i32_1 = arith.constant 0 : i32
    %c0_i32_2 = arith.constant 0 : i32
    %c0_i32_3 = arith.constant 0 : i32
    return %c0_i32, %c0_i32_0, %c0_i32_1, %c0_i32_2 : i32, i32, i32, i32
  }
  func.func @transform_3(%arg0: i32) -> (i32, i32, i32) {
    %c0_i32 = arith.constant 0 : i32
    %c0_i32_0 = arith.constant 0 : i32
    %c0_i32_1 = arith.constant 0 : i32
    %c0_i32_2 = arith.constant 0 : i32
    return %c0_i32, %c0_i32_0, %c0_i32_1 : i32, i32, i32
  }
  func.func @transform_4(%arg0: i32) -> (i32, i32, i32) {
    %c0_i32 = arith.constant 0 : i32
    %c0_i32_0 = arith.constant 0 : i32
    %c0_i32_1 = arith.constant 0 : i32
    %c0_i32_2 = arith.constant 0 : i32
    return %c0_i32, %c0_i32_0, %c0_i32_1 : i32, i32, i32
  }
  func.func @transform_5(%arg0: i32) -> (i32, i32, i32) {
    %c0_i32 = arith.constant 0 : i32
    %c0_i32_0 = arith.constant 0 : i32
    %c0_i32_1 = arith.constant 0 : i32
    %c0_i32_2 = arith.constant 0 : i32
    return %c0_i32, %c0_i32_0, %c0_i32_1 : i32, i32, i32
  }
  func.func @transform_6(%arg0: i32) -> (i32, i32) {
    %c0_i32 = arith.constant 0 : i32
    %c0_i32_0 = arith.constant 0 : i32
    %c0_i32_1 = arith.constant 0 : i32
    return %c0_i32, %c0_i32_0 : i32, i32
  }
  func.func @transform_7(%arg0: i32) -> (i32, i32) {
    %c0_i32 = arith.constant 0 : i32
    %c0_i32_0 = arith.constant 0 : i32
    %c0_i32_1 = arith.constant 0 : i32
    return %c0_i32, %c0_i32_0 : i32, i32
  }
  func.func @transform_8(%arg0: i32) -> (i32, i32) {
    %c0_i32 = arith.constant 0 : i32
    %c0_i32_0 = arith.constant 0 : i32
    %c0_i32_1 = arith.constant 0 : i32
    return %c0_i32, %c0_i32_0 : i32, i32
  }
  func.func @transform_9(%arg0: i32) -> (i32, i32, i32) {
    %c0_i32 = arith.constant 0 : i32
    %c0_i32_0 = arith.constant 0 : i32
    %c0_i32_1 = arith.constant 0 : i32
    return %arg0, %c0_i32, %c0_i32_0 : i32, i32, i32
  }
}

</mosaic_0001>

<bundles_post_ra>
// kernel: decoder_forward.1
= control target key start
LH: loop header
LB: loop body
LE: loop exit
PB: predicated region body
PF: predicated region fallthrough
CT: control target
= control target key end

     0   :  { %14 = vsyncpa [#allocation3], 0  ;;  %s8117_s0 = inlined_call_operand.vmem [shape: f32[2,8,32], index: 0, kind: input, shape index: {}]   ;;  %s8118_s1 = inlined_call_operand.vmem [shape: f32[2,16,32], index: 1, kind: input, shape index: {}]   ;;  %s8119_s2 = inlined_call_operand.hbm [shape: f32[2,8,32,32], index: 2, kind: input, shape index: {}]   ;;  %s8120_s3 = inlined_call_operand.vmem [shape: f32[2,15,32], index: 3, kind: input, shape index: {}]   ;;  %s8121_s4 = inlined_call_operand.vmem [shape: f32[2,32,64], index: 4, kind: input, shape index: {}]   ;;  %s8122_s5 = inlined_call_operand.vmem [shape: f32[2,64,32], index: 5, kind: input, shape index: {}]   ;;  %s8123_s6 = inlined_call_operand.vmem [shape: f32[2,64], index: 6, kind: input, shape index: {}]   ;;  %s8124_s7 = inlined_call_operand.vmem [shape: f32[2,32], index: 7, kind: input, shape index: {}]   ;;  %s8125_s8 = inlined_call_operand.vmem [shape: f32[33,128], index: 8, kind: input, shape index: {}]   ;;  %s8126_s9 = inlined_call_operand.hbm [shape: f32[2,8,128], index: 9, kind: output, shape index: {}]  }
   0x1   :  { %15 = vsyncpa [#allocation4], 0 }
   0x2   :  { %17 = vsyncpa [#allocation4 + $0x1], 0  ;;  %s7297_s30 = smov 0   ;;  %s7299_s10 = smov 0  }
   0x3   :  { %s7301_s11 = smov 0   ;;  %s7303_s12 = smov 0  }
   0x4 LB: > { %s7318_s13 = sadd.s32 4294967295, %s7235_s12   ;;  %s5954_s14 = sadd.s32 4294967294, %s7235_s12   ;;  %s7235_s12 = sphi %s7303_s12, %s8147_s12   ;;  %s7231_s11 = sphi %s7301_s11, %s8146_s11   ;;  %s7227_s10 = sphi %s7299_s10, %s8145_s10   ;;  %s7223_s30 = sphi %s7297_s30, %s8144_s30  }
   0x5   : > { %s7322_s15 = sadd.s32 1, %s7235_s12   ;;  %s229_s16 = sadd.s32 1, %s7231_s11 }
   0x6   : > { %s226_s17 = ssub.s32 %s7235_s12, %s7322_s15  ;;  %p239_p0 = scmp.ne.s32.totalorder %s7231_s11, %s7227_s10 }
   0x7   : > { %p227_p1 = scmp.eq.s32.totalorder %s226_s17, 0  ;;  %p240_p2 = scmp.eq.s32.totalorder %s7318_s13, 1 }
   0x8   : > { %p245_p3 = scmp.ne.s32.totalorder %s7227_s10, %s7223_s30  ;;  %p246_p4 = scmp.eq.s32.totalorder %s5954_s14, 1 }
   0x9   : > { %s7333_s18 = scalar_select %p227_p1, %s7231_s11, %s229_s16  }
   0xa   : > { %p7335_p5 = por %p240_p2, %p239_p0  ;;  %p7339_p6 = por %p246_p4, %p245_p3 }
   0xb   : > { %p5955_p7 = scmp.ge.s32.totalorder %s7235_s12, 1  ;;  %p253_p8 = scmp.lt.s32.totalorder %s7235_s12, 3 }
   0xc   : > { %s8132_s19 = scalar_select %p7335_p5, 1, 0 }
   0xd   : > { %s8133_s20 = scalar_select %p7339_p6, 1, 0 }
   0xe   : > { %p8127_p9 = scmp.eq.s32.totalorder %s7318_s13, 0  ;;  %p7346_p10 = pnand %p5955_p7, %p253_p8 }
   0xf   : > { %s7237_s22 = smov [#allocation2]   ;;  %s7141_s27 = scalar_lea.hbm %s8119_s2, 8192 }
  0x10   : > { %s8134_s21 = scalar_select %p7346_p10, 1, 0 }
  0x11   : > { %s265_s23 = sshll.u32 %s7237_s22, 4  ;;  %p6949_p11 = pneg %p7346_p10  ;;  %s266_s23 = int_to_ptr.vmem [resolvable:$true] %s265_s23 }
  0x12   : > { %p7142_p13 = scmp.ne.s32.totalorder %s8119_s2, %s7141_s27  ;;  %p7148_p3 = scmp.lt.u32.totalorder %s7141_s27, %s8119_s2 }
  0x13   : > { %p7354_p12 = pnand %p8127_p9, %p6949_p11 }
  0x15   : > { %p7143_p0 = pneg %p7354_p12 }
  0x17   : > { %p7144_p1 = pnand %p7143_p0, %p7142_p13 }
  0x19   : > { %p7145_p2 = pneg %p7144_p1 }
  0x1b   : > { %p7150_p4 = pnand %p7148_p3, %p7145_p2 }
  0x1d   : > { %7153 = shalt.err (!%p7150_p4)
}
  0x1e   : > { %s7154_s17 = scalar_lea.vmem %s266_s23, 8192  ;;  %p7162_p9 = scmp.lt.s32.totalorder %s266_s23, %s266_s23 }
  0x1f   : > { %p7155_p7 = scmp.ne.s32.totalorder %s266_s23, %s7154_s17  ;;  %p7163_p6 = scmp.lt.s32.totalorder %s7154_s17, %s7154_s17 }
  0x21   : > { %p7157_p8 = pnand %p7155_p7, %p7143_p0  ;;  %p7164_p5 = por %p7163_p6, %p7162_p9 }
  0x23   : > { %p7158_p11 = pneg %p7157_p8 }
  0x25   : > { %p7165_p10 = pnand %p7164_p5, %p7158_p11 }
  0x27   : > { %7168 = shalt.err (!%p7165_p10)
}
  0x28   : > { %s7238_s22 = smov 128   ;;  %s7239_s25 = smov 8  }
  0x29   : > { %6952 = dma.hbm_to_vmem [thread:$0]  (!%p7354_p12), %s8119_s2, 8192, %s266_s23, [#allocation3], %s7238_s22, %s7238_s22, %s7239_s25  }
  0x2a   : > { %p8136_p13 = scmp.ne.s32.totalorder %s8134_s21, 0 }
  0x2b   : > { %p8137_p1 = scmp.eq.s32.totalorder (!%p8136_p13), %s7318_s13, 0 }
  0x2c   : > { %314 = sbr.rel (%p8136_p13) target bundleno = 12989 (0x32bd), region = 56 }
  0x33   : > { %7214 = dma.done.wait (%p8137_p1), [#allocation3], 8192   ;;  %p8138_p0 = pmov %p8137_p1 }
  0x34   : > { %p354_p5 = scmp.lt.s32.totalorder %s7318_s13, 1  ;;  %v7240_v0 = vmov 0.0|0.0   ;;  %vm7241_vm0 = vmmov 0   ;;  %v7242_v1 = vmov 0.0   ;;  %v373_v2 = vld [vmem:[#allocation2 + $0x20] sm:$0xff]  ;;  %v374_v3 = vld [vmem:[#allocation2 + $0x28] sm:$0xff]  ;;  %v387_v21 = vlaneseq }
  0x35   : > { %7216 = vsyncadd (%p8138_p0), [#allocation3], 4294959104  ;;  %6771 = vmatprep.subr.bf16.mxu1 %v7240_v0  ;;  %6765 = vmatprep.subr.bf16.mxu0 %v7240_v0  ;;  %v368_v4 = vld [vmem:[#allocation2] sm:$0xff]  ;;  %v6772_v5 = vpack.c.bf16 %v374_v3, %v373_v2  ;;  %v369_v6 = vld [vmem:[#allocation2 + $0x8] sm:$0xff]  ;;  %vm391_vm1 = vcmask 261120   ;;  %vm613_vm2 = vcmask 64512  }
  0x36   : > { %6309 = vmatprep.mubr.msk.f32.mxu1 %vm7241_vm0, %v7242_v1  ;;  %6298 = vmatprep.mubr.msk.f32.mxu0 %vm7241_vm0, %v7242_v1  ;;  %s7388_s21 = scalar_select %p354_p5, %s7318_s13, 1  ;;  %v375_v7 = vld [vmem:[#allocation2 + $0x30] sm:$0xff]  ;;  %v376_v8 = vld [vmem:[#allocation2 + $0x38] sm:$0xff]  ;;  %v6766_v9 = vpack.c.bf16 %v369_v6, %v368_v4  ;;  %v378_v15 = vld [vmem:[#allocation2 + $0x40] sm:$0xff]  ;;  %v7414_v22 = vshrl.u32 %v387_v21, 7  ;;  %vm1939_vm4 = vcmask 130048  }
  0x37   : > { %v370_v10 = vld [vmem:[#allocation2 + $0x10] sm:$0xff]  ;;  %v371_v11 = vld [vmem:[#allocation2 + $0x18] sm:$0xff]  ;;  %6773 = vmatpush3.bf16.msra.mxu1 %v6772_v5  ;;  %v6775_v12 = vpack.c.bf16 %v376_v8, %v375_v7  ;;  %v379_v16 = vld [vmem:[#allocation2 + $0x48] sm:$0xff]  ;;  %s7243_s17 = smov 120   ;;  %s7244_s22 = smov 112   ;;  %vm2963_vm5 = vcmask 523264  }
  0x38   : > { %s5961_s23 = sshll.u32 %s7388_s21, 3  ;;  %6767 = vmatpush3.bf16.msra.mxu0 %v6766_v9  ;;  %6774 = vmatprep.subr.bf16.mxu1 %v7240_v0  ;;  %v6769_v13 = vpack.c.bf16 %v371_v11, %v370_v10  ;;  %v380_v17 = vld [vmem:[#allocation2 + $0x50] sm:$0xff]  ;;  %v6778_v18 = vpack.c.bf16 %v379_v16, %v378_v15  ;;  %v381_v19 = vld [vmem:[#allocation2 + $0x58] sm:$0xff]  ;;  %v7417_v23 = vsub.s32 1, %v7414_v22  ;;  %v7422_v24 = vld [vmem:[%s8120_s3] sm:$0xff]  ;;  %v7425_v25 = vsub.s32 0, %v7414_v22 }
  0x39   : > { %s357_s29 = scalar_lea.vmem %s8117_s0, %s5961_s23  ;;  %6768 = vmatprep.subr.bf16.mxu0 %v7240_v0  ;;  %v6781_v20 = vpack.c.bf16 %v381_v19, %v380_v17  ;;  %v7443_v34 = vsub.s32 2, %v7414_v22  ;;  %s8130_s25 = smov 104   ;;  %v384_v62 = vld [vmem:[#allocation2 + $0x68] sm:$0xff]  ;;  %v383_v5 = vld [vmem:[#allocation2 + $0x60] sm:$0xff]  ;;  %vm7560_vm3 = vmpackc.low %vm613_vm2, %vm613_vm2 }
  0x3a   : > { %v7396_v14 = vld [vmem:[%s357_s29] sm:$0xff]  ;;  %v468_v26 = vrot.slane %v7422_v24, %v7417_v23  ;;  %v390_v27 = vrot.slane %v7422_v24, %v7425_v25  ;;  %s6080_s26 = sshll.u32 %s7388_s21, 4  ;;  %s8141_s16 = smov 104  }
  0x3b   : > { %6776 = vmatpush3.bf16.msra.mxu1 %v6775_v12  ;;  %v542_v35 = vrot.slane %v7422_v24, %v7443_v34  ;;  %s7526_s24 = scalar_lea.vmem %s8118_s1, %s6080_s26  ;;  %s351_s26 = sand.u32 1, %s7227_s10  }
  0x3c   : > { %6770 = vmatpush3.bf16.msra.mxu0 %v6769_v13  ;;  %6323 = vmatprep.subr.mxu1 %v7242_v1  ;;  %s5960_s28 = sshll.u32 %s351_s26, 3  ;;  %s6077_s27 = sshll.u32 %s7318_s13, 7 }
  0x3d   : > { %6777 = vmatprep.subr.bf16.mxu0 %v7240_v0  ;;  %s353_s29 = scalar_lea.vmem [#allocation5], %s5960_s28  ;;  %p8142_p9 = scmp.ne.s32.totalorder %s8132_s19, 0 }
  0x3e   : > { %6310 = vmatmul.mubr.msk.f32.vlgmr.msra.gmra.mrb[0].mxu1 %vm391_vm1, %v7396_v14  ;;  %s5871_s14 = sshll.u32 %s353_s29, 4  ;;  %s7246_s13 = smov [#allocation5]   ;;  %s8077_s14 = int_to_ptr.vmem [resolvable:$true] %s5871_s14 }
  0x3f   : > { %6299 = vmatmul.mubr.msk.f32.vlgmr.msra.gmra.mrb[0].mxu0 %vm391_vm1, %v7396_v14  ;;  %6325 = vmatprep.mubr.msk.f32.mxu1 %vm7241_vm0, %v7242_v1  ;;  %s7173_s28 = sshll.u32 %s7246_s13, 4  ;;  %s7174_s28 = int_to_ptr.vmem [resolvable:$false] %s7173_s28 }
  0x40   : > { %6320 = vmatprep.mubr.msk.f32.mxu0 %vm7241_vm0, %v7242_v1  ;;  %6779 = vmatpush3.bf16.msra.mxu0 %v6778_v18  ;;  %s7175_s23 = scalar_lea.vmem %s7174_s28, 256  ;;  %p7176_p2 = scmp.lt.s32.totalorder %s8077_s14, %s7174_s28 }
  0x41   : > { %6780 = vmatprep.subr.bf16.mxu0 %v7240_v0 }
  0x44   : > { %6782 = vmatpush3.bf16.msra.mxu0 %v6781_v20 }
  0x45   : > { %6333 = vmatprep.subr.mxu0 %v7242_v1 }
  0x47   : > { %6321 = vmatmul.mubr.msk.f32.vlgmr.msra.gmra.mrb[2].mxu0 %vm391_vm1, %v7396_v14 }
  0x48   : > { %6335 = vmatprep.mubr.msk.f32.mxu0 %vm7241_vm0, %v7242_v1 }
 0x111   : > { %v535_v28 = vpop.f32.mrb[0].mxu1 }
 0x112   : > { %v536_v29 = vadd.f32 %v535_v28, %v468_v26  ;;  %v6311_v30 = vpop.f32.mrb[1].mxu1  ;;  %v461_v31 = vpop.f32.mrb[0].mxu0 }
 0x113   : > { %v7431_v32 = vadd.f32 %v461_v31, %v390_v27  ;;  %v6300_v33 = vpop.f32.mrb[1].mxu0 }
 0x114   : > { %777 = vrot.lane.b32.xlu0 %v536_v29, %s7243_s17  ;;  %6324 = vmatpush3.xpose.msk.msra.mxu1 %vm613_vm2, %v536_v29 }
 0x115   : > { %6328 = vmatprep.subr.mxu1 %v7242_v1 }
 0x117   : > { %6326 = vmatmul.mubr.msk.f32.vlgmr.msra.gmra.mrb[2].mxu1 %vm613_vm2, %v7431_v32 }
 0x118   : > { %775 = vrot.lane.b32.xlu0 %v7431_v32, %s7243_s17  ;;  %6330 = vmatprep.mubr.msk.f32.mxu1 %vm7241_vm0, %v7242_v1 }
 0x11a   : > { %v609_v36 = vpop.f32.mrb[2].mxu0 }
 0x11b   : > { %v7447_v37 = vadd.f32 %v609_v36, %v542_v35  ;;  %v6322_v38 = vpop.f32.mrb[3].mxu0 }
 0x11d   : > { %6329 = vmatpush3.msra.mxu1 %v7447_v37 }
 0x11e   : > { %6338 = vmatprep.subr.mxu1 %v7242_v1 }
 0x186   : > { %v778_v39 = vpop.permute.xlu0 %777 }
 0x187   : > { %6334 = vmatpush3.xpose.msk.msra.mxu0 %vm613_vm2, %v778_v39 }
 0x188   : > { %6343 = vmatprep.subr.mxu0 %v7242_v1 }
 0x18a   : > { %v776_v40 = vpop.permute.xlu0 %775 }
 0x18b   : > { %6336 = vmatmul.mubr.msk.f32.vlgmr.msra.gmra.mrb[4].mxu0 %vm613_vm2, %v776_v40 }
 0x18c   : > { %6345 = vmatprep.mubr.msk.f32.mxu0 %vm7241_vm0, %v7242_v1  ;;  %6344 = vmatpush3.msra.mxu0 %v384_v62 }
 0x18d   : > { %6353 = vmatprep.subr.mxu0 %v7242_v1 }
 0x1ea   : > { %v686_v41 = vpop.f32.mrb[2].mxu1 }
 0x1eb   : > { %v690_v42 = vmul.f32 0.35355338, %v686_v41  ;;  %v6327_v43 = vpop.f32.mrb[3].mxu1 }
 0x1ed   : > { %v691_v44 = vsel %vm613_vm2, %v690_v42, -inf }
 0x1ee   : > { %692 = vmax.xlane.f32.xlu1 %v691_v44 }
 0x25e   : > { %v849_v45 = vpop.f32.mrb[4].mxu0 }
 0x25f   : > { %v853_v46 = vmul.f32 0.35355338, %v849_v45  ;;  %v6337_v47 = vpop.f32.mrb[5].mxu0 }
 0x261   : > { %v854_v48 = vsel %vm613_vm2, %v853_v46, -inf }
 0x262   : > { %855 = vmax.xlane.f32.xlu1 %v854_v48 }
 0x27b   : > { %v693_v49 = vpop.xlane.xlu1 %692 }
 0x27c   : > { %v694_v50 = vsub.f32 %v690_v42, %v693_v49 }
 0x27e   : > { %v695_v51 = vmul.f32 1.442695, %v694_v50 }
 0x280   : > { %7061 = vpow2.f32 %v695_v51  ;;  %v386_v51 = vld [vmem:[#allocation2 + $0x78] sm:$0xff] }
 0x28a   : > { %v7062_v52 = vpop.eup %7061 }
 0x28b   : > { %v697_v53 = vsel %vm613_vm2, %v7062_v52, 0.0 }
 0x28c   : > { %698 = vadd.xlane.f32.xlu0 %v697_v53 }
 0x2a2   : > { %1178 = vrot.lane.b32.xlu0 %v7447_v37, %s7244_s22 }
 0x2a6   : > { %1330 = vrot.lane.b32.xlu0 %v536_v29, %s8130_s25 }
 0x2ef   : > { %v856_v54 = vpop.xlane.xlu1 %855 }
 0x2f0   : > { %v857_v55 = vsub.f32 %v853_v46, %v856_v54 }
 0x2f2   : > { %v858_v56 = vmul.f32 1.442695, %v857_v55 }
 0x2f4   : > { %7063 = vpow2.f32 %v858_v56 }
 0x2fe   : > { %v7064_v57 = vpop.eup %7063 }
 0x2ff   : > { %v860_v58 = vsel %vm613_vm2, %v7064_v57, 0.0 }
 0x300   : > { %861 = vadd.xlane.f32.xlu1 %v860_v58 }
 0x311   : > { %866 = vrot.lane.b32.xlu1 %v7447_v37, %s7243_s17 }
 0x315   : > { %1090 = vrot.lane.b32.xlu1 %v536_v29, %s7244_s22 }
 0x319   : > { %v699_v59 = vpop.xlane.xlu0 %698  ;;  %1088 = vrot.lane.b32.xlu1 %v7431_v32, %s7244_s22 }
 0x31a   : > { %7065 = vrcp.f32 %v699_v59 }
 0x31d   : > { %v1179_v7 = vpop.permute.xlu0 %1178 }
 0x321   : > { %v1331_v33 = vpop.permute.xlu0 %1330 }
 0x324   : > { %v7066_v60 = vpop.eup %7065 }
 0x325   : > { %v701_v61 = vmul.f32 %v7066_v60, %v7062_v52  ;;  %v7515_v60 = vsub.s32 3, %v7414_v22 }
 0x327   : > { %6331 = vmatmul.mubr.msk.f32.vlgmr.msra.gmra.mrb[4].mxu1 %vm613_vm2, %v701_v61  ;;  %v1571_v61 = vrot.slane %v7422_v24, %v7515_v60 }
 0x328   : > { %6340 = vmatprep.mubr.msk.f32.mxu1 %vm7241_vm0, %v7242_v1 }
 0x38d   : > { %v862_v63 = vpop.xlane.xlu1 %861 }
 0x38e   : > { %7067 = vrcp.f32 %v862_v63 }
 0x391   : > { %v867_v2 = vpop.permute.xlu1 %866 }
 0x392   : > { %6339 = vmatpush3.msra.mxu1 %v867_v2 }
 0x393   : > { %6348 = vmatprep.subr.mxu1 %v7242_v1 }
 0x395   : > { %v1091_v9 = vpop.permute.xlu1 %1090 }
 0x398   : > { %v7068_v3 = vpop.eup %7067 }
 0x399   : > { %v864_v4 = vmul.f32 %v7068_v3, %v7064_v57  ;;  %v1089_v12 = vpop.permute.xlu1 %1088 }
 0x39b   : > { %6341 = vmatmul.mubr.msk.f32.vlgmr.msra.gmra.mrb[6].mxu1 %vm613_vm2, %v864_v4 }
 0x39c   : > { %6349 = vmatpush3.msra.mxu1 %v383_v5  ;;  %6350 = vmatprep.mubr.msk.f32.mxu1 %vm7241_vm0, %v7242_v1 }
 0x39d   : > { %6358 = vmatprep.subr.mxu1 %v7242_v1 }
 0x3fa   : > { %v771_v6 = vpop.f32.mrb[4].mxu1 }
 0x3fb   : > { %v6332_v8 = vpop.f32.mrb[5].mxu1  ;;  %6351 = vmatmul.mubr.msk.f32.vlgmr.msra.gmra.mrb[8].mxu1 %vm613_vm2, %v771_v6  ;;  %v1604_v6 = vld [vmem:[#allocation2 + $0xa0] sm:$0xff] }
 0x3fc   : > { %6359 = vmatpush3.msra.mxu1 %v1179_v7  ;;  %6360 = vmatprep.mubr.msk.f32.mxu1 %vm7241_vm0, %v7242_v1  ;;  %v1605_v7 = vld [vmem:[#allocation2 + $0xa8] sm:$0xff] }
 0x3fd   : > { %6368 = vmatprep.subr.mxu1 %v7242_v1  ;;  %v6789_v8 = vpack.c.bf16 %v1605_v7, %v1604_v6 }
 0x46e   : > { %v938_v10 = vpop.f32.mrb[6].mxu1 }
 0x46f   : > { %v6342_v11 = vpop.f32.mrb[7].mxu1  ;;  %6346 = vmatmul.mubr.msk.f32.vlgmr.msra.gmra.mrb[6].mxu0 %vm613_vm2, %v938_v10 }
 0x470   : > { %6354 = vmatpush3.xpose.msk.msra.mxu0 %vm613_vm2, %v1091_v9  ;;  %6355 = vmatprep.mubr.msk.f32.mxu0 %vm7241_vm0, %v7242_v1 }
 0x471   : > { %6363 = vmatprep.subr.mxu0 %v7242_v1 }
 0x473   : > { %6356 = vmatmul.mubr.msk.f32.vlgmr.msra.gmra.mrb[8].mxu0 %vm613_vm2, %v1089_v12 }
 0x474   : > { %6365 = vmatprep.mubr.msk.f32.mxu0 %vm7241_vm0, %v7242_v1 }
 0x4ce   : > { %v1084_v13 = vpop.f32.mrb[8].mxu1 }
 0x4cf   : > { %v6352_v15 = vpop.f32.mrb[9].mxu1 }
 0x4d0   : > { %v1606_v15 = vld [vmem:[#allocation2 + $0xb0] sm:$0xff] }
 0x542   : > { %v1011_v16 = vpop.f32.mrb[6].mxu0 }
 0x543   : > { %v1085_v17 = vadd.f32 %v1084_v13, %v1011_v16  ;;  %v6347_v18 = vpop.f32.mrb[7].mxu0  ;;  %v1607_v16 = vld [vmem:[#allocation2 + $0xb8] sm:$0xff] }
 0x544   : > { %v7531_v18 = vld [vmem:[%s7526_s24 + $0x8] sm:$0xff] }
 0x546   : > { %v1162_v19 = vpop.f32.mrb[8].mxu0 }
 0x547   : > { %v1166_v20 = vmul.f32 0.35355338, %v1162_v19  ;;  %v6357_v21 = vpop.f32.mrb[9].mxu0  ;;  %v1599_v19 = vld [vmem:[#allocation2 + $0x80] sm:$0xff] }
 0x549   : > { %v1167_v26 = vsel %vm613_vm2, %v1166_v20, -inf }
 0x54a   : > { %1168 = vmax.xlane.f32.xlu1 %v1167_v26  ;;  %v1601_v26 = vld [vmem:[#allocation2 + $0x90] sm:$0xff] }
 0x5d7   : > { %v1169_v27 = vpop.xlane.xlu1 %1168 }
 0x5d8   : > { %v1170_v28 = vsub.f32 %v1166_v20, %v1169_v27  ;;  %v1600_v20 = vld [vmem:[#allocation2 + $0x88] sm:$0xff]  ;;  %v1602_v27 = vld [vmem:[#allocation2 + $0x98] sm:$0xff] }
 0x5d9   : > { %v6784_v21 = vpack.c.bf16 %v1600_v20, %v1599_v19 }
 0x5da   : > { %v1171_v29 = vmul.f32 1.442695, %v1170_v28  ;;  %v6787_v28 = vpack.c.bf16 %v1602_v27, %v1601_v26 }
 0x5dc   : > { %7069 = vpow2.f32 %v1171_v29 }
 0x5e6   : > { %v7070_v30 = vpop.eup %7069 }
 0x5e7   : > { %v1173_v31 = vsel %vm613_vm2, %v7070_v30, 0.0 }
 0x5e8   : > { %1174 = vadd.xlane.f32.xlu0 %v1173_v31 }
 0x5fe   : > { %1328 = vrot.lane.b32.xlu0 %v7431_v32, %s8130_s25  ;;  %v385_v32 = vld [vmem:[#allocation2 + $0x70] sm:$0xff] }
 0x5ff   : > { %6364 = vmatpush3.msra.mxu0 %v385_v32 }
 0x600   : > { %6373 = vmatprep.subr.mxu0 %v7242_v1 }
 0x675   : > { %v1175_v35 = vpop.xlane.xlu0 %1174 }
 0x676   : > { %7071 = vrcp.f32 %v1175_v35 }
 0x679   : > { %v1329_v39 = vpop.permute.xlu0 %1328 }
 0x680   : > { %v7072_v36 = vpop.eup %7071 }
 0x681   : > { %v1177_v38 = vmul.f32 %v7072_v36, %v7070_v30 }
 0x683   : > { %6361 = vmatmul.mubr.msk.f32.vlgmr.msra.gmra.mrb[10].mxu1 %vm613_vm2, %v1177_v38 }
 0x684   : > { %6369 = vmatpush3.xpose.msk.msra.mxu1 %vm613_vm2, %v1331_v33  ;;  %6370 = vmatprep.mubr.msk.f32.mxu1 %vm7241_vm0, %v7242_v1  ;;  %v7542_v33 = vld [vmem:[%s8120_s3 + $0x8] sm:$0x7f] }
 0x685   : > { %6378 = vmatprep.subr.mxu1 %v7242_v1  ;;  %v1591_v35 = vrot.slane %v7542_v33, %v7425_v25 }
 0x687   : > { %6371 = vmatmul.mubr.msk.f32.vlgmr.msra.gmra.mrb[12].mxu1 %vm613_vm2, %v1329_v39  ;;  %v1596_v39 = vrot.slane %v7542_v33, %v7417_v23 }
 0x688   : > { %6380 = vmatprep.mubr.msk.f32.mxu1 %vm7241_vm0, %v7242_v1  ;;  %6379 = vmatpush3.msra.mxu1 %v386_v51 }
 0x689   : > { %6790 = vmatprep.subr.bf16.mxu1 %v6789_v8 }
 0x756   : > { %v1250_v40 = vpop.f32.mrb[10].mxu1 }
 0x757   : > { %v6362_v41 = vpop.f32.mrb[11].mxu1  ;;  %6366 = vmatmul.mubr.msk.f32.vlgmr.msra.gmra.mrb[10].mxu0 %vm613_vm2, %v1250_v40 }
 0x758   : > { %6375 = vmatprep.mubr.msk.f32.mxu0 %vm7241_vm0, %v7242_v1  ;;  %v7554_v41 = vsub.s32 5, %v7414_v22 }
 0x75a   : > { %v1402_v42 = vpop.f32.mrb[12].mxu1 }
 0x75b   : > { %v1406_v43 = vmul.f32 0.35355338, %v1402_v42  ;;  %v6372_v44 = vpop.f32.mrb[13].mxu1  ;;  %v1698_v42 = vrot.slane %v7422_v24, %v7554_v41 }
 0x75d   : > { %v1407_v45 = vsel %vm613_vm2, %v1406_v43, -inf }
 0x75e   : > { %1408 = vmax.xlane.f32.xlu0 %v1407_v45 }
 0x7eb   : > { %v1409_v46 = vpop.xlane.xlu0 %1408 }
 0x7ec   : > { %v1410_v47 = vsub.f32 %v1406_v43, %v1409_v46 }
 0x7ee   : > { %v1411_v48 = vmul.f32 1.442695, %v1410_v47 }
 0x7f0   : > { %7073 = vpow2.f32 %v1411_v48 }
 0x7fa   : > { %v7074_v49 = vpop.eup %7073 }
 0x7fb   : > { %v1413_v50 = vsel %vm613_vm2, %v7074_v49, 0.0 }
 0x7fc   : > { %1414 = vadd.xlane.f32.xlu1 %v1413_v50  ;;  %v7572_v50 = vsub.s32 4, %v7414_v22 }
 0x80d   : > { %1418 = vrot.lane.b32.xlu1 %v7447_v37, %s8130_s25 }
 0x82a   : > { %v1323_v52 = vpop.f32.mrb[10].mxu0 }
 0x82b   : > { %v1327_v53 = vadd.f32 %v1323_v52, %v1085_v17  ;;  %v6367_v54 = vpop.f32.mrb[11].mxu0  ;;  %v6793_v17 = vpack.c.bf16 %v1607_v16, %v1606_v15  ;;  %v7600_v16 = vsub.s32 6, %v7414_v22 }
 0x82c   : > { %v1621_v54 = vrot.slane %v7422_v24, %v7572_v50 }
 0x889   : > { %v1415_v55 = vpop.xlane.xlu1 %1414 }
 0x88a   : > { %7075 = vrcp.f32 %v1415_v55 }
 0x88d   : > { %v1419_v56 = vpop.permute.xlu1 %1418 }
 0x88e   : > { %6374 = vmatpush3.msra.mxu0 %v1419_v56 }
 0x88f   : > { %6783 = vmatprep.subr.bf16.mxu0 %v7240_v0 }
 0x894   : > { %v7076_v57 = vpop.eup %7075 }
 0x895   : > { %v1417_v58 = vmul.f32 %v7076_v57, %v7074_v49 }
 0x897   : > { %6376 = vmatmul.mubr.msk.f32.vlgmr.msra.gmra.mrb[12].mxu0 %vm613_vm2, %v1417_v58 }
 0x898   : > { %6391 = vmatprep.mubr.msk.f32.mxu0 %vm7241_vm0, %v7242_v1  ;;  %6785 = vmatpush3.bf16.msra.mxu0 %v6784_v21 }
 0x899   : > { %6786 = vmatprep.subr.bf16.mxu0 %v7240_v0 }
 0x89c   : > { %6788 = vmatpush3.bf16.msra.mxu0 %v6787_v28 }
 0x96a   : > { %v1490_v59 = vpop.f32.mrb[12].mxu0 }
 0x96b   : > { %v6377_v37 = vpop.f32.mrb[13].mxu0  ;;  %6381 = vmatmul.mubr.msk.f32.vlgmr.msra.gmra.mrb[14].mxu1 %vm613_vm2, %v1490_v59  ;;  %v1609_v59 = vld [vmem:[#allocation2 + $0xc0] sm:$0xff] }
 0x96c   : > { %6792 = vmatpush3.bf16.msra.mxu1 %v6789_v8  ;;  %v1610_v37 = vld [vmem:[#allocation2 + $0xc8] sm:$0xff] }
 0x96d   : > { %6794 = vmatprep.subr.bf16.mxu1 %v6793_v17 }
 0x970   : > { %6796 = vmatpush3.bf16.msra.mxu1 %v6793_v17 }
 0x971   : > { %6805 = vmatprep.subr.bf16.mxu1 %v7240_v0 }
 0xa3e   : > { %v1563_v62 = vpop.f32.mrb[14].mxu1 }
 0xa3f   : > { %v1567_v63 = vadd.f32 %v1563_v62, %v1327_v53  ;;  %v6382_v2 = vpop.f32.mrb[15].mxu1  ;;  %v6797_v62 = vpack.c.bf16 %v1610_v37, %v1609_v59 }
 0xa41   : > { %v1572_v3 = vadd.f32 %v1571_v61, %v1567_v63  ;;  %v1611_v61 = vld [vmem:[#allocation2 + $0xd0] sm:$0xff]  ;;  %v1612_v63 = vld [vmem:[#allocation2 + $0xd8] sm:$0xff]  ;;  %6798 = vmatprep.subr.bf16.mxu0 %v6797_v62 }
 0xa42   : > { %v6801_v2 = vpack.c.bf16 %v1612_v63, %v1611_v61 }
 0xa43   : > { %v1573_v4 = vadd.f32 %v1572_v3, %v7396_v14  ;;  %v364_v14 = vld [vmem:[%s7526_s24] sm:$0xff] }
 0xa44   : > { %6402 = vmatprep.mubr.msk.f32.mxu1 %vm391_vm1, %v364_v14 }
 0xa45   : > { %v1574_v5 = vsel %vm391_vm1, %v1573_v4, 0.0  ;;  %6403 = vmatmul.mubr.msk.f32.vlgmr.msra.gmra.mrb[16].mxu1 %vm391_vm1, %v7531_v18 }
 0xa46   : > { %1575 = vadd.xlane.f32.xlu1 %v1574_v5  ;;  %6420 = vmatprep.mubr.msk.f32.mxu1 %vm7241_vm0, %v7242_v1 }
 0xad3   : > { %v1576_v9 = vpop.xlane.xlu1 %1575 }
 0xad4   : > { %v1578_v10 = vmul.f32 0.03125, %v1576_v9 }
 0xad6   : > { %v1579_v11 = vsub.f32 %v1573_v4, %v1578_v10 }
 0xad8   : > { %v1580_v12 = vmul.f32 %v1579_v11, %v1579_v11 }
 0xada   : > { %v1581_v13 = vsel %vm391_vm1, %v1580_v12, 0.0 }
 0xadb   : > { %1582 = vadd.xlane.f32.xlu0 %v1581_v13 }
 0xb18   : > { %v6404_v43 = vpop.f32.mrb[16].mxu1 }
 0xb19   : > { %v1777_v44 = vadd.f32 %v6404_v43, %v1698_v42  ;;  %v1771_v45 = vpop.f32.mrb[17].mxu1 }
 0xb1a   : > { %v1772_v46 = vadd.f32 %v1771_v45, %v1698_v42  ;;  %v1614_v42 = vld [vmem:[#allocation2 + $0xe0] sm:$0xff] }
 0xb1c   : > { %v6806_v48 = vpack.c.bf16 %v1777_v44, %v1772_v46  ;;  %v7564_v49 = vpack.i.bf16 %v1777_v44, %v1772_v46 }
 0xb1e   : > { %7002 = vrot.lane.b32.xlu0 %v7564_v49, %s7243_s17  ;;  %6808 = vmatpush3.bf16.xpose.msk.msra.mxu1 %vm7560_vm3, %v6806_v48 }
 0xb1f   : > { %6812 = vmatprep.subr.bf16.mxu1 %v7240_v0 }
 0xb68   : > { %v1583_v29 = vpop.xlane.xlu0 %1582 }
 0xb69   : > { %v1584_v30 = vmul.f32 0.03125, %v1583_v29 }
 0xb6b   : > { %v1585_v31 = vadd.f32 1e-05, %v1584_v30 }
 0xb6d   : > { %7077 = vrsqrt.f32 %v1585_v31 }
 0xb77   : > { %v7078_v36 = vpop.eup %7077 }
 0xb78   : > { %v1587_v38 = vmul.f32 %v7078_v36, %v1579_v11 }
 0xb7a   : > { %v1592_v32 = vmul.f32 %v1591_v35, %v1587_v38 }
 0xb7c   : > { %v7548_v40 = vadd.f32 %v1596_v39, %v1592_v32 }
 0xb7e   : > { %6392 = vmatmul.mubr.msk.f32.vlgmr.msra.gmra.mrb[14].mxu0 %vm391_vm1, %v7548_v40 }
 0xb7f   : > { %6413 = vmatprep.mubr.msk.f32.mxu0 %vm391_vm1, %v364_v14  ;;  %6800 = vmatpush3.bf16.msra.mxu0 %v6797_v62 }
 0xb80   : > { %6802 = vmatprep.subr.bf16.mxu0 %v6801_v2 }
 0xb83   : > { %6804 = vmatpush3.bf16.msra.mxu0 %v6801_v2 }
 0xb84   : > { %6809 = vmatprep.subr.bf16.mxu0 %v7240_v0 }
 0xb86   : > { %6414 = vmatmul.mubr.msk.f32.vlgmr.msra.gmra.mrb[16].mxu0 %vm391_vm1, %v7531_v18  ;;  %v1783_v18 = vrot.slane %v7422_v24, %v7600_v16 }
 0xb87   : > { %6427 = vmatprep.mubr.msk.f32.mxu0 %vm7241_vm0, %v7242_v1 }
 0xb90   : > { %v7003_v51 = vpop.permute.xlu0 %7002 }
 0xb91   : > { %v7005_v52 = vunpack.i.h.bf16 %v7003_v51  ;;  %v7004_v53 = vunpack.i.l.bf16 %v7003_v51 }
 0xb93   : > { %v6813_v56 = vpack.c.bf16 %v7005_v52, %v7004_v53  ;;  %v1615_v52 = vld [vmem:[#allocation2 + $0xe8] sm:$0xff] }
 0xc51   : > { %v1691_v55 = vpop.f32.mrb[14].mxu0 }
 0xc52   : > { %v7576_v57 = vadd.f32 %v1691_v55, %v1621_v54  ;;  %v6393_v58 = vpop.f32.mrb[15].mxu0 }
 0xc54   : > { %2024 = vrot.lane.b32.xlu0 %v7576_v57, %s7243_s17  ;;  %6421 = vmatmul.mubr.msk.f32.vlgmr.msra.gmra.mrb[18].mxu1 %vm613_vm2, %v7576_v57 }
 0xc55   : > { %6815 = vmatpush3.bf16.xpose.msk.msra.mxu1 %vm7560_vm3, %v6813_v56  ;;  %6434 = vmatprep.mubr.msk.f32.mxu1 %vm7241_vm0, %v7242_v1 }
 0xc56   : > { %6449 = vmatprep.subr.mxu1 %v7242_v1 }
 0xc59   : > { %v6415_v17 = vpop.f32.mrb[16].mxu0 }
 0xc5a   : > { %v1850_v14 = vpop.f32.mrb[17].mxu0  ;;  %v1856_v19 = vadd.f32 %v6415_v17, %v1783_v18 }
 0xc5b   : > { %v1851_v20 = vadd.f32 %v1850_v14, %v1783_v18 }
 0xc5d   : > { %v7604_v21 = vpack.i.bf16 %v1856_v19, %v1851_v20  ;;  %v6810_v28 = vpack.c.bf16 %v1856_v19, %v1851_v20 }
 0xc5f   : > { %6811 = vmatpush3.bf16.msra.mxu0 %v6810_v28 }
 0xc60   : > { %6816 = vmatprep.subr.bf16.mxu0 %v7240_v0 }
 0xcc6   : > { %v2025_v3 = vpop.permute.xlu0 %2024 }
 0xcc7   : > { %6435 = vmatmul.mubr.msk.f32.vlgmr.msra.gmra.mrb[20].mxu1 %vm613_vm2, %v2025_v3 }
 0xcc8   : > { %6451 = vmatprep.mubr.msk.f32.mxu1 %vm7241_vm0, %v7242_v1  ;;  %6450 = vmatpush3.msra.mxu1 %v1614_v42 }
 0xcc9   : > { %6823 = vmatprep.subr.bf16.mxu1 %v7240_v0 }
 0xd27   : > { %v1934_v4 = vpop.f32.mrb[18].mxu1 }
 0xd28   : > { %v1938_v5 = vmul.f32 0.35355338, %v1934_v4  ;;  %v6422_v6 = vpop.f32.mrb[19].mxu1 }
 0xd2a   : > { %v1940_v7 = vsel %vm1939_vm4, %v1938_v5, -inf }
 0xd2b   : > { %1941 = vmax.xlane.f32.xlu1 %v1940_v7 }
 0xd9a   : > { %v2102_v8 = vpop.f32.mrb[20].mxu1 }
 0xd9b   : > { %v2106_v9 = vmul.f32 0.35355338, %v2102_v8  ;;  %v6436_v10 = vpop.f32.mrb[21].mxu1 }
 0xd9d   : > { %v2107_v11 = vsel %vm1939_vm4, %v2106_v9, -inf }
 0xd9e   : > { %2108 = vmax.xlane.f32.xlu0 %v2107_v11 }
 0xdb4   : > { %7017 = vrot.lane.b32.xlu0 %v7564_v49, %s8130_s25 }
 0xdb8   : > { %v1942_v12 = vpop.xlane.xlu1 %1941 }
 0xdb9   : > { %v1943_v13 = vsub.f32 %v1938_v5, %v1942_v12 }
 0xdbb   : > { %v1944_v15 = vmul.f32 1.442695, %v1943_v13 }
 0xdbd   : > { %7079 = vpow2.f32 %v1944_v15 }
 0xdc7   : > { %v7080_v26 = vpop.eup %7079 }
 0xdc8   : > { %v1946_v27 = vsel %vm1939_vm4, %v7080_v26, 0.0 }
 0xdc9   : > { %1947 = vadd.xlane.f32.xlu1 %v1946_v27 }
 0xe2b   : > { %v2109_v29 = vpop.xlane.xlu0 %2108 }
 0xe2c   : > { %v2110_v30 = vsub.f32 %v2106_v9, %v2109_v29 }
 0xe2e   : > { %v2111_v31 = vmul.f32 1.442695, %v2110_v30 }
 0xe2f   : > { %v7018_v37 = vpop.permute.xlu0 %7017 }
 0xe30   : > { %7081 = vpow2.f32 %v2111_v31  ;;  %v7020_v62 = vunpack.i.h.bf16 %v7018_v37  ;;  %v7019_v63 = vunpack.i.l.bf16 %v7018_v37 }
 0xe32   : > { %v6827_v2 = vpack.c.bf16 %v7020_v62, %v7019_v63  ;;  %v2841_v63 = vsub.s32 7, %v7414_v22  ;;  %v6057_v22 = vld [vmem:[%s8121_s4 + $0x20] sm:$0xff] }
 0xe3a   : > { %v7082_v35 = vpop.eup %7081 }
 0xe3b   : > { %v2113_v36 = vsel %vm1939_vm4, %v7082_v35, 0.0 }
 0xe3c   : > { %2114 = vadd.xlane.f32.xlu1 %v2113_v36 }
 0xe4d   : > { %7007 = vrot.lane.b32.xlu1 %v7604_v21, %s7243_s17 }
 0xe51   : > { %7012 = vrot.lane.b32.xlu1 %v7564_v49, %s7244_s22 }
 0xe55   : > { %2345 = vrot.lane.b32.xlu1 %v7576_v57, %s7244_s22 }
 0xe56   : > { %v1948_v38 = vpop.xlane.xlu1 %1947 }
 0xe57   : > { %7083 = vrcp.f32 %v1948_v38 }
 0xe59   : > { %2592 = vrot.lane.b32.xlu1 %v7576_v57, %s8130_s25 }
 0xe61   : > { %v7084_v39 = vpop.eup %7083 }
 0xe62   : > { %v1950_v32 = vmul.f32 %v7084_v39, %v7080_v26 }
 0xe64   : > { %6428 = vmatmul.mubr.msk.f32.vlgmr.msra.gmra.mrb[18].mxu0 %vm1939_vm4, %v1950_v32 }
 0xe65   : > { %6441 = vmatprep.mubr.msk.f32.mxu0 %vm7241_vm0, %v7242_v1 }
 0xec9   : > { %v2115_v43 = vpop.xlane.xlu1 %2114 }
 0xeca   : > { %7085 = vrcp.f32 %v2115_v43 }
 0xecd   : > { %v7008_v44 = vpop.permute.xlu1 %7007 }
 0xece   : > { %v7010_v45 = vunpack.i.h.bf16 %v7008_v44  ;;  %v7009_v46 = vunpack.i.l.bf16 %v7008_v44 }
 0xed0   : > { %v6817_v48 = vpack.c.bf16 %v7010_v45, %v7009_v46  ;;  %v1616_v45 = vld [vmem:[#allocation2 + $0xf0] sm:$0xff] }
 0xed1   : > { %v7013_v55 = vpop.permute.xlu1 %7012 }
 0xed2   : > { %6818 = vmatpush3.bf16.msra.mxu0 %v6817_v48  ;;  %v7015_v56 = vunpack.i.h.bf16 %v7013_v55  ;;  %v7014_v57 = vunpack.i.l.bf16 %v7013_v55 }
 0xed3   : > { %6444 = vmatprep.subr.mxu0 %v7242_v1 }
 0xed4   : > { %v7086_v49 = vpop.eup %7085  ;;  %v6820_v58 = vpack.c.bf16 %v7015_v56, %v7014_v57  ;;  %v1617_v57 = vld [vmem:[#allocation2 + $0xf8] sm:$0xff] }
 0xed5   : > { %v2117_v51 = vmul.f32 %v7086_v49, %v7082_v35  ;;  %v2346_v3 = vpop.permute.xlu1 %2345 }
 0xed7   : > { %6442 = vmatmul.mubr.msk.f32.vlgmr.msra.gmra.mrb[20].mxu0 %vm1939_vm4, %v2117_v51 }
 0xed8   : > { %6445 = vmatpush3.msra.mxu0 %v1615_v52  ;;  %6446 = vmatprep.mubr.msk.f32.mxu0 %vm7241_vm0, %v7242_v1 }
 0xed9   : > { %6819 = vmatprep.subr.bf16.mxu0 %v7240_v0  ;;  %v2593_v4 = vpop.permute.xlu1 %2592 }
 0xf37   : > { %v2020_v53 = vpop.f32.mrb[18].mxu0 }
 0xf38   : > { %v6429_v54 = vpop.f32.mrb[19].mxu0  ;;  %6452 = vmatmul.mubr.msk.f32.vlgmr.msra.gmra.mrb[22].mxu1 %vm613_vm2, %v2020_v53 }
 0xf39   : > { %6465 = vmatprep.mubr.msk.f32.mxu1 %vm7241_vm0, %v7242_v1 }
 0xfaa   : > { %v2195_v59 = vpop.f32.mrb[20].mxu0 }
 0xfab   : > { %v6443_v61 = vpop.f32.mrb[21].mxu0  ;;  %6447 = vmatmul.mubr.msk.f32.vlgmr.msra.gmra.mrb[22].mxu0 %vm613_vm2, %v2195_v59 }
 0xfac   : > { %6822 = vmatpush3.bf16.xpose.msk.msra.mxu0 %vm7560_vm3, %v6820_v58  ;;  %6458 = vmatprep.mubr.msk.f32.mxu0 %vm7241_vm0, %v7242_v1 }
 0xfad   : > { %6826 = vmatprep.subr.bf16.mxu0 %v7240_v0 }
 0xfb3   : > { %6459 = vmatmul.mubr.msk.f32.vlgmr.msra.gmra.mrb[24].mxu0 %vm613_vm2, %v2346_v3 }
 0xfb4   : > { %6829 = vmatpush3.bf16.xpose.msk.msra.mxu0 %vm7560_vm3, %v6827_v2  ;;  %6477 = vmatprep.mubr.msk.f32.mxu0 %vm7241_vm0, %v7242_v1  ;;  %v2842_v2 = vrot.slane %v7422_v24, %v2841_v63  ;;  %v2868_v24 = vld [vmem:[%s8121_s4] sm:$0xff] }
 0xfb5   : > { %6833 = vmatprep.subr.bf16.mxu0 %v7240_v0 }
 0xfbb   : > { %6478 = vmatmul.mubr.msk.f32.vlgmr.msra.gmra.mrb[26].mxu0 %vm613_vm2, %v2593_v4 }
 0xfbc   : > { %6500 = vmatprep.mubr.msk.f32.mxu0 %vm7241_vm0, %v7242_v1 }
0x100b   : > { %v2341_v5 = vpop.f32.mrb[22].mxu1 }
0x100c   : > { %v6453_v6 = vpop.f32.mrb[23].mxu1 }
0x107e   : > { %v2268_v7 = vpop.f32.mrb[22].mxu0 }
0x107f   : > { %v7644_v8 = vadd.f32 %v2341_v5, %v2268_v7  ;;  %v6448_v9 = vpop.f32.mrb[23].mxu0 }
0x1086   : > { %v2423_v10 = vpop.f32.mrb[24].mxu0 }
0x1087   : > { %v2427_v11 = vmul.f32 0.35355338, %v2423_v10  ;;  %v6460_v12 = vpop.f32.mrb[25].mxu0 }
0x1089   : > { %v2428_v13 = vsel %vm1939_vm4, %v2427_v11, -inf }
0x108a   : > { %2429 = vmax.xlane.f32.xlu1 %v2428_v13 }
0x108e   : > { %v2670_v15 = vpop.f32.mrb[26].mxu0 }
0x108f   : > { %v6479_v17 = vpop.f32.mrb[27].mxu0  ;;  %v2674_v30 = vmul.f32 0.35355338, %v2670_v15  ;;  %v2869_v15 = vld [vmem:[%s8121_s4 + $0x8] sm:$0xff] }
0x1090   : > { %v6834_v17 = vpack.c.bf16 %v2869_v15, %v2868_v24  ;;  %v3077_v24 = vld [vmem:[#allocation2 + $0x150] sm:$0xff] }
0x1091   : > { %v2675_v35 = vsel %vm1939_vm4, %v2674_v30, -inf }
0x1092   : > { %6835 = vmatpush3.bf16.msra.mxu0 %v6834_v17  ;;  %v3078_v17 = vld [vmem:[#allocation2 + $0x158] sm:$0xff] }
0x1093   : > { %6836 = vmatprep.subr.bf16.mxu0 %v7240_v0 }
0x109b   : > { %7022 = vrot.lane.b32.xlu1 %v7604_v21, %s7244_s22 }
0x109f   : > { %7027 = vrot.lane.b32.xlu1 %v7604_v21, %s8130_s25  ;;  %s8075_s25 = scalar_lea.hbm %s8126_s9, %s6077_s27 }
0x1117   : > { %v2430_v14 = vpop.xlane.xlu1 %2429 }
0x1118   : > { %v2431_v18 = vsub.f32 %v2427_v11, %v2430_v14  ;;  %v2871_v14 = vld [vmem:[%s8121_s4 + $0x18] sm:$0xff] }
0x111a   : > { %v2432_v19 = vmul.f32 1.442695, %v2431_v18 }
0x111b   : > { %v7023_v20 = vpop.permute.xlu1 %7022 }
0x111c   : > { %7087 = vpow2.f32 %v2432_v19  ;;  %v7025_v26 = vunpack.i.h.bf16 %v7023_v20  ;;  %v7024_v27 = vunpack.i.l.bf16 %v7023_v20  ;;  %v2951_v19 = vld [vmem:[%s8122_s5] sm:$0xff]  ;;  %v2952_v20 = vld [vmem:[%s8122_s5 + $0x8] sm:$0xff] }
0x111e   : > { %v6824_v28 = vpack.c.bf16 %v7025_v26, %v7024_v27  ;;  %v2953_v26 = vld [vmem:[%s8122_s5 + $0x10] sm:$0xff]  ;;  %v6840_v27 = vpack.c.bf16 %v2952_v20, %v2951_v19  ;;  %v3054_v20 = vrot.slane %v7542_v33, %v7572_v50 }
0x111f   : > { %v7028_v48 = vpop.permute.xlu1 %7027 }
0x1120   : > { %6825 = vmatpush3.bf16.msra.mxu1 %v6824_v28  ;;  %v7030_v49 = vunpack.i.h.bf16 %v7028_v48  ;;  %v7029_v51 = vunpack.i.l.bf16 %v7028_v48  ;;  %v2954_v28 = vld [vmem:[%s8122_s5 + $0x18] sm:$0xff] }
0x1121   : > { %6468 = vmatprep.subr.mxu1 %v7242_v1  ;;  %v2958_v48 = vld [vmem:[%s8122_s5 + $0x38] sm:$0xff] }
0x1122   : > { %v6831_v53 = vpack.c.bf16 %v7030_v49, %v7029_v51  ;;  %v6008_v51 = vld [vmem:[%s8123_s6] ss:$0 sm:$0xff] }
0x1126   : > { %v7088_v29 = vpop.eup %7087 }
0x1127   : > { %v2434_v31 = vsel %vm1939_vm4, %v7088_v29, 0.0 }
0x1128   : > { %2435 = vadd.xlane.f32.xlu0 %v2434_v31  ;;  %v2956_v31 = vld [vmem:[%s8122_s5 + $0x28] sm:$0xff] }
0x112c   : > { %2676 = vmax.xlane.f32.xlu0 %v2675_v35 }
0x11b5   : > { %v2436_v21 = vpop.xlane.xlu0 %2435 }
0x11b6   : > { %7089 = vrcp.f32 %v2436_v21 }
0x11b9   : > { %v2677_v36 = vpop.xlane.xlu0 %2676 }
0x11ba   : > { %v2678_v38 = vsub.f32 %v2674_v30, %v2677_v36  ;;  %v2955_v30 = vld [vmem:[%s8122_s5 + $0x20] sm:$0xff] }
0x11bb   : > { %v6846_v35 = vpack.c.bf16 %v2956_v31, %v2955_v30  ;;  %v3071_v30 = vld [vmem:[#allocation2 + $0x128] sm:$0xff] }
0x11bc   : > { %v2679_v39 = vmul.f32 1.442695, %v2678_v38 }
0x11be   : > { %7091 = vpow2.f32 %v2679_v39  ;;  %v2861_v39 = vrot.slane %v7542_v33, %v7443_v34 }
0x11c0   : > { %v7090_v32 = vpop.eup %7089 }
0x11c1   : > { %v2438_v42 = vmul.f32 %v7090_v32, %v7088_v29  ;;  %v6843_v29 = vpack.c.bf16 %v2954_v28, %v2953_v26  ;;  %v3059_v28 = vrot.slane %v7542_v33, %v7554_v41 }
0x11c3   : > { %6466 = vmatmul.mubr.msk.f32.vlgmr.msra.gmra.mrb[24].mxu1 %vm1939_vm4, %v2438_v42 }
0x11c4   : > { %6470 = vmatprep.mubr.msk.f32.mxu1 %vm7241_vm0, %v7242_v1  ;;  %6469 = vmatpush3.msra.mxu1 %v1616_v45 }
0x11c5   : > { %6830 = vmatprep.subr.bf16.mxu1 %v7240_v0 }
0x11c8   : > { %v7092_v43 = vpop.eup %7091 }
0x11c9   : > { %v2681_v44 = vsel %vm1939_vm4, %v7092_v43, 0.0 }
0x11ca   : > { %2682 = vadd.xlane.f32.xlu0 %v2681_v44 }
0x1257   : > { %v2683_v46 = vpop.xlane.xlu0 %2682 }
0x1258   : > { %7093 = vrcp.f32 %v2683_v46  ;;  %v2957_v46 = vld [vmem:[%s8122_s5 + $0x30] sm:$0xff] }
0x1259   : > { %v6849_v49 = vpack.c.bf16 %v2958_v48, %v2957_v46 }
0x1262   : > { %v7094_v52 = vpop.eup %7093 }
0x1263   : > { %v2685_v56 = vmul.f32 %v7094_v52, %v7092_v43  ;;  %v2866_v43 = vrot.slane %v7542_v33, %v7515_v60 }
0x1296   : > { %v2514_v54 = vpop.f32.mrb[24].mxu1 }
0x1297   : > { %v6467_v55 = vpop.f32.mrb[25].mxu1  ;;  %6471 = vmatmul.mubr.msk.f32.vlgmr.msra.gmra.mrb[26].mxu1 %vm613_vm2, %v2514_v54 }
0x1298   : > { %6832 = vmatpush3.bf16.msra.mxu1 %v6831_v53  ;;  %6484 = vmatprep.mubr.msk.f32.mxu1 %vm7241_vm0, %v7242_v1 }
0x1299   : > { %6487 = vmatprep.subr.mxu1 %v7242_v1 }
0x129b   : > { %6485 = vmatmul.mubr.msk.f32.vlgmr.msra.gmra.mrb[28].mxu1 %vm1939_vm4, %v2685_v56  ;;  %v2962_v56 = vrot.slane %v7542_v33, %v7600_v16  ;;  %v7764_v33 = vld [vmem:[%s8120_s3 + $0x10] sm:$0xff] }
0x129c   : > { %6489 = vmatprep.mubr.msk.f32.mxu1 %vm7241_vm0, %v7242_v1  ;;  %6488 = vmatpush3.msra.mxu1 %v1617_v57  ;;  %v3164_v48 = vrot.slane %v7764_v33, %v7417_v23 }
0x129d   : > { %6839 = vmatprep.subr.bf16.mxu1 %v7240_v0 }
0x136a   : > { %v2587_v58 = vpop.f32.mrb[26].mxu1 }
0x136b   : > { %v2591_v59 = vadd.f32 %v2587_v58, %v7644_v8  ;;  %v6472_v37 = vpop.f32.mrb[27].mxu1 }
0x136e   : > { %v2761_v61 = vpop.f32.mrb[28].mxu1 }
0x136f   : > { %v6486_v62 = vpop.f32.mrb[29].mxu1  ;;  %6490 = vmatmul.mubr.msk.f32.vlgmr.msra.gmra.mrb[30].mxu1 %vm613_vm2, %v2761_v61 }
0x1370   : > { %6519 = vmatprep.mubr.msk.f32.mxu1 %vm7241_vm0, %v7242_v1  ;;  %6841 = vmatpush3.bf16.msra.mxu1 %v6840_v27 }
0x1371   : > { %6842 = vmatprep.subr.bf16.mxu1 %v7240_v0 }
0x1374   : > { %6844 = vmatpush3.bf16.msra.mxu1 %v6843_v29  ;;  %v3070_v29 = vld [vmem:[#allocation2 + $0x120] sm:$0xff] }
0x1375   : > { %6845 = vmatprep.subr.bf16.mxu1 %v7240_v0 }
0x1378   : > { %6847 = vmatpush3.bf16.msra.mxu1 %v6846_v35  ;;  %v6858_v35 = vpack.c.bf16 %v3071_v30, %v3070_v29 }
0x1379   : > { %6848 = vmatprep.subr.bf16.mxu1 %v7240_v0 }
0x137c   : > { %6850 = vmatpush3.bf16.msra.mxu1 %v6849_v49  ;;  %v3087_v49 = vrot.slane %v7764_v33, %v7425_v25 }
0x137d   : > { %6863 = vmatprep.subr.bf16.mxu1 %v7240_v0 }
0x1442   : > { %v2834_v3 = vpop.f32.mrb[30].mxu1 }
0x1443   : > { %v2838_v4 = vadd.f32 %v2834_v3, %v2591_v59  ;;  %v6491_v5 = vpop.f32.mrb[31].mxu1 }
0x1445   : > { %v2843_v6 = vadd.f32 %v2842_v2, %v2838_v4 }
0x1447   : > { %v2844_v7 = vadd.f32 %v2843_v6, %v7548_v40  ;;  %v2870_v40 = vld [vmem:[%s8121_s4 + $0x10] sm:$0xff]  ;;  %v3065_v6 = vld [vmem:[#allocation2 + $0x100] sm:$0xff] }
0x1448   : > { %v6837_v18 = vpack.c.bf16 %v2871_v14, %v2870_v40  ;;  %v6867_v40 = vpack.c.bf16 %v3078_v17, %v3077_v24 }
0x1449   : > { %v2845_v8 = vsel %vm391_vm1, %v2844_v7, 0.0 }
0x144a   : > { %2846 = vadd.xlane.f32.xlu0 %v2845_v8  ;;  %6838 = vmatpush3.bf16.msra.mxu0 %v6837_v18 }
0x144b   : > { %6851 = vmatprep.subr.bf16.mxu0 %v7240_v0 }
0x14d7   : > { %v2847_v9 = vpop.xlane.xlu0 %2846 }
0x14d8   : > { %v2848_v10 = vmul.f32 0.03125, %v2847_v9  ;;  %v3075_v9 = vld [vmem:[#allocation2 + $0x140] sm:$0xff] }
0x14da   : > { %v2849_v11 = vsub.f32 %v2844_v7, %v2848_v10  ;;  %v3066_v7 = vld [vmem:[#allocation2 + $0x108] sm:$0xff] }
0x14db   : > { %v6852_v8 = vpack.c.bf16 %v3066_v7, %v3065_v6  ;;  %v3076_v10 = vld [vmem:[#allocation2 + $0x148] sm:$0xff] }
0x14dc   : > { %v2850_v12 = vmul.f32 %v2849_v11, %v2849_v11 }
0x14de   : > { %v2851_v13 = vsel %vm391_vm1, %v2850_v12, 0.0  ;;  %v3067_v12 = vld [vmem:[#allocation2 + $0x110] sm:$0xff] }
0x14df   : > { %2852 = vadd.xlane.f32.xlu1 %v2851_v13  ;;  %v3068_v13 = vld [vmem:[#allocation2 + $0x118] sm:$0xff] }
0x14e0   : > { %v6855_v15 = vpack.c.bf16 %v3068_v13, %v3067_v12 }
0x156c   : > { %v2853_v21 = vpop.xlane.xlu1 %2852 }
0x156d   : > { %v2854_v36 = vmul.f32 0.03125, %v2853_v21 }
0x156f   : > { %v2855_v38 = vadd.f32 1e-05, %v2854_v36  ;;  %v3072_v36 = vld [vmem:[#allocation2 + $0x130] sm:$0xff] }
0x1571   : > { %7095 = vrsqrt.f32 %v2855_v38  ;;  %v3073_v38 = vld [vmem:[#allocation2 + $0x138] sm:$0xff] }
0x157b   : > { %v7096_v32 = vpop.eup %7095 }
0x157c   : > { %v2857_v42 = vmul.f32 %v7096_v32, %v2849_v11  ;;  %v6864_v11 = vpack.c.bf16 %v3076_v10, %v3075_v9  ;;  %v3238_v32 = vrot.slane %v7764_v33, %v7443_v34 }
0x157e   : > { %v2862_v44 = vmul.f32 %v2861_v39, %v2857_v42  ;;  %v6861_v39 = vpack.c.bf16 %v3073_v38, %v3072_v36 }
0x1580   : > { %v2867_v45 = vadd.f32 %v2866_v43, %v2862_v44 }
0x1582   : > { %6501 = vmatmul.mubr.msk.f32.vlgmr.msra.gmra.mrb[28].mxu0 %vm391_vm1, %v2867_v45 }
0x1583   : > { %6530 = vmatprep.mubr.msk.f32.mxu0 %vm7241_vm0, %v7242_v1  ;;  %6853 = vmatpush3.bf16.msra.mxu0 %v6852_v8 }
0x1584   : > { %6854 = vmatprep.subr.bf16.mxu0 %v7240_v0 }
0x1587   : > { %6856 = vmatpush3.bf16.msra.mxu0 %v6855_v15 }
0x1588   : > { %6857 = vmatprep.subr.bf16.mxu0 %v7240_v0 }
0x1655   : > { %v2946_v52 = vpop.f32.mrb[28].mxu0 }
0x1656   : > { %v2947_v53 = vadd.f32 %v6008_v51, %v2946_v52  ;;  %v6502_v54 = vpop.f32.mrb[29].mxu0 }
0x1658   : > { %v2950_v55 = vmax.f32 %v2947_v53, 0.0 }
0x165a   : > { %6520 = vmatmul.mubr.msk.f32.vlgmr.msra.gmra.mrb[32].mxu1 %vm2963_vm5, %v2950_v55 }
0x165b   : > { %6552 = vmatprep.mubr.msk.f32.mxu1 %vm7241_vm0, %v7242_v1  ;;  %6865 = vmatpush3.bf16.msra.mxu1 %v6864_v11 }
0x165c   : > { %6866 = vmatprep.subr.bf16.mxu1 %v7240_v0 }
0x165f   : > { %6868 = vmatpush3.bf16.msra.mxu1 %v6867_v40  ;;  %v3081_v40 = vld [vmem:[#allocation2 + $0x168] sm:$0xff] }
0x1660   : > { %6560 = vmatprep.subr.mxu1 %v7242_v1 }
0x172d   : > { %v3033_v57 = vpop.f32.mrb[32].mxu1 }
0x172e   : > { %v3034_v58 = vadd.f32 %v3033_v57, %v2962_v56  ;;  %v6521_v59 = vpop.f32.mrb[33].mxu1 }
0x1730   : > { %v3037_v37 = vadd.f32 %v3034_v58, %v2867_v45 }
0x1732   : > { %v3038_v61 = vsel %vm391_vm1, %v3037_v37, 0.0 }
0x1733   : > { %3039 = vadd.xlane.f32.xlu0 %v3038_v61 }
0x17c0   : > { %v3040_v62 = vpop.xlane.xlu0 %3039 }
0x17c1   : > { %v3041_v2 = vmul.f32 0.03125, %v3040_v62 }
0x17c3   : > { %v3042_v3 = vsub.f32 %v3037_v37, %v3041_v2 }
0x17c5   : > { %v3043_v4 = vmul.f32 %v3042_v3, %v3042_v3 }
0x17c7   : > { %v3044_v5 = vsel %vm391_vm1, %v3043_v4, 0.0 }
0x17c8   : > { %3045 = vadd.xlane.f32.xlu0 %v3044_v5 }
0x1855   : > { %v3046_v14 = vpop.xlane.xlu0 %3045 }
0x1856   : > { %v3047_v18 = vmul.f32 0.03125, %v3046_v14 }
0x1858   : > { %v3048_v19 = vadd.f32 1e-05, %v3047_v18 }
0x185a   : > { %7097 = vrsqrt.f32 %v3048_v19 }
0x1864   : > { %v7098_v26 = vpop.eup %7097 }
0x1865   : > { %v3050_v27 = vmul.f32 %v7098_v26, %v3042_v3  ;;  %v3080_v26 = vld [vmem:[#allocation2 + $0x160] sm:$0xff] }
0x1867   : > { %v3055_v31 = vmul.f32 %v3054_v20, %v3050_v27 }
0x1869   : > { %v7745_v21 = vadd.f32 %v3059_v28, %v3055_v31 }
0x186b   : > { %6531 = vmatmul.mubr.msk.f32.vlgmr.msra.gmra.mrb[30].mxu0 %vm391_vm1, %v7745_v21  ;;  %6553 = vmatmul.mubr.msk.f32.vlgmr.msra.gmra.mrb[34].mxu1 %vm391_vm1, %v7745_v21 }
0x186c   : > { %6859 = vmatpush3.bf16.msra.mxu0 %v6858_v35  ;;  %6541 = vmatprep.mubr.msk.f32.mxu0 %vm7241_vm0, %v7242_v1 }
0x186d   : > { %6860 = vmatprep.subr.bf16.mxu0 %v7240_v0  ;;  %6562 = vmatprep.mubr.msk.f32.mxu1 %vm7241_vm0, %v7242_v1 }
0x1870   : > { %6862 = vmatpush3.bf16.msra.mxu0 %v6861_v39 }
0x1871   : > { %6555 = vmatprep.subr.mxu0 %v7242_v1 }
0x1873   : > { %6542 = vmatmul.mubr.msk.f32.vlgmr.msra.gmra.mrb[32].mxu0 %vm391_vm1, %v7745_v21 }
0x1874   : > { %6557 = vmatprep.mubr.msk.f32.mxu0 %vm7241_vm0, %v7242_v1 }
0x193e   : > { %v3157_v42 = vpop.f32.mrb[30].mxu0  ;;  %v3305_v43 = vpop.f32.mrb[34].mxu1 }
0x193f   : > { %v7768_v44 = vadd.f32 %v3305_v43, %v3238_v32  ;;  %v6532_v45 = vpop.f32.mrb[31].mxu0  ;;  %v6554_v46 = vpop.f32.mrb[35].mxu1  ;;  %v7782_v54 = vadd.f32 %v3157_v42, %v3087_v49 }
0x1941   : > { %6561 = vmatpush3.msra.mxu1 %v7768_v44 }
0x1942   : > { %6570 = vmatprep.subr.mxu1 %v7242_v1 }
0x1946   : > { %v3231_v51 = vpop.f32.mrb[32].mxu0 }
0x1947   : > { %v7776_v52 = vadd.f32 %v3231_v51, %v3164_v48  ;;  %v6543_v53 = vpop.f32.mrb[33].mxu0 }
0x1949   : > { %3472 = vrot.lane.b32.xlu0 %v7776_v52, %s7243_s17  ;;  %6556 = vmatpush3.xpose.msk.msra.mxu0 %vm613_vm2, %v7776_v52 }
0x194a   : > { %6565 = vmatprep.subr.mxu0 %v7242_v1 }
0x194c   : > { %6558 = vmatmul.mubr.msk.f32.vlgmr.msra.gmra.mrb[34].mxu0 %vm613_vm2, %v7782_v54 }
0x194d   : > { %3470 = vrot.lane.b32.xlu0 %v7782_v54, %s7243_s17  ;;  %6567 = vmatprep.mubr.msk.f32.mxu0 %vm7241_vm0, %v7242_v1 }
0x19bb   : > { %v3473_v55 = vpop.permute.xlu0 %3472 }
0x19bc   : > { %6566 = vmatpush3.xpose.msk.msra.mxu0 %vm613_vm2, %v3473_v55 }
0x19bd   : > { %6575 = vmatprep.subr.mxu0 %v7242_v1 }
0x19bf   : > { %v3471_v56 = vpop.permute.xlu0 %3470 }
0x19c0   : > { %6568 = vmatmul.mubr.msk.f32.vlgmr.msra.gmra.mrb[36].mxu0 %vm613_vm2, %v3471_v56 }
0x19c1   : > { %6577 = vmatprep.mubr.msk.f32.mxu0 %vm7241_vm0, %v7242_v1  ;;  %6576 = vmatpush3.msra.mxu0 %v3081_v40 }
0x19c2   : > { %6585 = vmatprep.subr.mxu0 %v7242_v1 }
0x1a1f   : > { %v3381_v57 = vpop.f32.mrb[34].mxu0 }
0x1a20   : > { %v3385_v58 = vmul.f32 0.35355338, %v3381_v57  ;;  %v6559_v59 = vpop.f32.mrb[35].mxu0 }
0x1a22   : > { %v3386_v37 = vsel %vm613_vm2, %v3385_v58, -inf }
0x1a23   : > { %3387 = vmax.xlane.f32.xlu0 %v3386_v37 }
0x1a39   : > { %3783 = vrot.lane.b32.xlu0 %v7782_v54, %s7244_s22 }
0x1a93   : > { %v3544_v61 = vpop.f32.mrb[36].mxu0 }
0x1a94   : > { %v3548_v62 = vmul.f32 0.35355338, %v3544_v61  ;;  %v6569_v2 = vpop.f32.mrb[37].mxu0 }
0x1a96   : > { %v3549_v3 = vsel %vm613_vm2, %v3548_v62, -inf }
0x1a97   : > { %3550 = vmax.xlane.f32.xlu1 %v3549_v3 }
0x1ab0   : > { %v3388_v4 = vpop.xlane.xlu0 %3387 }
0x1ab1   : > { %v3389_v5 = vsub.f32 %v3385_v58, %v3388_v4 }
0x1ab3   : > { %v3390_v6 = vmul.f32 1.442695, %v3389_v5 }
0x1ab4   : > { %v3784_v35 = vpop.permute.xlu0 %3783 }
0x1ab5   : > { %7099 = vpow2.f32 %v3390_v6 }
0x1abf   : > { %v7100_v7 = vpop.eup %7099 }
0x1ac0   : > { %v3392_v8 = vsel %vm613_vm2, %v7100_v7, 0.0 }
0x1ac1   : > { %3393 = vadd.xlane.f32.xlu1 %v3392_v8 }
0x1b24   : > { %v3551_v9 = vpop.xlane.xlu1 %3550 }
0x1b25   : > { %v3552_v10 = vsub.f32 %v3548_v62, %v3551_v9 }
0x1b27   : > { %v3553_v11 = vmul.f32 1.442695, %v3552_v10 }
0x1b29   : > { %7101 = vpow2.f32 %v3553_v11 }
0x1b33   : > { %v7102_v12 = vpop.eup %7101 }
0x1b34   : > { %v3555_v13 = vsel %vm613_vm2, %v7102_v12, 0.0 }
0x1b35   : > { %3556 = vadd.xlane.f32.xlu1 %v3555_v13  ;;  %v3083_v13 = vld [vmem:[#allocation2 + $0x178] sm:$0xff] }
0x1b46   : > { %3561 = vrot.lane.b32.xlu1 %v7768_v44, %s7243_s17 }
0x1b4a   : > { %3785 = vrot.lane.b32.xlu1 %v7776_v52, %s7244_s22 }
0x1b4e   : > { %v3394_v24 = vpop.xlane.xlu1 %3393 }
0x1b4f   : > { %7103 = vrcp.f32 %v3394_v24 }
0x1b59   : > { %v7104_v15 = vpop.eup %7103 }
0x1b5a   : > { %v3396_v17 = vmul.f32 %v7104_v15, %v7100_v7 }
0x1b5c   : > { %6563 = vmatmul.mubr.msk.f32.vlgmr.msra.gmra.mrb[36].mxu1 %vm613_vm2, %v3396_v17 }
0x1b5d   : > { %6572 = vmatprep.mubr.msk.f32.mxu1 %vm7241_vm0, %v7242_v1 }
0x1bc2   : > { %v3557_v14 = vpop.xlane.xlu1 %3556 }
0x1bc3   : > { %7105 = vrcp.f32 %v3557_v14 }
0x1bc6   : > { %v3562_v18 = vpop.permute.xlu1 %3561 }
0x1bc7   : > { %6571 = vmatpush3.msra.mxu1 %v3562_v18 }
0x1bc8   : > { %6580 = vmatprep.subr.mxu1 %v7242_v1 }
0x1bca   : > { %v3786_v30 = vpop.permute.xlu1 %3785 }
0x1bcd   : > { %v7106_v19 = vpop.eup %7105 }
0x1bce   : > { %v3559_v20 = vmul.f32 %v7106_v19, %v7102_v12 }
0x1bd0   : > { %6573 = vmatmul.mubr.msk.f32.vlgmr.msra.gmra.mrb[38].mxu1 %vm613_vm2, %v3559_v20  ;;  %v7139_v20 = vld [vmem:[%s7526_s24] sm:$0xff] }
0x1bd1   : > { %6581 = vmatpush3.msra.mxu1 %v3080_v26  ;;  %6582 = vmatprep.mubr.msk.f32.mxu1 %vm7241_vm0, %v7242_v1  ;;  %v4266_v26 = vrot.slane %v7764_v33, %v7515_v60 }
0x1bd2   : > { %6590 = vmatprep.subr.mxu1 %v7242_v1 }
0x1c2f   : > { %v3466_v27 = vpop.f32.mrb[36].mxu1 }
0x1c30   : > { %v6564_v28 = vpop.f32.mrb[37].mxu1  ;;  %6583 = vmatmul.mubr.msk.f32.vlgmr.msra.gmra.mrb[40].mxu1 %vm613_vm2, %v3466_v27 }
0x1c31   : > { %6592 = vmatprep.mubr.msk.f32.mxu1 %vm7241_vm0, %v7242_v1 }
0x1ca3   : > { %v3633_v29 = vpop.f32.mrb[38].mxu1 }
0x1ca4   : > { %v6574_v31 = vpop.f32.mrb[39].mxu1  ;;  %6578 = vmatmul.mubr.msk.f32.vlgmr.msra.gmra.mrb[38].mxu0 %vm613_vm2, %v3633_v29 }
0x1ca5   : > { %6586 = vmatpush3.xpose.msk.msra.mxu0 %vm613_vm2, %v3786_v30  ;;  %6587 = vmatprep.mubr.msk.f32.mxu0 %vm7241_vm0, %v7242_v1 }
0x1ca6   : > { %6595 = vmatprep.subr.mxu0 %v7242_v1 }
0x1ca8   : > { %6588 = vmatmul.mubr.msk.f32.vlgmr.msra.gmra.mrb[40].mxu0 %vm613_vm2, %v3784_v35 }
0x1ca9   : > { %6597 = vmatprep.mubr.msk.f32.mxu0 %vm7241_vm0, %v7242_v1 }
0x1d03   : > { %v3779_v36 = vpop.f32.mrb[40].mxu1 }
0x1d04   : > { %v6584_v38 = vpop.f32.mrb[41].mxu1 }
0x1d05   : > { %v4299_v38 = vld [vmem:[#allocation2 + $0x1a8] sm:$0xff] }
0x1d77   : > { %v3706_v39 = vpop.f32.mrb[38].mxu0 }
0x1d78   : > { %v3780_v32 = vadd.f32 %v3779_v36, %v3706_v39  ;;  %v6579_v42 = vpop.f32.mrb[39].mxu0  ;;  %v4298_v36 = vld [vmem:[#allocation2 + $0x1a0] sm:$0xff] }
0x1d79   : > { %v6875_v39 = vpack.c.bf16 %v4299_v38, %v4298_v36 }
0x1d7b   : > { %v3857_v43 = vpop.f32.mrb[40].mxu0 }
0x1d7c   : > { %v3861_v45 = vmul.f32 0.35355338, %v3857_v43  ;;  %v6589_v46 = vpop.f32.mrb[41].mxu0 }
0x1d7e   : > { %v3862_v48 = vsel %vm613_vm2, %v3861_v45, -inf }
0x1d7f   : > { %3863 = vmax.xlane.f32.xlu1 %v3862_v48  ;;  %v4300_v48 = vld [vmem:[#allocation2 + $0x1b0] sm:$0xff] }
0x1d90   : > { %3873 = vrot.lane.b32.xlu1 %v7768_v44, %s7244_s22 }
0x1d94   : > { %4023 = vrot.lane.b32.xlu1 %v7782_v54, %s8141_s16 }
0x1e0c   : > { %v3864_v49 = vpop.xlane.xlu1 %3863 }
0x1e0d   : > { %v3865_v51 = vsub.f32 %v3861_v45, %v3864_v49  ;;  %v4301_v49 = vld [vmem:[#allocation2 + $0x1b8] sm:$0xff] }
0x1e0f   : > { %v3866_v53 = vmul.f32 1.442695, %v3865_v51  ;;  %v6879_v51 = vpack.c.bf16 %v4301_v49, %v4300_v48  ;;  %v4471_v48 = vrot.slane %v7764_v33, %v7600_v16 }
0x1e10   : > { %v3874_v55 = vpop.permute.xlu1 %3873 }
0x1e11   : > { %7107 = vpow2.f32 %v3866_v53  ;;  %6591 = vmatpush3.msra.mxu1 %v3874_v55  ;;  %v4293_v53 = vld [vmem:[#allocation2 + $0x180] sm:$0xff]  ;;  %v4294_v55 = vld [vmem:[#allocation2 + $0x188] sm:$0xff] }
0x1e12   : > { %6600 = vmatprep.subr.mxu1 %v7242_v1 }
0x1e14   : > { %v4024_v61 = vpop.permute.xlu1 %4023 }
0x1e1b   : > { %v7108_v56 = vpop.eup %7107 }
0x1e1c   : > { %v3868_v57 = vsel %vm613_vm2, %v7108_v56, 0.0 }
0x1e1d   : > { %3869 = vadd.xlane.f32.xlu0 %v3868_v57  ;;  %v4295_v57 = vld [vmem:[#allocation2 + $0x190] sm:$0xff] }
0x1e33   : > { %4025 = vrot.lane.b32.xlu0 %v7776_v52, %s8141_s16  ;;  %v3082_v52 = vld [vmem:[#allocation2 + $0x170] sm:$0xff] }
0x1e34   : > { %6596 = vmatpush3.msra.mxu0 %v3082_v52  ;;  %v7872_v52 = vld [vmem:[%s8120_s3 + $0x18] sm:$0x7f] }
0x1e35   : > { %6605 = vmatprep.subr.mxu0 %v7242_v1 }
0x1eaa   : > { %v3870_v58 = vpop.xlane.xlu0 %3869 }
0x1eab   : > { %7109 = vrcp.f32 %v3870_v58  ;;  %v4296_v58 = vld [vmem:[#allocation2 + $0x198] sm:$0xff] }
0x1eae   : > { %v4026_v54 = vpop.permute.xlu0 %4025 }
0x1eb5   : > { %v7110_v59 = vpop.eup %7109 }
0x1eb6   : > { %v3872_v37 = vmul.f32 %v7110_v59, %v7108_v56  ;;  %v6870_v56 = vpack.c.bf16 %v4294_v55, %v4293_v53  ;;  %v6873_v59 = vpack.c.bf16 %v4296_v58, %v4295_v57 }
0x1eb8   : > { %6593 = vmatmul.mubr.msk.f32.vlgmr.msra.gmra.mrb[42].mxu1 %vm613_vm2, %v3872_v37 }
0x1eb9   : > { %6601 = vmatpush3.xpose.msk.msra.mxu1 %vm613_vm2, %v4026_v54  ;;  %6602 = vmatprep.mubr.msk.f32.mxu1 %vm7241_vm0, %v7242_v1 }
0x1eba   : > { %6610 = vmatprep.subr.mxu1 %v7242_v1 }
0x1ebc   : > { %6603 = vmatmul.mubr.msk.f32.vlgmr.msra.gmra.mrb[44].mxu1 %vm613_vm2, %v4024_v61 }
0x1ebd   : > { %6612 = vmatprep.mubr.msk.f32.mxu1 %vm7241_vm0, %v7242_v1  ;;  %6611 = vmatpush3.msra.mxu1 %v3083_v13 }
0x1ebe   : > { %6876 = vmatprep.subr.bf16.mxu1 %v6875_v39 }
0x1f8b   : > { %v3945_v62 = vpop.f32.mrb[42].mxu1 }
0x1f8c   : > { %v6594_v2 = vpop.f32.mrb[43].mxu1  ;;  %6598 = vmatmul.mubr.msk.f32.vlgmr.msra.gmra.mrb[42].mxu0 %vm613_vm2, %v3945_v62  ;;  %v4285_v62 = vrot.slane %v7872_v52, %v7425_v25 }
0x1f8d   : > { %6607 = vmatprep.mubr.msk.f32.mxu0 %vm7241_vm0, %v7242_v1 }
0x1f8f   : > { %v4097_v3 = vpop.f32.mrb[44].mxu1 }
0x1f90   : > { %v4101_v4 = vmul.f32 0.35355338, %v4097_v3  ;;  %v6604_v5 = vpop.f32.mrb[45].mxu1 }
0x1f92   : > { %v4102_v6 = vsel %vm613_vm2, %v4101_v4, -inf }
0x1f93   : > { %4103 = vmax.xlane.f32.xlu1 %v4102_v6 }
0x1fa4   : > { %4113 = vrot.lane.b32.xlu1 %v7768_v44, %s8141_s16 }
0x2020   : > { %v4104_v7 = vpop.xlane.xlu1 %4103 }
0x2021   : > { %v4105_v8 = vsub.f32 %v4101_v4, %v4104_v7  ;;  %v4290_v4 = vrot.slane %v7872_v52, %v7417_v23  ;;  %v4392_v7 = vrot.slane %v7764_v33, %v7554_v41 }
0x2023   : > { %v4106_v9 = vmul.f32 1.442695, %v4105_v8 }
0x2024   : > { %v4114_v10 = vpop.permute.xlu1 %4113 }
0x2025   : > { %7111 = vpow2.f32 %v4106_v9  ;;  %6606 = vmatpush3.msra.mxu0 %v4114_v10 }
0x2026   : > { %6869 = vmatprep.subr.bf16.mxu0 %v7240_v0 }
0x202f   : > { %v7112_v11 = vpop.eup %7111 }
0x2030   : > { %v4108_v12 = vsel %vm613_vm2, %v7112_v11, 0.0 }
0x2031   : > { %4109 = vadd.xlane.f32.xlu0 %v4108_v12 }
0x205f   : > { %v4018_v24 = vpop.f32.mrb[42].mxu0 }
0x2060   : > { %v4022_v15 = vadd.f32 %v4018_v24, %v3780_v32  ;;  %v6599_v17 = vpop.f32.mrb[43].mxu0 }
0x20be   : > { %v4110_v40 = vpop.xlane.xlu0 %4109 }
0x20bf   : > { %7113 = vrcp.f32 %v4110_v40 }
0x20c9   : > { %v7114_v44 = vpop.eup %7113 }
0x20ca   : > { %v4112_v14 = vmul.f32 %v7114_v44, %v7112_v11 }
0x20cc   : > { %6608 = vmatmul.mubr.msk.f32.vlgmr.msra.gmra.mrb[44].mxu0 %vm613_vm2, %v4112_v14 }
0x20cd   : > { %6623 = vmatprep.mubr.msk.f32.mxu0 %vm7241_vm0, %v7242_v1  ;;  %6871 = vmatpush3.bf16.msra.mxu0 %v6870_v56 }
0x20ce   : > { %6872 = vmatprep.subr.bf16.mxu0 %v7240_v0 }
0x20d1   : > { %6874 = vmatpush3.bf16.msra.mxu0 %v6873_v59 }
0x219f   : > { %v4185_v18 = vpop.f32.mrb[44].mxu0 }
0x21a0   : > { %v6609_v19 = vpop.f32.mrb[45].mxu0  ;;  %6613 = vmatmul.mubr.msk.f32.vlgmr.msra.gmra.mrb[46].mxu1 %vm613_vm2, %v4185_v18  ;;  %v4303_v18 = vld [vmem:[#allocation2 + $0x1c0] sm:$0xff] }
0x21a1   : > { %6634 = vmatprep.mubr.msk.f32.mxu1 %vm391_vm1, %v7139_v20  ;;  %6878 = vmatpush3.bf16.msra.mxu1 %v6875_v39  ;;  %v4304_v19 = vld [vmem:[#allocation2 + $0x1c8] sm:$0xff] }
0x21a2   : > { %6880 = vmatprep.subr.bf16.mxu1 %v6879_v51 }
0x21a5   : > { %6882 = vmatpush3.bf16.msra.mxu1 %v6879_v51 }
0x21a6   : > { %6891 = vmatprep.subr.bf16.mxu1 %v7240_v0 }
0x2273   : > { %v4258_v27 = vpop.f32.mrb[46].mxu1 }
0x2274   : > { %v4262_v28 = vadd.f32 %v4258_v27, %v4022_v15  ;;  %v6614_v29 = vpop.f32.mrb[47].mxu1  ;;  %v4315_v15 = vrot.slane %v7764_v33, %v7572_v50  ;;  %v4306_v27 = vld [vmem:[#allocation2 + $0x1d8] sm:$0xff] }
0x2276   : > { %v4267_v30 = vadd.f32 %v4266_v26, %v4262_v28  ;;  %v6883_v26 = vpack.c.bf16 %v4304_v19, %v4303_v18 }
0x2278   : > { %v4268_v31 = vadd.f32 %v4267_v30, %v7745_v21  ;;  %v7140_v21 = vld [vmem:[%s7526_s24 + $0x8] sm:$0xff]  ;;  %6884 = vmatprep.subr.bf16.mxu0 %v6883_v26 }
0x2279   : > { %6635 = vmatmul.mubr.msk.f32.vlgmr.msra.gmra.mrb[48].mxu1 %vm391_vm1, %v7140_v21 }
0x227a   : > { %v4269_v35 = vsel %vm391_vm1, %v4268_v31, 0.0  ;;  %6652 = vmatprep.mubr.msk.f32.mxu1 %vm7241_vm0, %v7242_v1 }
0x227b   : > { %4270 = vadd.xlane.f32.xlu0 %v4269_v35 }
0x2308   : > { %v4271_v32 = vpop.xlane.xlu0 %4270 }
0x2309   : > { %v4272_v42 = vmul.f32 0.03125, %v4271_v32 }
0x230b   : > { %v4273_v43 = vsub.f32 %v4268_v31, %v4272_v42 }
0x230d   : > { %v4274_v45 = vmul.f32 %v4273_v43, %v4273_v43 }
0x230f   : > { %v4275_v46 = vsel %vm391_vm1, %v4274_v45, 0.0 }
0x2310   : > { %4276 = vadd.xlane.f32.xlu0 %v4275_v46 }
0x234c   : > { %v6636_v8 = vpop.f32.mrb[48].mxu1 }
0x234d   : > { %v4465_v9 = vadd.f32 %v6636_v8, %v4392_v7  ;;  %v4459_v10 = vpop.f32.mrb[49].mxu1 }
0x234e   : > { %v4460_v25 = vadd.f32 %v4459_v10, %v4392_v7 }
0x2350   : > { %v6892_v11 = vpack.c.bf16 %v4465_v9, %v4460_v25  ;;  %v7885_v12 = vpack.i.bf16 %v4465_v9, %v4460_v25 }
0x2352   : > { %7032 = vrot.lane.b32.xlu1 %v7885_v12, %s7243_s17  ;;  %6894 = vmatpush3.bf16.xpose.msk.msra.mxu1 %vm7560_vm3, %v6892_v11 }
0x2353   : > { %6898 = vmatprep.subr.bf16.mxu1 %v7240_v0 }
0x239d   : > { %v4277_v37 = vpop.xlane.xlu0 %4276 }
0x239e   : > { %v4278_v54 = vmul.f32 0.03125, %v4277_v37 }
0x23a0   : > { %v4279_v61 = vadd.f32 1e-05, %v4278_v54 }
0x23a2   : > { %7115 = vrsqrt.f32 %v4279_v61 }
0x23ac   : > { %v7116_v2 = vpop.eup %7115 }
0x23ad   : > { %v4281_v3 = vmul.f32 %v7116_v2, %v4273_v43 }
0x23af   : > { %v4286_v5 = vmul.f32 %v4285_v62, %v4281_v3 }
0x23b1   : > { %v7878_v6 = vadd.f32 %v4290_v4, %v4286_v5  ;;  %v4308_v5 = vld [vmem:[#allocation2 + $0x1e0] sm:$0xff] }
0x23b3   : > { %6624 = vmatmul.mubr.msk.f32.vlgmr.msra.gmra.mrb[46].mxu0 %vm391_vm1, %v7878_v6 }
0x23b4   : > { %6645 = vmatprep.mubr.msk.f32.mxu0 %vm391_vm1, %v7139_v20  ;;  %v4305_v20 = vld [vmem:[#allocation2 + $0x1d0] sm:$0xff]  ;;  %6886 = vmatpush3.bf16.msra.mxu0 %v6883_v26 }
0x23b5   : > { %v6887_v28 = vpack.c.bf16 %v4306_v27, %v4305_v20 }
0x23b7   : > { %6888 = vmatprep.subr.bf16.mxu0 %v6887_v28 }
0x23b8   : > { %6890 = vmatpush3.bf16.msra.mxu0 %v6887_v28 }
0x23b9   : > { %6895 = vmatprep.subr.bf16.mxu0 %v7240_v0 }
0x23bb   : > { %6646 = vmatmul.mubr.msk.f32.vlgmr.msra.gmra.mrb[48].mxu0 %vm391_vm1, %v7140_v21 }
0x23bc   : > { %6659 = vmatprep.mubr.msk.f32.mxu0 %vm7241_vm0, %v7242_v1 }
0x23c4   : > { %v7033_v23 = vpop.permute.xlu1 %7032 }
0x23c5   : > { %v7035_v13 = vunpack.i.h.bf16 %v7033_v23  ;;  %v7034_v24 = vunpack.i.l.bf16 %v7033_v23  ;;  %v4309_v23 = vld [vmem:[#allocation2 + $0x1e8] sm:$0xff] }
0x23c7   : > { %v6899_v40 = vpack.c.bf16 %v7035_v13, %v7034_v24 }
0x2486   : > { %v4385_v17 = vpop.f32.mrb[46].mxu0 }
0x2487   : > { %v4386_v44 = vadd.f32 %v4385_v17, %v4315_v15  ;;  %v6625_v14 = vpop.f32.mrb[47].mxu0 }
0x2489   : > { %4711 = vrot.lane.b32.xlu0 %v4386_v44, %s7243_s17  ;;  %6653 = vmatmul.mubr.msk.f32.vlgmr.msra.gmra.mrb[50].mxu1 %vm613_vm2, %v4386_v44 }
0x248a   : > { %6901 = vmatpush3.bf16.xpose.msk.msra.mxu1 %vm7560_vm3, %v6899_v40  ;;  %6666 = vmatprep.mubr.msk.f32.mxu1 %vm7241_vm0, %v7242_v1 }
0x248b   : > { %6681 = vmatprep.subr.mxu1 %v7242_v1 }
0x248e   : > { %v6647_v49 = vpop.f32.mrb[48].mxu0 }
0x248f   : > { %v4538_v51 = vpop.f32.mrb[49].mxu0  ;;  %v4544_v21 = vadd.f32 %v6647_v49, %v4471_v48 }
0x2490   : > { %v4539_v53 = vadd.f32 %v4538_v51, %v4471_v48 }
0x2492   : > { %v7914_v55 = vpack.i.bf16 %v4544_v21, %v4539_v53  ;;  %v6896_v58 = vpack.c.bf16 %v4544_v21, %v4539_v53 }
0x2494   : > { %6897 = vmatpush3.bf16.msra.mxu0 %v6896_v58 }
0x2495   : > { %6902 = vmatprep.subr.bf16.mxu0 %v7240_v0 }
0x24fb   : > { %v4712_v29 = vpop.permute.xlu0 %4711 }
0x24fc   : > { %6667 = vmatmul.mubr.msk.f32.vlgmr.msra.gmra.mrb[52].mxu1 %vm613_vm2, %v4712_v29 }
0x24fd   : > { %6683 = vmatprep.mubr.msk.f32.mxu1 %vm7241_vm0, %v7242_v1  ;;  %6682 = vmatpush3.msra.mxu1 %v4308_v5 }
0x24fe   : > { %6909 = vmatprep.subr.bf16.mxu1 %v7240_v0 }
0x255c   : > { %v4622_v30 = vpop.f32.mrb[50].mxu1 }
0x255d   : > { %v4626_v31 = vmul.f32 0.35355338, %v4622_v30  ;;  %v6654_v35 = vpop.f32.mrb[51].mxu1 }
0x255f   : > { %v4627_v36 = vsel %vm1939_vm4, %v4626_v31, -inf }
0x2560   : > { %4628 = vmax.xlane.f32.xlu1 %v4627_v36 }
0x25cf   : > { %v4789_v38 = vpop.f32.mrb[52].mxu1 }
0x25d0   : > { %v4793_v39 = vmul.f32 0.35355338, %v4789_v38  ;;  %v6668_v32 = vpop.f32.mrb[53].mxu1 }
0x25d2   : > { %v4794_v42 = vsel %vm1939_vm4, %v4793_v39, -inf }
0x25d3   : > { %4795 = vmax.xlane.f32.xlu0 %v4794_v42 }
0x25e9   : > { %7042 = vrot.lane.b32.xlu0 %v7885_v12, %s7244_s22 }
0x25ed   : > { %v4629_v43 = vpop.xlane.xlu1 %4628 }
0x25ee   : > { %v4630_v45 = vsub.f32 %v4626_v31, %v4629_v43 }
0x25f0   : > { %v4631_v46 = vmul.f32 1.442695, %v4630_v45 }
0x25f2   : > { %7117 = vpow2.f32 %v4631_v46 }
0x25fc   : > { %v7118_v56 = vpop.eup %7117 }
0x25fd   : > { %v4633_v57 = vsel %vm1939_vm4, %v7118_v56, 0.0 }
0x25fe   : > { %4634 = vadd.xlane.f32.xlu1 %v4633_v57 }
0x2660   : > { %v4796_v59 = vpop.xlane.xlu0 %4795 }
0x2661   : > { %v4797_v37 = vsub.f32 %v4793_v39, %v4796_v59 }
0x2663   : > { %v4798_v54 = vmul.f32 1.442695, %v4797_v37 }
0x2664   : > { %v7043_v15 = vpop.permute.xlu0 %7042 }
0x2665   : > { %7119 = vpow2.f32 %v4798_v54  ;;  %v7045_v40 = vunpack.i.h.bf16 %v7043_v15 }
0x266f   : > { %v7120_v61 = vpop.eup %7119 }
0x2670   : > { %v4800_v62 = vsel %vm1939_vm4, %v7120_v61, 0.0 }
0x2671   : > { %4801 = vadd.xlane.f32.xlu1 %v4800_v62 }
0x2682   : > { %7037 = vrot.lane.b32.xlu1 %v7914_v55, %s7243_s17  ;;  %s5858_s17 = scalar_lea.sflag [#allocation4], %s351_s26 }
0x2686   : > { %5032 = vrot.lane.b32.xlu1 %v4386_v44, %s7244_s22 }
0x268a   : > { %7047 = vrot.lane.b32.xlu1 %v7885_v12, %s8141_s16 }
0x268b   : > { %v4635_v2 = vpop.xlane.xlu1 %4634 }
0x268c   : > { %7121 = vrcp.f32 %v4635_v2 }
0x268e   : > { %5279 = vrot.lane.b32.xlu1 %v4386_v44, %s8141_s16  ;;  %v7044_v44 = vunpack.i.l.bf16 %v7043_v15  ;;  %v4311_v15 = vld [vmem:[#allocation2 + $0x1f8] sm:$0xff] }
0x2690   : > { %v6906_v14 = vpack.c.bf16 %v7045_v40, %v7044_v44 }
0x2696   : > { %v7122_v3 = vpop.eup %7121 }
0x2697   : > { %v4637_v4 = vmul.f32 %v7122_v3, %v7118_v56 }
0x2699   : > { %6660 = vmatmul.mubr.msk.f32.vlgmr.msra.gmra.mrb[50].mxu0 %vm1939_vm4, %v4637_v4 }
0x269a   : > { %6673 = vmatprep.mubr.msk.f32.mxu0 %vm7241_vm0, %v7242_v1 }
0x26fe   : > { %v4802_v7 = vpop.xlane.xlu1 %4801 }
0x26ff   : > { %7123 = vrcp.f32 %v4802_v7 }
0x2702   : > { %v7038_v8 = vpop.permute.xlu1 %7037 }
0x2703   : > { %v7040_v9 = vunpack.i.h.bf16 %v7038_v8  ;;  %v7039_v10 = vunpack.i.l.bf16 %v7038_v8  ;;  %v4310_v8 = vld [vmem:[#allocation2 + $0x1f0] sm:$0xff] }
0x2705   : > { %v6903_v25 = vpack.c.bf16 %v7040_v9, %v7039_v10 }
0x2706   : > { %v5033_v17 = vpop.permute.xlu1 %5032 }
0x2707   : > { %6904 = vmatpush3.bf16.msra.mxu0 %v6903_v25 }
0x2708   : > { %6676 = vmatprep.subr.mxu0 %v7242_v1 }
0x2709   : > { %v7124_v11 = vpop.eup %7123 }
0x270a   : > { %v4804_v12 = vmul.f32 %v7124_v11, %v7120_v61  ;;  %v7048_v19 = vpop.permute.xlu1 %7047 }
0x270b   : > { %v7050_v26 = vunpack.i.h.bf16 %v7048_v19  ;;  %v7049_v27 = vunpack.i.l.bf16 %v7048_v19  ;;  %v5529_v19 = vrot.slane %v7764_v33, %v2841_v63  ;;  %v6058_v63 = vld [vmem:[%s8121_s4 + $0x28] sm:$0xff] }
0x270c   : > { %6674 = vmatmul.mubr.msk.f32.vlgmr.msra.gmra.mrb[52].mxu0 %vm1939_vm4, %v4804_v12  ;;  %v6920_v33 = vpack.c.bf16 %v6058_v63, %v6057_v22 }
0x270d   : > { %6677 = vmatpush3.msra.mxu0 %v4309_v23  ;;  %6678 = vmatprep.mubr.msk.f32.mxu0 %vm7241_vm0, %v7242_v1  ;;  %v6913_v28 = vpack.c.bf16 %v7050_v26, %v7049_v27 }
0x270e   : > { %6905 = vmatprep.subr.bf16.mxu0 %v7240_v0  ;;  %v5280_v29 = vpop.permute.xlu1 %5279 }
0x276c   : > { %v4707_v13 = vpop.f32.mrb[50].mxu0 }
0x276d   : > { %v6661_v24 = vpop.f32.mrb[51].mxu0  ;;  %6684 = vmatmul.mubr.msk.f32.vlgmr.msra.gmra.mrb[54].mxu1 %vm613_vm2, %v4707_v13 }
0x276e   : > { %6697 = vmatprep.mubr.msk.f32.mxu1 %vm7241_vm0, %v7242_v1 }
0x27df   : > { %v4882_v18 = vpop.f32.mrb[52].mxu0 }
0x27e0   : > { %v6675_v20 = vpop.f32.mrb[53].mxu0  ;;  %6679 = vmatmul.mubr.msk.f32.vlgmr.msra.gmra.mrb[54].mxu0 %vm613_vm2, %v4882_v18 }
0x27e1   : > { %6908 = vmatpush3.bf16.xpose.msk.msra.mxu0 %vm7560_vm3, %v6906_v14  ;;  %6690 = vmatprep.mubr.msk.f32.mxu0 %vm7241_vm0, %v7242_v1 }
0x27e2   : > { %6912 = vmatprep.subr.bf16.mxu0 %v7240_v0 }
0x27e8   : > { %6691 = vmatmul.mubr.msk.f32.vlgmr.msra.gmra.mrb[56].mxu0 %vm613_vm2, %v5033_v17 }
0x27e9   : > { %6915 = vmatpush3.bf16.xpose.msk.msra.mxu0 %vm7560_vm3, %v6913_v28  ;;  %6709 = vmatprep.mubr.msk.f32.mxu0 %vm7241_vm0, %v7242_v1 }
0x27ea   : > { %6919 = vmatprep.subr.bf16.mxu0 %v7240_v0 }
0x27f0   : > { %6710 = vmatmul.mubr.msk.f32.vlgmr.msra.gmra.mrb[58].mxu0 %vm613_vm2, %v5280_v29 }
0x27f1   : > { %6732 = vmatprep.mubr.msk.f32.mxu0 %vm7241_vm0, %v7242_v1  ;;  %6921 = vmatpush3.bf16.msra.mxu0 %v6920_v33 }
0x27f2   : > { %6922 = vmatprep.subr.bf16.mxu0 %v7240_v0 }
0x2840   : > { %v5028_v30 = vpop.f32.mrb[54].mxu1 }
0x2841   : > { %v6685_v31 = vpop.f32.mrb[55].mxu1 }
0x28b3   : > { %v4955_v35 = vpop.f32.mrb[54].mxu0 }
0x28b4   : > { %v7952_v36 = vadd.f32 %v5028_v30, %v4955_v35  ;;  %v6680_v38 = vpop.f32.mrb[55].mxu0 }
0x28bb   : > { %v5110_v39 = vpop.f32.mrb[56].mxu0 }
0x28bc   : > { %v5114_v47 = vmul.f32 0.35355338, %v5110_v39  ;;  %v6692_v32 = vpop.f32.mrb[57].mxu0 }
0x28be   : > { %v5115_v42 = vsel %vm1939_vm4, %v5114_v47, -inf }
0x28bf   : > { %5116 = vmax.xlane.f32.xlu0 %v5115_v42  ;;  %v6063_v42 = vld [vmem:[%s8122_s5 + $0x40] sm:$0xff] }
0x28c3   : > { %v5357_v43 = vpop.f32.mrb[58].mxu0 }
0x28c4   : > { %v6711_v45 = vpop.f32.mrb[59].mxu0  ;;  %v5361_v58 = vmul.f32 0.35355338, %v5357_v43  ;;  %v6064_v43 = vld [vmem:[%s8122_s5 + $0x48] sm:$0xff] }
0x28c5   : > { %v6065_v45 = vld [vmem:[%s8122_s5 + $0x50] sm:$0xff] }
0x28c6   : > { %v5362_v37 = vsel %vm1939_vm4, %v5361_v58, -inf }
0x28d5   : > { %7052 = vrot.lane.b32.xlu0 %v7914_v55, %s7244_s22  ;;  %s7169_s22 = scalar_lea.vmem %s8077_s14, 128 }
0x28d6   : > { %p7170_p6 = scmp.ne.s32.totalorder %s8077_s14, %s7169_s22  ;;  %p7177_p3 = scmp.lt.s32.totalorder %s7175_s23, %s7169_s22 }
0x28d8   : > { %p7171_p10 = pnand %p7170_p6, %p8142_p9  ;;  %p7178_p4 = por %p7177_p3, %p7176_p2 }
0x28da   : > { %p7172_p12 = pneg %p7171_p10 }
0x28dc   : > { %p7179_p7 = pnand %p7178_p4, %p7172_p12 }
0x294c   : > { %v5117_v46 = vpop.xlane.xlu0 %5116 }
0x294d   : > { %v5118_v48 = vsub.f32 %v5114_v47, %v5117_v46  ;;  %v6060_v47 = vld [vmem:[%s8121_s4 + $0x38] sm:$0xff]  ;;  %v6926_v46 = vpack.c.bf16 %v6064_v43, %v6063_v42  ;;  %v6073_v42 = vld [vmem:[%s8124_s7 + $0x1] ss:$0 sm:$0xff] }
0x294f   : > { %v5119_v49 = vmul.f32 1.442695, %v5118_v48  ;;  %v6066_v48 = vld [vmem:[%s8122_s5 + $0x58] sm:$0xff] }
0x2950   : > { %v7053_v51 = vpop.permute.xlu0 %7052 }
0x2951   : > { %7125 = vpow2.f32 %v5119_v49  ;;  %v7055_v21 = vunpack.i.h.bf16 %v7053_v51  ;;  %v7054_v53 = vunpack.i.l.bf16 %v7053_v51  ;;  %v6929_v49 = vpack.c.bf16 %v6066_v48, %v6065_v45  ;;  %v6067_v51 = vld [vmem:[%s8122_s5 + $0x60] sm:$0xff] }
0x2953   : > { %v6910_v56 = vpack.c.bf16 %v7055_v21, %v7054_v53  ;;  %v6068_v21 = vld [vmem:[%s8122_s5 + $0x68] sm:$0xff] }
0x2954   : > { %v6932_v53 = vpack.c.bf16 %v6068_v21, %v6067_v51 }
0x2955   : > { %6911 = vmatpush3.bf16.msra.mxu1 %v6910_v56 }
0x2956   : > { %6700 = vmatprep.subr.mxu1 %v7242_v1 }
0x295b   : > { %v7126_v57 = vpop.eup %7125 }
0x295c   : > { %v5121_v59 = vsel %vm1939_vm4, %v7126_v57, 0.0 }
0x295d   : > { %5122 = vadd.xlane.f32.xlu1 %v5121_v59  ;;  %v5548_v59 = vrot.slane %v7872_v52, %v7443_v34  ;;  %v6070_v34 = vld [vmem:[%s8122_s5 + $0x78] sm:$0xff] }
0x2961   : > { %5363 = vmax.xlane.f32.xlu1 %v5362_v37 }
0x29ea   : > { %v5123_v54 = vpop.xlane.xlu1 %5122 }
0x29eb   : > { %7127 = vrcp.f32 %v5123_v54 }
0x29ee   : > { %v5364_v61 = vpop.xlane.xlu1 %5363 }
0x29ef   : > { %v5365_v62 = vsub.f32 %v5361_v58, %v5364_v61  ;;  %v5553_v61 = vrot.slane %v7872_v52, %v7515_v60  ;;  %v6061_v60 = vld [vmem:[%s8123_s6 + $0x1] ss:$0 sm:$0xff] }
0x29f1   : > { %v5366_v2 = vmul.f32 1.442695, %v5365_v62 }
0x29f3   : > { %7129 = vpow2.f32 %v5366_v2 }
0x29f5   : > { %v7128_v3 = vpop.eup %7127 }
0x29f6   : > { %v5125_v4 = vmul.f32 %v7128_v3, %v7126_v57  ;;  %v6069_v3 = vld [vmem:[%s8122_s5 + $0x70] sm:$0xff] }
0x29f8   : > { %6698 = vmatmul.mubr.msk.f32.vlgmr.msra.gmra.mrb[56].mxu1 %vm1939_vm4, %v5125_v4  ;;  %v6935_v4 = vpack.c.bf16 %v6070_v34, %v6069_v3 }
0x29f9   : > { %6702 = vmatprep.mubr.msk.f32.mxu1 %vm7241_vm0, %v7242_v1  ;;  %6701 = vmatpush3.msra.mxu1 %v4310_v8 }
0x29fa   : > { %6916 = vmatprep.subr.bf16.mxu1 %v7240_v0 }
0x29fd   : > { %v7130_v5 = vpop.eup %7129 }
0x29fe   : > { %v5368_v7 = vsel %vm1939_vm4, %v7130_v5, 0.0 }
0x29ff   : > { %5369 = vadd.xlane.f32.xlu1 %v5368_v7 }
0x2a10   : > { %7057 = vrot.lane.b32.xlu1 %v7914_v55, %s8141_s16 }
0x2a8c   : > { %v5370_v9 = vpop.xlane.xlu1 %5369 }
0x2a8d   : > { %7131 = vrcp.f32 %v5370_v9 }
0x2a90   : > { %v7058_v10 = vpop.permute.xlu1 %7057 }
0x2a91   : > { %v7060_v25 = vunpack.i.h.bf16 %v7058_v10  ;;  %v7059_v11 = vunpack.i.l.bf16 %v7058_v10 }
0x2a93   : > { %v6917_v23 = vpack.c.bf16 %v7060_v25, %v7059_v11 }
0x2a97   : > { %v7132_v12 = vpop.eup %7131 }
0x2a98   : > { %v5372_v55 = vmul.f32 %v7132_v12, %v7130_v5 }
0x2acb   : > { %v5201_v13 = vpop.f32.mrb[56].mxu1 }
0x2acc   : > { %v6699_v24 = vpop.f32.mrb[57].mxu1  ;;  %6703 = vmatmul.mubr.msk.f32.vlgmr.msra.gmra.mrb[58].mxu1 %vm613_vm2, %v5201_v13 }
0x2acd   : > { %6918 = vmatpush3.bf16.msra.mxu1 %v6917_v23  ;;  %6716 = vmatprep.mubr.msk.f32.mxu1 %vm7241_vm0, %v7242_v1 }
0x2ace   : > { %6719 = vmatprep.subr.mxu1 %v7242_v1 }
0x2ad0   : > { %6717 = vmatmul.mubr.msk.f32.vlgmr.msra.gmra.mrb[60].mxu1 %vm1939_vm4, %v5372_v55 }
0x2ad1   : > { %6721 = vmatprep.mubr.msk.f32.mxu1 %vm7241_vm0, %v7242_v1  ;;  %6720 = vmatpush3.msra.mxu1 %v4311_v15 }
0x2ad2   : > { %6925 = vmatprep.subr.bf16.mxu1 %v7240_v0 }
0x2b9f   : > { %v5274_v17 = vpop.f32.mrb[58].mxu1 }
0x2ba0   : > { %v5278_v40 = vadd.f32 %v5274_v17, %v7952_v36  ;;  %v6704_v44 = vpop.f32.mrb[59].mxu1 }
0x2ba3   : > { %v5448_v14 = vpop.f32.mrb[60].mxu1 }
0x2ba4   : > { %v6718_v18 = vpop.f32.mrb[61].mxu1  ;;  %6722 = vmatmul.mubr.msk.f32.vlgmr.msra.gmra.mrb[62].mxu1 %vm613_vm2, %v5448_v14 }
0x2ba5   : > { %6751 = vmatprep.mubr.msk.f32.mxu1 %vm7241_vm0, %v7242_v1  ;;  %6927 = vmatpush3.bf16.msra.mxu1 %v6926_v46  ;;  %v6074_v46 = vld [vmem:[%s8125_s8 + $0x20] ss:$0 sm:$0xff] }
0x2ba6   : > { %6928 = vmatprep.subr.bf16.mxu1 %v7240_v0 }
0x2ba9   : > { %6930 = vmatpush3.bf16.msra.mxu1 %v6929_v49 }
0x2baa   : > { %6931 = vmatprep.subr.bf16.mxu1 %v7240_v0 }
0x2bad   : > { %6933 = vmatpush3.bf16.msra.mxu1 %v6932_v53 }
0x2bae   : > { %6934 = vmatprep.subr.bf16.mxu1 %v7240_v0 }
0x2bb1   : > { %6936 = vmatpush3.bf16.msra.mxu1 %v6935_v4 }
0x2c77   : > { %v5521_v20 = vpop.f32.mrb[62].mxu1 }
0x2c78   : > { %v5525_v26 = vadd.f32 %v5521_v20, %v5278_v40  ;;  %v6723_v27 = vpop.f32.mrb[63].mxu1  ;;  %v5747_v20 = vrot.slane %v7872_v52, %v7554_v41  ;;  %v5775_v41 = vld [vmem:[%s8125_s8 + $0x8] sm:$0xff] }
0x2c7a   : > { %v5530_v28 = vadd.f32 %v5529_v19, %v5525_v26 }
0x2c7c   : > { %v5531_v29 = vadd.f32 %v5530_v28, %v7878_v6  ;;  %v6059_v6 = vld [vmem:[%s8121_s4 + $0x30] sm:$0xff] }
0x2c7d   : > { %v6923_v32 = vpack.c.bf16 %v6060_v47, %v6059_v6 }
0x2c7e   : > { %v5532_v30 = vsel %vm391_vm1, %v5531_v29, 0.0 }
0x2c7f   : > { %5533 = vadd.xlane.f32.xlu0 %v5532_v30  ;;  %6924 = vmatpush3.bf16.msra.mxu0 %v6923_v32 }
0x2c80   : > { %6937 = vmatprep.subr.bf16.mxu0 %v7240_v0 }
0x2d0c   : > { %v5534_v31 = vpop.xlane.xlu0 %5533 }
0x2d0d   : > { %v5535_v35 = vmul.f32 0.03125, %v5534_v31 }
0x2d0f   : > { %v5536_v36 = vsub.f32 %v5531_v29, %v5535_v35 }
0x2d11   : > { %v5537_v38 = vmul.f32 %v5536_v36, %v5536_v36 }
0x2d13   : > { %v5538_v39 = vsel %vm391_vm1, %v5537_v38, 0.0  ;;  %v5776_v38 = vld [vmem:[%s8125_s8 + $0x10] sm:$0xff] }
0x2d14   : > { %5539 = vadd.xlane.f32.xlu1 %v5538_v39  ;;  %v5777_v39 = vld [vmem:[%s8125_s8 + $0x18] sm:$0xff] }
0x2d15   : > { %v6941_v22 = vpack.c.bf16 %v5777_v39, %v5776_v38 }
0x2da1   : > { %v5540_v56 = vpop.xlane.xlu1 %5539 }
0x2da2   : > { %v5541_v57 = vmul.f32 0.03125, %v5540_v56 }
0x2da4   : > { %v5542_v58 = vadd.f32 1e-05, %v5541_v57 }
0x2da6   : > { %7133 = vrsqrt.f32 %v5542_v58 }
0x2db0   : > { %v7134_v37 = vpop.eup %7133 }
0x2db1   : > { %v5544_v54 = vmul.f32 %v7134_v37, %v5536_v36 }
0x2db3   : > { %v5549_v62 = vmul.f32 %v5548_v59, %v5544_v54 }
0x2db5   : > { %v5554_v2 = vadd.f32 %v5553_v61, %v5549_v62 }
0x2db7   : > { %6733 = vmatmul.mubr.msk.f32.vlgmr.msra.gmra.mrb[60].mxu0 %vm391_vm1, %v5554_v2 }
0x2db8   : > { %6762 = vmatprep.mubr.msk.f32.mxu0 %vm7241_vm0, %v7242_v1  ;;  %v5651_v1 = vrot.slane %v7872_v52, %v7600_v16  ;;  %v5742_v16 = vrot.slane %v7872_v52, %v7572_v50  ;;  %v5774_v50 = vld [vmem:[%s8125_s8] sm:$0xff] }
0x2db9   : > { %v6938_v52 = vpack.c.bf16 %v5775_v41, %v5774_v50 }
0x2dbb   : > { %6939 = vmatpush3.bf16.msra.mxu0 %v6938_v52 }
0x2dbc   : > { %6940 = vmatprep.subr.bf16.mxu0 %v7240_v0  ;;  %v6072_v0 = vld [vmem:[%s8124_s7] ss:$0 sm:$0xff] }
0x2dbf   : > { %6942 = vmatpush3.bf16.msra.mxu0 %v6941_v22 }
0x2e8a   : > { %v5634_v5 = vpop.f32.mrb[60].mxu0 }
0x2e8b   : > { %v5635_v7 = vadd.f32 %v6061_v60, %v5634_v5  ;;  %v6734_v8 = vpop.f32.mrb[61].mxu0 }
0x2e8d   : > { %v5638_v9 = vmax.f32 %v5635_v7, 0.0 }
0x2e8f   : > { %6752 = vmatmul.mubr.msk.f32.vlgmr.msra.gmra.mrb[64].mxu1 %vm2963_vm5, %v5638_v9 }
0x2f62   : > { %v5721_v10 = vpop.f32.mrb[64].mxu1 }
0x2f63   : > { %v5722_v25 = vadd.f32 %v5721_v10, %v5651_v1  ;;  %v6753_v11 = vpop.f32.mrb[65].mxu1 }
0x2f65   : > { %v5725_v12 = vadd.f32 %v5722_v25, %v5554_v2 }
0x2f67   : > { %v5726_v23 = vsel %vm391_vm1, %v5725_v12, 0.0 }
0x2f68   : > { %5727 = vadd.xlane.f32.xlu0 %v5726_v23 }
0x2ff5   : > { %v5728_v13 = vpop.xlane.xlu0 %5727 }
0x2ff6   : > { %v5729_v24 = vmul.f32 0.03125, %v5728_v13 }
0x2ff8   : > { %v5730_v55 = vsub.f32 %v5725_v12, %v5729_v24 }
0x2ffa   : > { %v5731_v15 = vmul.f32 %v5730_v55, %v5730_v55 }
0x2ffc   : > { %v5732_v17 = vsel %vm391_vm1, %v5731_v15, 0.0 }
0x2ffd   : > { %5733 = vadd.xlane.f32.xlu0 %v5732_v17 }
0x308a   : > { %v5734_v40 = vpop.xlane.xlu0 %5733 }
0x308b   : > { %v5735_v44 = vmul.f32 0.03125, %v5734_v40 }
0x308d   : > { %v5736_v14 = vadd.f32 1e-05, %v5735_v44 }
0x308f   : > { %7135 = vrsqrt.f32 %v5736_v14 }
0x3099   : > { %v7136_v18 = vpop.eup %7135 }
0x309a   : > { %v5738_v19 = vmul.f32 %v7136_v18, %v5730_v55 }
0x309c   : > { %v5743_v26 = vmul.f32 %v5742_v16, %v5738_v19 }
0x309e   : > { %v5748_v27 = vadd.f32 %v5747_v20, %v5743_v26 }
0x30a0   : > { %v5751_v28 = vsel %vm391_vm1, %v5748_v27, 0.0 }
0x30a1   : > { %5752 = vadd.xlane.f32.xlu0 %v5751_v28 }
0x312e   : > { %v5753_v29 = vpop.xlane.xlu0 %5752 }
0x312f   : > { %v5754_v30 = vmul.f32 0.03125, %v5753_v29 }
0x3131   : > { %v5755_v31 = vsub.f32 %v5748_v27, %v5754_v30 }
0x3133   : > { %v5756_v35 = vmul.f32 %v5755_v31, %v5755_v31 }
0x3135   : > { %v5757_v36 = vsel %vm391_vm1, %v5756_v35, 0.0 }
0x3136   : > { %5758 = vadd.xlane.f32.xlu0 %v5757_v36 }
0x31c3   : > { %v5759_v63 = vpop.xlane.xlu0 %5758 }
0x31c4   : > { %v5760_v33 = vmul.f32 0.03125, %v5759_v63 }
0x31c6   : > { %v5761_v6 = vadd.f32 1e-05, %v5760_v33 }
0x31c8   : > { %7137 = vrsqrt.f32 %v5761_v6 }
0x31d2   : > { %v7138_v47 = vpop.eup %7137 }
0x31d3   : > { %v5763_v32 = vmul.f32 %v7138_v47, %v5755_v31 }
0x31d5   : > { %v5768_v43 = vmul.f32 %v6072_v0, %v5763_v32 }
0x31d7   : > { %v5773_v45 = vadd.f32 %v6073_v42, %v5768_v43 }
0x31d9   : > { %6763 = vmatmul.mubr.msk.f32.vlgmr.msra.gmra.mrb[62].mxu0 %vm391_vm1, %v5773_v45 }
0x32ac   : > { %v5852_v48 = vpop.f32.mrb[62].mxu0 }
0x32ad   : > { %v5853_v49 = vadd.f32 %v6074_v46, %v5852_v48  ;;  %v6764_v51 = vpop.f32.mrb[63].mxu0 }
0x32af   : > { %5856 = vst [vmem:[%s353_s29] sm:$0xff] %v5853_v49 }
0x32b0   : > { %7182 = shalt.err (!%p7179_p7)
}
0x32b1   : > { %s7183_s26 = scalar_lea.hbm %s8075_s25, 128  ;;  %s7187_s29 = scalar_lea.hbm %s8126_s9, 256 }
0x32b2   : > { %p7184_p8 = scmp.ne.s32.totalorder %s8075_s25, %s7183_s26  ;;  %p7188_p1 = scmp.lt.u32.totalorder %s8075_s25, %s8126_s9 }
0x32b3   : > { %p7189_p0 = scmp.lt.u32.totalorder %s7187_s29, %s7183_s26  ;;  %p7191_p6 = scmp.lt.u32.totalorder %s7183_s26, %s8075_s25 }
0x32b4   : > { %p7185_p11 = pnand %p7184_p8, %p8142_p9 }
0x32b5   : > { %p7190_p5 = por %p7189_p0, %p7188_p1 }
0x32b6   : > { %p7186_p13 = pneg %p7185_p11 }
0x32b7   : > { %p7192_p10 = por %p7191_p6, %p7190_p5 }
0x32b9   : > { %p7193_p12 = pnand %p7192_p10, %p7186_p13 }
0x32bb   : > { %7196 = shalt.err (!%p7193_p12)
}
0x32bc   : > { %6947 = dma.vmem_to_hbm [thread:$0]  (%p8142_p9), %s8077_s14, 128, %s8075_s25, %s5858_s17  }
0x32bd PF: > { %p6959_p2 = scmp.ge.s32.totalorder %s7235_s12, 2  ;;  %s5883_s22 = sand.u32 1, %s7223_s30  }
0x32be   : > { %p8143_p3 = scmp.ne.s32.totalorder %s8133_s20, 0  ;;  %s5884_s13 = scalar_lea.sflag [#allocation4], %s5883_s22 }
0x32c0   : > { %p6954_p4 = pnand %p6959_p2, %p8143_p3 }
0x32c2   : > { %7218 = dma.done.wait (!%p6954_p4), %s5884_s13, 128  }
0x32c3   : > { %7220 = vsyncadd (!%p6954_p4), %s5884_s13, 4294967168  ;;  %p20_p7 = scmp.ge.s32.totalorder %s7322_s15, 4   ;;  %s8144_s30 = smov %s7227_s10 }
0x32c4   : > { %s8145_s10 = smov %s7231_s11  ;;  %s8146_s11 = smov %s7333_s18 }
0x32c5   : > { %s8147_s12 = smov %s7322_s15  ;;  %22 = sbr.rel (!%p20_p7) target bundleno = 4 (0x4), region = 117 }
0x32cc   :  { %5889 = vsyncpa [#allocation3], 1 }
0x32cd   :  { %5891 = vsyncpa [#allocation3 + $0x1], 1 }
0x32ce   :  { %5892 = vsyncpa [#allocation4], 1 }
0x32cf   :  { %5894 = vsyncpa [#allocation4 + $0x1], 1 }

</bundles_post_ra>
